<compile_context>
chip_gen: v6e
topology: v6e:2x2x1
jax: 0.10.0
libtpu: 0.0.40
codegen_flags: <defaults>
</compile_context>

<pallas_src>
import functools

import jax
import jax.numpy as jnp
from jax.experimental import pallas as pl
from jax.experimental.pallas import tpu as pltpu

HIGHEST = jax.lax.Precision.HIGHEST


# ----------------------------- Pallas kernel ---------------------------------

def _bigru_chunk_kernel(gi_ref, whh_ref, bhn_ref, out_ref, h_scr, *, unroll):
    """One time-chunk of a fused (both-directions) bidirectional GRU layer.

    Layout (H = hidden_dim; gate-major, direction-minor columns):
      gi_ref : (TL, B, 6H)  x @ W_ih^T + folded biases, cols [r_f,r_b,z_f,z_b,n_f,n_b];
                            the backward stream is already flipped in time.
      whh_ref: (2H, 6H)     block-diagonal W_hh^T for both directions (f32).
      bhn_ref: (1, 2H)      hidden bias of the n gate, [n_f | n_b].
      out_ref: (TL, B, 2H)  per-step hidden states [h_f | h_b] at kernel time idx.
      h_scr  : (B, 2H)      f32 scratch carrying h across time chunks only.
    """
    c = pl.program_id(0)

    @pl.when(c == 0)
    def _():
        h_scr[...] = jnp.zeros_like(h_scr)          # h0 = 0 for both directions

    TL, B, _ = gi_ref.shape
    H2 = h_scr.shape[-1]                            # 2 * hidden_dim

    whh = whh_ref[...]                              # loaded once per chunk
    bhn = jnp.broadcast_to(bhn_ref[...].astype(jnp.float32), (B, H2))  # hoisted

    def step(i, h):
        gi = gi_ref[i].astype(jnp.float32)          # (B, 6H), f32 gate math
        # TODO(synk): if the bundle dump shows per-step W_hh re-streaming, hold the
        # loop-invariant RHS in the MXU via pltpu.matmul_push_rhs/acc_lhs/pop.
        gh = jnp.dot(h, whh, preferred_element_type=jnp.float32)      # (B, 6H)
        r = jax.nn.sigmoid(gi[:, 0:H2] + gh[:, 0:H2])
        z = jax.nn.sigmoid(gi[:, H2:2 * H2] + gh[:, H2:2 * H2])
        n = jnp.tanh(gi[:, 2 * H2:3 * H2] + r * (gh[:, 2 * H2:3 * H2] + bhn))
        h_new = (1.0 - z) * n + z * h
        out_ref[i] = h_new.astype(out_ref.dtype)
        return h_new

    # h stays in vregs across the chunk; scratch only at chunk boundaries.
    h_final = jax.lax.fori_loop(0, TL, step, h_scr[...], unroll=unroll)
    h_scr[...] = h_final


def bigru_layer(gi, whh_block, bhn, *, chunk):
    """gi:(Lp,B,6H) [bwd stream pre-flipped], whh_block:(2H,6H), bhn:(1,2H)
       -> (Lp,B,2H) fused per-kernel-timestep hidden states."""
    Lp, B, G6 = gi.shape
    H2 = whh_block.shape[0]
    assert Lp % chunk == 0
    n_chunks = Lp // chunk
    unroll = next(u for u in (8, 4, 2, 1) if chunk % u == 0)

    itemsize = jnp.dtype(gi.dtype).itemsize
    need = (2 * chunk * B * (G6 + H2) * itemsize            # double-buffered gi/out
            + (H2 * G6 + H2 + B * H2) * 4)                  # weights + bias + scratch
    vmem_limit = int(min(100 << 20, max(32 << 20, 2 * need)))

    return pl.pallas_call(
        functools.partial(_bigru_chunk_kernel, unroll=unroll),
        out_shape=jax.ShapeDtypeStruct((Lp, B, H2), gi.dtype),
        grid=(n_chunks,),                                   # time-chunk axis
        in_specs=[
            pl.BlockSpec((chunk, B, G6), lambda c: (c, 0, 0)),
            pl.BlockSpec((H2, G6), lambda c: (0, 0)),
            pl.BlockSpec((1, H2), lambda c: (0, 0)),
        ],
        out_specs=pl.BlockSpec((chunk, B, H2), lambda c: (c, 0, 0)),
        scratch_shapes=[pltpu.VMEM((B, H2), jnp.float32)],
        compiler_params=pltpu.CompilerParams(
            dimension_semantics=("arbitrary",),             # sequential recurrence
            vmem_limit_bytes=vmem_limit),
    )(gi, whh_block, bhn)


# ------------------------------ model wrapper ---------------------------------

def _round_up(n, m):
    return -(-n // m) * m


def _interleave_gates(a_f, a_b):
    """Per-direction [r,z,n] -> gate-major/dir-minor [r_f,r_b,z_f,z_b,n_f,n_b]."""
    *lead, g3 = a_f.shape
    H = g3 // 3
    stacked = jnp.stack([a_f.reshape(*lead, 3, H),
                         a_b.reshape(*lead, 3, H)], axis=-2)   # (..., 3, 2, H)
    return stacked.reshape(*lead, 6 * H)


def _block_diag_whh(whh):
    """(2,H,3H) W_hh^T per direction -> (2H,6H) block matrix matching the fused
    [h_f|h_b] rows x [r_f,r_b,z_f,z_b,n_f,n_b] columns layout."""
    H = whh.shape[1]
    blk = jnp.zeros((2 * H, 6 * H), whh.dtype)
    for d in range(2):
        for g in range(3):
            blk = blk.at[d * H:(d + 1) * H,
                         (2 * g + d) * H:(2 * g + d + 1) * H].set(
                whh[d, :, g * H:(g + 1) * H])
    return blk


def _layer_gi(x, wih, b_fold, storage_dtype):
    """Hoisted input projection (one XLA GEMM per direction) for all timesteps.
    x:(L,B,Din) time-ordered, wih:(2,Din,3H), b_fold:(2,3H) -> (L,B,6H) with the
    backward stream already flipped in time (monotone kernel time index)."""
    gi_f = jnp.einsum("lbi,ig->lbg", x, wih[0], precision=HIGHEST) + b_fold[0]
    gi_b = jnp.einsum("lbi,ig->lbg", x, wih[1], precision=HIGHEST) + b_fold[1]
    gi = _interleave_gates(gi_f, gi_b[::-1])
    return gi.astype(storage_dtype)


def init_params(key, vocab_size, embed_dim, hidden_dim, num_layers, num_classes):
    k = key

    def nxt():
        nonlocal k
        k, sub = jax.random.split(k)
        return sub

    scale = 1.0 / float(hidden_dim) ** 0.5
    u = lambda shape: jax.random.uniform(nxt(), shape, jnp.float32, -scale, scale)

    params = {
        "embedding": jax.random.normal(nxt(), (vocab_size, embed_dim), jnp.float32) * 0.1,
        "gru": [],
        "fc_w": u((2 * hidden_dim, num_classes)),
        "fc_b": u((num_classes,)),
    }
    for layer in range(num_layers):
        d_in = embed_dim if layer == 0 else 2 * hidden_dim
        params["gru"].append((
            u((2, d_in, 3 * hidden_dim)),          # W_ih^T stacked [fwd, bwd]
            u((2, hidden_dim, 3 * hidden_dim)),    # W_hh^T stacked
            u((2, 3 * hidden_dim)),                # b_ih
            u((2, 3 * hidden_dim)),                # b_hh
        ))
    return params


def simple_rnn_forward(params, tokens, *, storage_dtype=jnp.bfloat16, max_chunk=128):
    """tokens:(B,L) int32 -> logits (B,num_classes).  Dropout = identity (eval).
    Reproduces the lengths=None branch of the PyTorch forward()."""
    B, L = tokens.shape
    H = params["gru"][0][1].shape[1]

    # Embedding gather kept in plain JAX (glue); hot recurrent path is in Pallas.
    emb = jnp.take(params["embedding"], tokens, axis=0)        # (B, L, E)
    x = jnp.transpose(emb, (1, 0, 2)).astype(jnp.float32)      # (L, B, E)

    # Pad batch to 8 sublanes; padded rows never mix with real rows.
    B_pad = _round_up(B, 8)
    if B_pad != B:
        x = jnp.pad(x, ((0, 0), (0, B_pad - B), (0, 0)))

    # Time chunking: pad L so Lp % chunk == 0.  Padded (zero-gi) steps sit after
    # the last real step of BOTH fused streams, so they are never read.
    chunk = min(max_chunk, _round_up(L, 8))
    Lp = _round_up(L, chunk)

    out = None
    for wih, whh, bih, bhh in params["gru"]:
        # Fold b_ih and the r/z slices of b_hh into gi; b_hn stays in-kernel
        # (PyTorch: n = tanh(gi_n + r * (W_hn h + b_hn))).
        b_fold = bih + jnp.concatenate(
            [bhh[:, :2 * H], jnp.zeros_like(bhh[:, 2 * H:])], axis=-1)
        bhn = bhh[:, 2 * H:].reshape(1, 2 * H)                 # [n_f | n_b]

        gi = _layer_gi(x, wih, b_fold, storage_dtype)          # (L, Bp, 6H)
        if Lp != L:
            gi = jnp.pad(gi, ((0, Lp - L), (0, 0), (0, 0)))
        whh_blk = _block_diag_whh(whh)                         # (2H, 6H) f32
        out = bigru_layer(gi, whh_blk, bhn, chunk=chunk)[:L]   # (L, Bp, 2H)

        # Next layer input x(t) = [h_f(t), h_b(t)]; the kernel stores h_b at
        # kernel index L-1-t, so un-flip the backward half (cheap XLA reverse).
        x = jnp.concatenate(
            [out[:, :, :H], out[::-1, :, H:]], axis=-1).astype(jnp.float32)

    # bidirectional, lengths=None: concat(h_f(L-1), h_b(0)) == out[L-1] in the
    # fused layout.  Tiny FC stays in XLA.
    final = out[L - 1, :B].astype(jnp.float32)                 # (B, 2H)
    logits = jnp.dot(final, params["fc_w"], precision=HIGHEST) + params["fc_b"]
    # TODO(synk): pack_padded_sequence path (lengths != None) not implemented;
    # this reproduces the lengths=None branch of the PyTorch forward().
    return logits


# ------------------------------ pure-JAX reference ----------------------------

def _gru_dir_ref(x_seq, w_ih, w_hh, b_ih, b_hh, reverse):
    L, B, _ = x_seq.shape
    H = w_hh.shape[0]
    xs = x_seq[::-1] if reverse else x_seq

    def step(h, x_t):
        gi = jnp.dot(x_t, w_ih, precision=HIGHEST) + b_ih
        gh = jnp.dot(h, w_hh, precision=HIGHEST) + b_hh
        r = jax.nn.sigmoid(gi[:, :H] + gh[:, :H])
        z = jax.nn.sigmoid(gi[:, H:2 * H] + gh[:, H:2 * H])
        n = jnp.tanh(gi[:, 2 * H:] + r * gh[:, 2 * H:])
        h_new = (1.0 - z) * n + z * h
        return h_new, h_new

    _, outs = jax.lax.scan(step, jnp.zeros((B, H), jnp.float32), xs)
    return outs[::-1] if reverse else outs


def simple_rnn_ref(params, tokens):
    emb = jnp.take(params["embedding"], tokens, axis=0)
    x = jnp.transpose(emb, (1, 0, 2))
    out_f = out_b = None
    for wih, whh, bih, bhh in params["gru"]:
        out_f = _gru_dir_ref(x, wih[0], whh[0], bih[0], bhh[0], reverse=False)
        out_b = _gru_dir_ref(x, wih[1], whh[1], bih[1], bhh[1], reverse=True)
        x = jnp.concatenate([out_f, out_b], axis=-1)
    final = jnp.concatenate([out_f[-1], out_b[0]], axis=-1)
    return jnp.dot(final, params["fc_w"], precision=HIGHEST) + params["fc_b"]


# ----------------------------------- main --------------------------------------

if __name__ == "__main__":
    B, L = 2, 8
    vocab_size, embed_dim = 100, 32
    hidden_dim = 128          # multiple of 128 -> lane-aligned gate slices
    num_layers, num_classes = 2, 2

    key = jax.random.PRNGKey(0)
    k_params, k_tok = jax.random.split(key)
    params = init_params(k_params, vocab_size, embed_dim, hidden_dim,
                         num_layers, num_classes)
    tokens = jax.random.randint(k_tok, (B, L), 0, vocab_size, dtype=jnp.int32)

    ref = simple_rnn_ref(params, tokens)

    # f32 gi/out storage: tight check that the fused-kernel math matches PyTorch GRU.
    logits_f32 = jax.block_until_ready(
        simple_rnn_forward(params, tokens, storage_dtype=jnp.float32))
    assert logits_f32.shape == (B, num_classes), logits_f32.shape
    assert jnp.allclose(logits_f32, ref, atol=1e-3, rtol=1e-3), (logits_f32, ref)

    # bf16 gi/out storage (production setting on v6e/v7x): looser tolerance.
    logits_bf16 = jax.block_until_ready(
        simple_rnn_forward(params, tokens, storage_dtype=jnp.bfloat16))
    assert logits_bf16.shape == (B, num_classes), logits_bf16.shape
    assert jnp.allclose(logits_bf16, ref, atol=5e-2, rtol=5e-2), (logits_bf16, ref)

    print("KERNEL_OK")
</pallas_src>

<mosaic_0001>
module attributes {stable_mosaic.version = 11 : i64} {
  func.func @_bigru_chunk_kernel(%arg0: i32, %arg1: memref<8x8x768xf32, #tpu.memory_space<vmem>>, %arg2: memref<256x768xf32, #tpu.memory_space<vmem>>, %arg3: memref<1x256xf32, #tpu.memory_space<vmem>>, %arg4: memref<8x8x256xf32, #tpu.memory_space<vmem>>, %arg5: memref<8x256xf32, #tpu.memory_space<vmem>>) attributes {dimension_semantics = [#tpu.dimension_semantics<arbitrary>], iteration_bounds = array<i64: 1>, scalar_prefetch = 0 : i64, scratch_operands = 1 : i64, tpu.core_type = #tpu.core_type<tc>, window_params = [{transform_indices = @transform_0, window_bounds = array<i64: 8, 8, 768>}, {pipeline_mode = #tpu.pipeline_mode<synchronous>, transform_indices = @transform_1, window_bounds = array<i64: 256, 768>}, {pipeline_mode = #tpu.pipeline_mode<synchronous>, transform_indices = @transform_2, window_bounds = array<i64: 1, 256>}, {transform_indices = @transform_3, window_bounds = array<i64: 8, 8, 256>}]} {
    %c0_i32 = arith.constant 0 : i32
    %0 = arith.cmpi eq, %arg0, %c0_i32 : i32
    %1 = arith.extui %0 : i1 to i32
    %c0_i32_0 = arith.constant 0 : i32
    %2 = arith.cmpi ne, %1, %c0_i32_0 : i32
    scf.if %2 {
      %cst_72 = arith.constant 0.000000e+00 : f32
      %289 = vector.broadcast %cst_72 : f32 to vector<8x256xf32>
      %c0_73 = arith.constant 0 : index
      %c0_74 = arith.constant 0 : index
      %290 = vector.load %arg5[%c0_73, %c0_74] : memref<8x256xf32, #tpu.memory_space<vmem>>, vector<8x256xf32>
      tpu.vector_store %arg5[%c0_73, %c0_74], %289 {strides = array<i32>} : memref<8x256xf32, #tpu.memory_space<vmem>>, vector<8x256xf32>,
    } else {
    }
    %c0 = arith.constant 0 : index
    %c0_1 = arith.constant 0 : index
    %3 = vector.load %arg2[%c0, %c0_1] : memref<256x768xf32, #tpu.memory_space<vmem>>, vector<256x768xf32>
    %c0_2 = arith.constant 0 : index
    %c0_3 = arith.constant 0 : index
    %4 = vector.load %arg3[%c0_2, %c0_3] : memref<1x256xf32, #tpu.memory_space<vmem>>, vector<1x256xf32>
    %5 = vector.shape_cast %4 : vector<1x256xf32> to vector<1x256xf32>
    %6 = vector.broadcast %5 : vector<1x256xf32> to vector<8x256xf32>
    %c0_4 = arith.constant 0 : index
    %c0_5 = arith.constant 0 : index
    %7 = vector.load %arg5[%c0_4, %c0_5] : memref<8x256xf32, #tpu.memory_space<vmem>>, vector<8x256xf32>
    %c0_i32_6 = arith.constant 0 : i32
    %8 = arith.index_cast %c0_i32_6 : i32 to index
    %c0_7 = arith.constant 0 : index
    %c0_8 = arith.constant 0 : index
    %9 = vector.load %arg1[%8, %c0_7, %c0_8] : memref<8x8x768xf32, #tpu.memory_space<vmem>>, vector<1x8x768xf32>
    %10 = vector.shape_cast %9 : vector<1x8x768xf32> to vector<8x768xf32>
    %cst = arith.constant dense<0.000000e+00> : vector<8x768xf32>
    %11 = tpu.matmul %7, %3, %cst {dimension_numbers = #tpu.dot_dimension_numbers<[1], [0], [0], [1], [0, 0, 1, 1], [], []>} : vector<8x256xf32>, vector<256x768xf32>, vector<8x768xf32> -> vector<8x768xf32>
    %12 = vector.extract_strided_slice %10 {offsets = [0, 0], sizes = [8, 256], strides = [1, 1]} : vector<8x768xf32> to vector<8x256xf32>
    %13 = vector.extract_strided_slice %11 {offsets = [0, 0], sizes = [8, 256], strides = [1, 1]} : vector<8x768xf32> to vector<8x256xf32>
    %14 = arith.addf %12, %13 : vector<8x256xf32>
    %15 = arith.negf %14 : vector<8x256xf32>
    %16 = math.exp %15 : vector<8x256xf32>
    %cst_9 = arith.constant 1.000000e+00 : f32
    %17 = vector.broadcast %cst_9 : f32 to vector<8x256xf32>
    %18 = arith.addf %17, %16 : vector<8x256xf32>
    %19 = arith.divf %17, %18 : vector<8x256xf32>
    %20 = vector.extract_strided_slice %10 {offsets = [0, 256], sizes = [8, 256], strides = [1, 1]} : vector<8x768xf32> to vector<8x256xf32>
    %21 = vector.extract_strided_slice %11 {offsets = [0, 256], sizes = [8, 256], strides = [1, 1]} : vector<8x768xf32> to vector<8x256xf32>
    %22 = arith.addf %20, %21 : vector<8x256xf32>
    %23 = arith.negf %22 : vector<8x256xf32>
    %24 = math.exp %23 : vector<8x256xf32>
    %cst_10 = arith.constant 1.000000e+00 : f32
    %25 = vector.broadcast %cst_10 : f32 to vector<8x256xf32>
    %26 = arith.addf %25, %24 : vector<8x256xf32>
    %27 = arith.divf %25, %26 : vector<8x256xf32>
    %28 = vector.extract_strided_slice %10 {offsets = [0, 512], sizes = [8, 256], strides = [1, 1]} : vector<8x768xf32> to vector<8x256xf32>
    %29 = vector.extract_strided_slice %11 {offsets = [0, 512], sizes = [8, 256], strides = [1, 1]} : vector<8x768xf32> to vector<8x256xf32>
    %30 = arith.addf %29, %6 : vector<8x256xf32>
    %31 = arith.mulf %19, %30 : vector<8x256xf32>
    %32 = arith.addf %28, %31 : vector<8x256xf32>
    %33 = math.tanh %32 : vector<8x256xf32>
    %cst_11 = arith.constant 1.000000e+00 : f32
    %34 = vector.broadcast %cst_11 : f32 to vector<8x256xf32>
    %35 = arith.subf %34, %27 : vector<8x256xf32>
    %36 = arith.mulf %35, %33 : vector<8x256xf32>
    %37 = arith.mulf %27, %7 : vector<8x256xf32>
    %38 = arith.addf %36, %37 : vector<8x256xf32>
    %39 = arith.index_cast %c0_i32_6 : i32 to index
    %c0_12 = arith.constant 0 : index
    %c0_13 = arith.constant 0 : index
    %40 = vector.load %arg4[%39, %c0_12, %c0_13] : memref<8x8x256xf32, #tpu.memory_space<vmem>>, vector<1x8x256xf32>
    %41 = vector.shape_cast %40 : vector<1x8x256xf32> to vector<8x256xf32>
    %42 = vector.shape_cast %38 : vector<8x256xf32> to vector<1x8x256xf32>
    tpu.vector_store %arg4[%39, %c0_12, %c0_13], %42 {strides = array<i32>} : memref<8x8x256xf32, #tpu.memory_space<vmem>>, vector<1x8x256xf32>,
    %c1_i32 = arith.constant 1 : i32
    %43 = arith.index_cast %c1_i32 : i32 to index
    %c0_14 = arith.constant 0 : index
    %c0_15 = arith.constant 0 : index
    %44 = vector.load %arg1[%43, %c0_14, %c0_15] : memref<8x8x768xf32, #tpu.memory_space<vmem>>, vector<1x8x768xf32>
    %45 = vector.shape_cast %44 : vector<1x8x768xf32> to vector<8x768xf32>
    %cst_16 = arith.constant dense<0.000000e+00> : vector<8x768xf32>
    %46 = tpu.matmul %38, %3, %cst_16 {dimension_numbers = #tpu.dot_dimension_numbers<[1], [0], [0], [1], [0, 0, 1, 1], [], []>} : vector<8x256xf32>, vector<256x768xf32>, vector<8x768xf32> -> vector<8x768xf32>
    %47 = vector.extract_strided_slice %45 {offsets = [0, 0], sizes = [8, 256], strides = [1, 1]} : vector<8x768xf32> to vector<8x256xf32>
    %48 = vector.extract_strided_slice %46 {offsets = [0, 0], sizes = [8, 256], strides = [1, 1]} : vector<8x768xf32> to vector<8x256xf32>
    %49 = arith.addf %47, %48 : vector<8x256xf32>
    %50 = arith.negf %49 : vector<8x256xf32>
    %51 = math.exp %50 : vector<8x256xf32>
    %cst_17 = arith.constant 1.000000e+00 : f32
    %52 = vector.broadcast %cst_17 : f32 to vector<8x256xf32>
    %53 = arith.addf %52, %51 : vector<8x256xf32>
    %54 = arith.divf %52, %53 : vector<8x256xf32>
    %55 = vector.extract_strided_slice %45 {offsets = [0, 256], sizes = [8, 256], strides = [1, 1]} : vector<8x768xf32> to vector<8x256xf32>
    %56 = vector.extract_strided_slice %46 {offsets = [0, 256], sizes = [8, 256], strides = [1, 1]} : vector<8x768xf32> to vector<8x256xf32>
    %57 = arith.addf %55, %56 : vector<8x256xf32>
    %58 = arith.negf %57 : vector<8x256xf32>
    %59 = math.exp %58 : vector<8x256xf32>
    %cst_18 = arith.constant 1.000000e+00 : f32
    %60 = vector.broadcast %cst_18 : f32 to vector<8x256xf32>
    %61 = arith.addf %60, %59 : vector<8x256xf32>
    %62 = arith.divf %60, %61 : vector<8x256xf32>
    %63 = vector.extract_strided_slice %45 {offsets = [0, 512], sizes = [8, 256], strides = [1, 1]} : vector<8x768xf32> to vector<8x256xf32>
    %64 = vector.extract_strided_slice %46 {offsets = [0, 512], sizes = [8, 256], strides = [1, 1]} : vector<8x768xf32> to vector<8x256xf32>
    %65 = arith.addf %64, %6 : vector<8x256xf32>
    %66 = arith.mulf %54, %65 : vector<8x256xf32>
    %67 = arith.addf %63, %66 : vector<8x256xf32>
    %68 = math.tanh %67 : vector<8x256xf32>
    %cst_19 = arith.constant 1.000000e+00 : f32
    %69 = vector.broadcast %cst_19 : f32 to vector<8x256xf32>
    %70 = arith.subf %69, %62 : vector<8x256xf32>
    %71 = arith.mulf %70, %68 : vector<8x256xf32>
    %72 = arith.mulf %62, %38 : vector<8x256xf32>
    %73 = arith.addf %71, %72 : vector<8x256xf32>
    %74 = arith.index_cast %c1_i32 : i32 to index
    %c0_20 = arith.constant 0 : index
    %c0_21 = arith.constant 0 : index
    %75 = vector.load %arg4[%74, %c0_20, %c0_21] : memref<8x8x256xf32, #tpu.memory_space<vmem>>, vector<1x8x256xf32>
    %76 = vector.shape_cast %75 : vector<1x8x256xf32> to vector<8x256xf32>
    %77 = vector.shape_cast %73 : vector<8x256xf32> to vector<1x8x256xf32>
    tpu.vector_store %arg4[%74, %c0_20, %c0_21], %77 {strides = array<i32>} : memref<8x8x256xf32, #tpu.memory_space<vmem>>, vector<1x8x256xf32>,
    %c2_i32 = arith.constant 2 : i32
    %78 = arith.index_cast %c2_i32 : i32 to index
    %c0_22 = arith.constant 0 : index
    %c0_23 = arith.constant 0 : index
    %79 = vector.load %arg1[%78, %c0_22, %c0_23] : memref<8x8x768xf32, #tpu.memory_space<vmem>>, vector<1x8x768xf32>
    %80 = vector.shape_cast %79 : vector<1x8x768xf32> to vector<8x768xf32>
    %cst_24 = arith.constant dense<0.000000e+00> : vector<8x768xf32>
    %81 = tpu.matmul %73, %3, %cst_24 {dimension_numbers = #tpu.dot_dimension_numbers<[1], [0], [0], [1], [0, 0, 1, 1], [], []>} : vector<8x256xf32>, vector<256x768xf32>, vector<8x768xf32> -> vector<8x768xf32>
    %82 = vector.extract_strided_slice %80 {offsets = [0, 0], sizes = [8, 256], strides = [1, 1]} : vector<8x768xf32> to vector<8x256xf32>
    %83 = vector.extract_strided_slice %81 {offsets = [0, 0], sizes = [8, 256], strides = [1, 1]} : vector<8x768xf32> to vector<8x256xf32>
    %84 = arith.addf %82, %83 : vector<8x256xf32>
    %85 = arith.negf %84 : vector<8x256xf32>
    %86 = math.exp %85 : vector<8x256xf32>
    %cst_25 = arith.constant 1.000000e+00 : f32
    %87 = vector.broadcast %cst_25 : f32 to vector<8x256xf32>
    %88 = arith.addf %87, %86 : vector<8x256xf32>
    %89 = arith.divf %87, %88 : vector<8x256xf32>
    %90 = vector.extract_strided_slice %80 {offsets = [0, 256], sizes = [8, 256], strides = [1, 1]} : vector<8x768xf32> to vector<8x256xf32>
    %91 = vector.extract_strided_slice %81 {offsets = [0, 256], sizes = [8, 256], strides = [1, 1]} : vector<8x768xf32> to vector<8x256xf32>
    %92 = arith.addf %90, %91 : vector<8x256xf32>
    %93 = arith.negf %92 : vector<8x256xf32>
    %94 = math.exp %93 : vector<8x256xf32>
    %cst_26 = arith.constant 1.000000e+00 : f32
    %95 = vector.broadcast %cst_26 : f32 to vector<8x256xf32>
    %96 = arith.addf %95, %94 : vector<8x256xf32>
    %97 = arith.divf %95, %96 : vector<8x256xf32>
    %98 = vector.extract_strided_slice %80 {offsets = [0, 512], sizes = [8, 256], strides = [1, 1]} : vector<8x768xf32> to vector<8x256xf32>
    %99 = vector.extract_strided_slice %81 {offsets = [0, 512], sizes = [8, 256], strides = [1, 1]} : vector<8x768xf32> to vector<8x256xf32>
    %100 = arith.addf %99, %6 : vector<8x256xf32>
    %101 = arith.mulf %89, %100 : vector<8x256xf32>
    %102 = arith.addf %98, %101 : vector<8x256xf32>
    %103 = math.tanh %102 : vector<8x256xf32>
    %cst_27 = arith.constant 1.000000e+00 : f32
    %104 = vector.broadcast %cst_27 : f32 to vector<8x256xf32>
    %105 = arith.subf %104, %97 : vector<8x256xf32>
    %106 = arith.mulf %105, %103 : vector<8x256xf32>
    %107 = arith.mulf %97, %73 : vector<8x256xf32>
    %108 = arith.addf %106, %107 : vector<8x256xf32>
    %109 = arith.index_cast %c2_i32 : i32 to index
    %c0_28 = arith.constant 0 : index
    %c0_29 = arith.constant 0 : index
    %110 = vector.load %arg4[%109, %c0_28, %c0_29] : memref<8x8x256xf32, #tpu.memory_space<vmem>>, vector<1x8x256xf32>
    %111 = vector.shape_cast %110 : vector<1x8x256xf32> to vector<8x256xf32>
    %112 = vector.shape_cast %108 : vector<8x256xf32> to vector<1x8x256xf32>
    tpu.vector_store %arg4[%109, %c0_28, %c0_29], %112 {strides = array<i32>} : memref<8x8x256xf32, #tpu.memory_space<vmem>>, vector<1x8x256xf32>,
    %c3_i32 = arith.constant 3 : i32
    %113 = arith.index_cast %c3_i32 : i32 to index
    %c0_30 = arith.constant 0 : index
    %c0_31 = arith.constant 0 : index
    %114 = vector.load %arg1[%113, %c0_30, %c0_31] : memref<8x8x768xf32, #tpu.memory_space<vmem>>, vector<1x8x768xf32>
    %115 = vector.shape_cast %114 : vector<1x8x768xf32> to vector<8x768xf32>
    %cst_32 = arith.constant dense<0.000000e+00> : vector<8x768xf32>
    %116 = tpu.matmul %108, %3, %cst_32 {dimension_numbers = #tpu.dot_dimension_numbers<[1], [0], [0], [1], [0, 0, 1, 1], [], []>} : vector<8x256xf32>, vector<256x768xf32>, vector<8x768xf32> -> vector<8x768xf32>
    %117 = vector.extract_strided_slice %115 {offsets = [0, 0], sizes = [8, 256], strides = [1, 1]} : vector<8x768xf32> to vector<8x256xf32>
    %118 = vector.extract_strided_slice %116 {offsets = [0, 0], sizes = [8, 256], strides = [1, 1]} : vector<8x768xf32> to vector<8x256xf32>
    %119 = arith.addf %117, %118 : vector<8x256xf32>
    %120 = arith.negf %119 : vector<8x256xf32>
    %121 = math.exp %120 : vector<8x256xf32>
    %cst_33 = arith.constant 1.000000e+00 : f32
    %122 = vector.broadcast %cst_33 : f32 to vector<8x256xf32>
    %123 = arith.addf %122, %121 : vector<8x256xf32>
    %124 = arith.divf %122, %123 : vector<8x256xf32>
    %125 = vector.extract_strided_slice %115 {offsets = [0, 256], sizes = [8, 256], strides = [1, 1]} : vector<8x768xf32> to vector<8x256xf32>
    %126 = vector.extract_strided_slice %116 {offsets = [0, 256], sizes = [8, 256], strides = [1, 1]} : vector<8x768xf32> to vector<8x256xf32>
    %127 = arith.addf %125, %126 : vector<8x256xf32>
    %128 = arith.negf %127 : vector<8x256xf32>
    %129 = math.exp %128 : vector<8x256xf32>
    %cst_34 = arith.constant 1.000000e+00 : f32
    %130 = vector.broadcast %cst_34 : f32 to vector<8x256xf32>
    %131 = arith.addf %130, %129 : vector<8x256xf32>
    %132 = arith.divf %130, %131 : vector<8x256xf32>
    %133 = vector.extract_strided_slice %115 {offsets = [0, 512], sizes = [8, 256], strides = [1, 1]} : vector<8x768xf32> to vector<8x256xf32>
    %134 = vector.extract_strided_slice %116 {offsets = [0, 512], sizes = [8, 256], strides = [1, 1]} : vector<8x768xf32> to vector<8x256xf32>
    %135 = arith.addf %134, %6 : vector<8x256xf32>
    %136 = arith.mulf %124, %135 : vector<8x256xf32>
    %137 = arith.addf %133, %136 : vector<8x256xf32>
    %138 = math.tanh %137 : vector<8x256xf32>
    %cst_35 = arith.constant 1.000000e+00 : f32
    %139 = vector.broadcast %cst_35 : f32 to vector<8x256xf32>
    %140 = arith.subf %139, %132 : vector<8x256xf32>
    %141 = arith.mulf %140, %138 : vector<8x256xf32>
    %142 = arith.mulf %132, %108 : vector<8x256xf32>
    %143 = arith.addf %141, %142 : vector<8x256xf32>
    %144 = arith.index_cast %c3_i32 : i32 to index
    %c0_36 = arith.constant 0 : index
    %c0_37 = arith.constant 0 : index
    %145 = vector.load %arg4[%144, %c0_36, %c0_37] : memref<8x8x256xf32, #tpu.memory_space<vmem>>, vector<1x8x256xf32>
    %146 = vector.shape_cast %145 : vector<1x8x256xf32> to vector<8x256xf32>
    %147 = vector.shape_cast %143 : vector<8x256xf32> to vector<1x8x256xf32>
    tpu.vector_store %arg4[%144, %c0_36, %c0_37], %147 {strides = array<i32>} : memref<8x8x256xf32, #tpu.memory_space<vmem>>, vector<1x8x256xf32>,
    %c4_i32 = arith.constant 4 : i32
    %148 = arith.index_cast %c4_i32 : i32 to index
    %c0_38 = arith.constant 0 : index
    %c0_39 = arith.constant 0 : index
    %149 = vector.load %arg1[%148, %c0_38, %c0_39] : memref<8x8x768xf32, #tpu.memory_space<vmem>>, vector<1x8x768xf32>
    %150 = vector.shape_cast %149 : vector<1x8x768xf32> to vector<8x768xf32>
    %cst_40 = arith.constant dense<0.000000e+00> : vector<8x768xf32>
    %151 = tpu.matmul %143, %3, %cst_40 {dimension_numbers = #tpu.dot_dimension_numbers<[1], [0], [0], [1], [0, 0, 1, 1], [], []>} : vector<8x256xf32>, vector<256x768xf32>, vector<8x768xf32> -> vector<8x768xf32>
    %152 = vector.extract_strided_slice %150 {offsets = [0, 0], sizes = [8, 256], strides = [1, 1]} : vector<8x768xf32> to vector<8x256xf32>
    %153 = vector.extract_strided_slice %151 {offsets = [0, 0], sizes = [8, 256], strides = [1, 1]} : vector<8x768xf32> to vector<8x256xf32>
    %154 = arith.addf %152, %153 : vector<8x256xf32>
    %155 = arith.negf %154 : vector<8x256xf32>
    %156 = math.exp %155 : vector<8x256xf32>
    %cst_41 = arith.constant 1.000000e+00 : f32
    %157 = vector.broadcast %cst_41 : f32 to vector<8x256xf32>
    %158 = arith.addf %157, %156 : vector<8x256xf32>
    %159 = arith.divf %157, %158 : vector<8x256xf32>
    %160 = vector.extract_strided_slice %150 {offsets = [0, 256], sizes = [8, 256], strides = [1, 1]} : vector<8x768xf32> to vector<8x256xf32>
    %161 = vector.extract_strided_slice %151 {offsets = [0, 256], sizes = [8, 256], strides = [1, 1]} : vector<8x768xf32> to vector<8x256xf32>
    %162 = arith.addf %160, %161 : vector<8x256xf32>
    %163 = arith.negf %162 : vector<8x256xf32>
    %164 = math.exp %163 : vector<8x256xf32>
    %cst_42 = arith.constant 1.000000e+00 : f32
    %165 = vector.broadcast %cst_42 : f32 to vector<8x256xf32>
    %166 = arith.addf %165, %164 : vector<8x256xf32>
    %167 = arith.divf %165, %166 : vector<8x256xf32>
    %168 = vector.extract_strided_slice %150 {offsets = [0, 512], sizes = [8, 256], strides = [1, 1]} : vector<8x768xf32> to vector<8x256xf32>
    %169 = vector.extract_strided_slice %151 {offsets = [0, 512], sizes = [8, 256], strides = [1, 1]} : vector<8x768xf32> to vector<8x256xf32>
    %170 = arith.addf %169, %6 : vector<8x256xf32>
    %171 = arith.mulf %159, %170 : vector<8x256xf32>
    %172 = arith.addf %168, %171 : vector<8x256xf32>
    %173 = math.tanh %172 : vector<8x256xf32>
    %cst_43 = arith.constant 1.000000e+00 : f32
    %174 = vector.broadcast %cst_43 : f32 to vector<8x256xf32>
    %175 = arith.subf %174, %167 : vector<8x256xf32>
    %176 = arith.mulf %175, %173 : vector<8x256xf32>
    %177 = arith.mulf %167, %143 : vector<8x256xf32>
    %178 = arith.addf %176, %177 : vector<8x256xf32>
    %179 = arith.index_cast %c4_i32 : i32 to index
    %c0_44 = arith.constant 0 : index
    %c0_45 = arith.constant 0 : index
    %180 = vector.load %arg4[%179, %c0_44, %c0_45] : memref<8x8x256xf32, #tpu.memory_space<vmem>>, vector<1x8x256xf32>
    %181 = vector.shape_cast %180 : vector<1x8x256xf32> to vector<8x256xf32>
    %182 = vector.shape_cast %178 : vector<8x256xf32> to vector<1x8x256xf32>
    tpu.vector_store %arg4[%179, %c0_44, %c0_45], %182 {strides = array<i32>} : memref<8x8x256xf32, #tpu.memory_space<vmem>>, vector<1x8x256xf32>,
    %c5_i32 = arith.constant 5 : i32
    %183 = arith.index_cast %c5_i32 : i32 to index
    %c0_46 = arith.constant 0 : index
    %c0_47 = arith.constant 0 : index
    %184 = vector.load %arg1[%183, %c0_46, %c0_47] : memref<8x8x768xf32, #tpu.memory_space<vmem>>, vector<1x8x768xf32>
    %185 = vector.shape_cast %184 : vector<1x8x768xf32> to vector<8x768xf32>
    %cst_48 = arith.constant dense<0.000000e+00> : vector<8x768xf32>
    %186 = tpu.matmul %178, %3, %cst_48 {dimension_numbers = #tpu.dot_dimension_numbers<[1], [0], [0], [1], [0, 0, 1, 1], [], []>} : vector<8x256xf32>, vector<256x768xf32>, vector<8x768xf32> -> vector<8x768xf32>
    %187 = vector.extract_strided_slice %185 {offsets = [0, 0], sizes = [8, 256], strides = [1, 1]} : vector<8x768xf32> to vector<8x256xf32>
    %188 = vector.extract_strided_slice %186 {offsets = [0, 0], sizes = [8, 256], strides = [1, 1]} : vector<8x768xf32> to vector<8x256xf32>
    %189 = arith.addf %187, %188 : vector<8x256xf32>
    %190 = arith.negf %189 : vector<8x256xf32>
    %191 = math.exp %190 : vector<8x256xf32>
    %cst_49 = arith.constant 1.000000e+00 : f32
    %192 = vector.broadcast %cst_49 : f32 to vector<8x256xf32>
    %193 = arith.addf %192, %191 : vector<8x256xf32>
    %194 = arith.divf %192, %193 : vector<8x256xf32>
    %195 = vector.extract_strided_slice %185 {offsets = [0, 256], sizes = [8, 256], strides = [1, 1]} : vector<8x768xf32> to vector<8x256xf32>
    %196 = vector.extract_strided_slice %186 {offsets = [0, 256], sizes = [8, 256], strides = [1, 1]} : vector<8x768xf32> to vector<8x256xf32>
    %197 = arith.addf %195, %196 : vector<8x256xf32>
    %198 = arith.negf %197 : vector<8x256xf32>
    %199 = math.exp %198 : vector<8x256xf32>
    %cst_50 = arith.constant 1.000000e+00 : f32
    %200 = vector.broadcast %cst_50 : f32 to vector<8x256xf32>
    %201 = arith.addf %200, %199 : vector<8x256xf32>
    %202 = arith.divf %200, %201 : vector<8x256xf32>
    %203 = vector.extract_strided_slice %185 {offsets = [0, 512], sizes = [8, 256], strides = [1, 1]} : vector<8x768xf32> to vector<8x256xf32>
    %204 = vector.extract_strided_slice %186 {offsets = [0, 512], sizes = [8, 256], strides = [1, 1]} : vector<8x768xf32> to vector<8x256xf32>
    %205 = arith.addf %204, %6 : vector<8x256xf32>
    %206 = arith.mulf %194, %205 : vector<8x256xf32>
    %207 = arith.addf %203, %206 : vector<8x256xf32>
    %208 = math.tanh %207 : vector<8x256xf32>
    %cst_51 = arith.constant 1.000000e+00 : f32
    %209 = vector.broadcast %cst_51 : f32 to vector<8x256xf32>
    %210 = arith.subf %209, %202 : vector<8x256xf32>
    %211 = arith.mulf %210, %208 : vector<8x256xf32>
    %212 = arith.mulf %202, %178 : vector<8x256xf32>
    %213 = arith.addf %211, %212 : vector<8x256xf32>
    %214 = arith.index_cast %c5_i32 : i32 to index
    %c0_52 = arith.constant 0 : index
    %c0_53 = arith.constant 0 : index
    %215 = vector.load %arg4[%214, %c0_52, %c0_53] : memref<8x8x256xf32, #tpu.memory_space<vmem>>, vector<1x8x256xf32>
    %216 = vector.shape_cast %215 : vector<1x8x256xf32> to vector<8x256xf32>
    %217 = vector.shape_cast %213 : vector<8x256xf32> to vector<1x8x256xf32>
    tpu.vector_store %arg4[%214, %c0_52, %c0_53], %217 {strides = array<i32>} : memref<8x8x256xf32, #tpu.memory_space<vmem>>, vector<1x8x256xf32>,
    %c6_i32 = arith.constant 6 : i32
    %218 = arith.index_cast %c6_i32 : i32 to index
    %c0_54 = arith.constant 0 : index
    %c0_55 = arith.constant 0 : index
    %219 = vector.load %arg1[%218, %c0_54, %c0_55] : memref<8x8x768xf32, #tpu.memory_space<vmem>>, vector<1x8x768xf32>
    %220 = vector.shape_cast %219 : vector<1x8x768xf32> to vector<8x768xf32>
    %cst_56 = arith.constant dense<0.000000e+00> : vector<8x768xf32>
    %221 = tpu.matmul %213, %3, %cst_56 {dimension_numbers = #tpu.dot_dimension_numbers<[1], [0], [0], [1], [0, 0, 1, 1], [], []>} : vector<8x256xf32>, vector<256x768xf32>, vector<8x768xf32> -> vector<8x768xf32>
    %222 = vector.extract_strided_slice %220 {offsets = [0, 0], sizes = [8, 256], strides = [1, 1]} : vector<8x768xf32> to vector<8x256xf32>
    %223 = vector.extract_strided_slice %221 {offsets = [0, 0], sizes = [8, 256], strides = [1, 1]} : vector<8x768xf32> to vector<8x256xf32>
    %224 = arith.addf %222, %223 : vector<8x256xf32>
    %225 = arith.negf %224 : vector<8x256xf32>
    %226 = math.exp %225 : vector<8x256xf32>
    %cst_57 = arith.constant 1.000000e+00 : f32
    %227 = vector.broadcast %cst_57 : f32 to vector<8x256xf32>
    %228 = arith.addf %227, %226 : vector<8x256xf32>
    %229 = arith.divf %227, %228 : vector<8x256xf32>
    %230 = vector.extract_strided_slice %220 {offsets = [0, 256], sizes = [8, 256], strides = [1, 1]} : vector<8x768xf32> to vector<8x256xf32>
    %231 = vector.extract_strided_slice %221 {offsets = [0, 256], sizes = [8, 256], strides = [1, 1]} : vector<8x768xf32> to vector<8x256xf32>
    %232 = arith.addf %230, %231 : vector<8x256xf32>
    %233 = arith.negf %232 : vector<8x256xf32>
    %234 = math.exp %233 : vector<8x256xf32>
    %cst_58 = arith.constant 1.000000e+00 : f32
    %235 = vector.broadcast %cst_58 : f32 to vector<8x256xf32>
    %236 = arith.addf %235, %234 : vector<8x256xf32>
    %237 = arith.divf %235, %236 : vector<8x256xf32>
    %238 = vector.extract_strided_slice %220 {offsets = [0, 512], sizes = [8, 256], strides = [1, 1]} : vector<8x768xf32> to vector<8x256xf32>
    %239 = vector.extract_strided_slice %221 {offsets = [0, 512], sizes = [8, 256], strides = [1, 1]} : vector<8x768xf32> to vector<8x256xf32>
    %240 = arith.addf %239, %6 : vector<8x256xf32>
    %241 = arith.mulf %229, %240 : vector<8x256xf32>
    %242 = arith.addf %238, %241 : vector<8x256xf32>
    %243 = math.tanh %242 : vector<8x256xf32>
    %cst_59 = arith.constant 1.000000e+00 : f32
    %244 = vector.broadcast %cst_59 : f32 to vector<8x256xf32>
    %245 = arith.subf %244, %237 : vector<8x256xf32>
    %246 = arith.mulf %245, %243 : vector<8x256xf32>
    %247 = arith.mulf %237, %213 : vector<8x256xf32>
    %248 = arith.addf %246, %247 : vector<8x256xf32>
    %249 = arith.index_cast %c6_i32 : i32 to index
    %c0_60 = arith.constant 0 : index
    %c0_61 = arith.constant 0 : index
    %250 = vector.load %arg4[%249, %c0_60, %c0_61] : memref<8x8x256xf32, #tpu.memory_space<vmem>>, vector<1x8x256xf32>
    %251 = vector.shape_cast %250 : vector<1x8x256xf32> to vector<8x256xf32>
    %252 = vector.shape_cast %248 : vector<8x256xf32> to vector<1x8x256xf32>
    tpu.vector_store %arg4[%249, %c0_60, %c0_61], %252 {strides = array<i32>} : memref<8x8x256xf32, #tpu.memory_space<vmem>>, vector<1x8x256xf32>,
    %c7_i32 = arith.constant 7 : i32
    %253 = arith.index_cast %c7_i32 : i32 to index
    %c0_62 = arith.constant 0 : index
    %c0_63 = arith.constant 0 : index
    %254 = vector.load %arg1[%253, %c0_62, %c0_63] : memref<8x8x768xf32, #tpu.memory_space<vmem>>, vector<1x8x768xf32>
    %255 = vector.shape_cast %254 : vector<1x8x768xf32> to vector<8x768xf32>
    %cst_64 = arith.constant dense<0.000000e+00> : vector<8x768xf32>
    %256 = tpu.matmul %248, %3, %cst_64 {dimension_numbers = #tpu.dot_dimension_numbers<[1], [0], [0], [1], [0, 0, 1, 1], [], []>} : vector<8x256xf32>, vector<256x768xf32>, vector<8x768xf32> -> vector<8x768xf32>
    %257 = vector.extract_strided_slice %255 {offsets = [0, 0], sizes = [8, 256], strides = [1, 1]} : vector<8x768xf32> to vector<8x256xf32>
    %258 = vector.extract_strided_slice %256 {offsets = [0, 0], sizes = [8, 256], strides = [1, 1]} : vector<8x768xf32> to vector<8x256xf32>
    %259 = arith.addf %257, %258 : vector<8x256xf32>
    %260 = arith.negf %259 : vector<8x256xf32>
    %261 = math.exp %260 : vector<8x256xf32>
    %cst_65 = arith.constant 1.000000e+00 : f32
    %262 = vector.broadcast %cst_65 : f32 to vector<8x256xf32>
    %263 = arith.addf %262, %261 : vector<8x256xf32>
    %264 = arith.divf %262, %263 : vector<8x256xf32>
    %265 = vector.extract_strided_slice %255 {offsets = [0, 256], sizes = [8, 256], strides = [1, 1]} : vector<8x768xf32> to vector<8x256xf32>
    %266 = vector.extract_strided_slice %256 {offsets = [0, 256], sizes = [8, 256], strides = [1, 1]} : vector<8x768xf32> to vector<8x256xf32>
    %267 = arith.addf %265, %266 : vector<8x256xf32>
    %268 = arith.negf %267 : vector<8x256xf32>
    %269 = math.exp %268 : vector<8x256xf32>
    %cst_66 = arith.constant 1.000000e+00 : f32
    %270 = vector.broadcast %cst_66 : f32 to vector<8x256xf32>
    %271 = arith.addf %270, %269 : vector<8x256xf32>
    %272 = arith.divf %270, %271 : vector<8x256xf32>
    %273 = vector.extract_strided_slice %255 {offsets = [0, 512], sizes = [8, 256], strides = [1, 1]} : vector<8x768xf32> to vector<8x256xf32>
    %274 = vector.extract_strided_slice %256 {offsets = [0, 512], sizes = [8, 256], strides = [1, 1]} : vector<8x768xf32> to vector<8x256xf32>
    %275 = arith.addf %274, %6 : vector<8x256xf32>
    %276 = arith.mulf %264, %275 : vector<8x256xf32>
    %277 = arith.addf %273, %276 : vector<8x256xf32>
    %278 = math.tanh %277 : vector<8x256xf32>
    %cst_67 = arith.constant 1.000000e+00 : f32
    %279 = vector.broadcast %cst_67 : f32 to vector<8x256xf32>
    %280 = arith.subf %279, %272 : vector<8x256xf32>
    %281 = arith.mulf %280, %278 : vector<8x256xf32>
    %282 = arith.mulf %272, %248 : vector<8x256xf32>
    %283 = arith.addf %281, %282 : vector<8x256xf32>
    %284 = arith.index_cast %c7_i32 : i32 to index
    %c0_68 = arith.constant 0 : index
    %c0_69 = arith.constant 0 : index
    %285 = vector.load %arg4[%284, %c0_68, %c0_69] : memref<8x8x256xf32, #tpu.memory_space<vmem>>, vector<1x8x256xf32>
    %286 = vector.shape_cast %285 : vector<1x8x256xf32> to vector<8x256xf32>
    %287 = vector.shape_cast %283 : vector<8x256xf32> to vector<1x8x256xf32>
    tpu.vector_store %arg4[%284, %c0_68, %c0_69], %287 {strides = array<i32>} : memref<8x8x256xf32, #tpu.memory_space<vmem>>, vector<1x8x256xf32>,
    %c8_i32 = arith.constant 8 : i32
    %c0_70 = arith.constant 0 : index
    %c0_71 = arith.constant 0 : index
    %288 = vector.load %arg5[%c0_70, %c0_71] : memref<8x256xf32, #tpu.memory_space<vmem>>, vector<8x256xf32>
    tpu.vector_store %arg5[%c0_70, %c0_71], %283 {strides = array<i32>} : memref<8x256xf32, #tpu.memory_space<vmem>>, vector<8x256xf32>,
    return
  }
  func.func @transform_0(%arg0: i32) -> (i32, i32, i32) {
    %c0_i32 = arith.constant 0 : i32
    %c0_i32_0 = arith.constant 0 : i32
    %c0_i32_1 = arith.constant 0 : i32
    return %arg0, %c0_i32, %c0_i32_0 : i32, i32, i32
  }
  func.func @transform_1(%arg0: i32) -> (i32, i32) {
    %c0_i32 = arith.constant 0 : i32
    %c0_i32_0 = arith.constant 0 : i32
    %c0_i32_1 = arith.constant 0 : i32
    return %c0_i32, %c0_i32_0 : i32, i32
  }
  func.func @transform_2(%arg0: i32) -> (i32, i32) {
    %c0_i32 = arith.constant 0 : i32
    %c0_i32_0 = arith.constant 0 : i32
    %c0_i32_1 = arith.constant 0 : i32
    return %c0_i32, %c0_i32_0 : i32, i32
  }
  func.func @transform_3(%arg0: i32) -> (i32, i32, i32) {
    %c0_i32 = arith.constant 0 : i32
    %c0_i32_0 = arith.constant 0 : i32
    %c0_i32_1 = arith.constant 0 : i32
    return %arg0, %c0_i32, %c0_i32_0 : i32, i32, i32
  }
}

</mosaic_0001>

<bundles_post_ra>
// kernel: tpu_custom_call.1
= control target key start
LH: loop header
LB: loop body
LE: loop exit
PB: predicated region body
PF: predicated region fallthrough
CT: control target
= control target key end

     0   :  { %8 = vsyncpa [#allocation4], 0  ;;  %s6448_s0 = inlined_call_operand.hbm [shape: f32[8,8,768], index: 0, kind: input, shape index: {}]   ;;  %s6449_s1 = inlined_call_operand.hbm [shape: f32[256,768], index: 1, kind: input, shape index: {}]   ;;  %s6450_s2 = inlined_call_operand.vmem [shape: f32[1,256], index: 2, kind: input, shape index: {}]   ;;  %s6451_s3 = inlined_call_operand.hbm [shape: f32[8,8,256], index: 3, kind: output, shape index: {}]  }
   0x1   :  { %9 = vsyncpa [#allocation7], 0 }
   0x2   :  { %10 = vsyncpa [#allocation5], 0  ;;  %s3251_s12 = smov [#allocation3]  }
   0x3   :  { %s16_s13 = sshll.u32 %s3251_s12, 4  ;;  %s17_s13 = int_to_ptr.vmem [resolvable:$true] %s16_s13 }
   0x4   :  { %s3193_s14 = scalar_lea.vmem %s17_s13, 6144  ;;  %p3198_p1 = scmp.lt.s32.totalorder %s17_s13, %s17_s13 }
   0x5   :  { %p3194_p0 = scmp.ne.s32.totalorder %s17_s13, %s3193_s14  ;;  %p3199_p2 = scmp.lt.s32.totalorder %s3193_s14, %s3193_s14 }
   0x7   :  { %p3200_p3 = por %p3199_p2, %p3198_p1 }
   0x9   :  { %p3201_p4 = pnand %p3200_p3, %p3194_p0 }
   0xb   :  { %3204 = shalt.err (!%p3201_p4)
}
   0xc   :  { %s3252_s15 = smov 768   ;;  %s3253_s16 = smov 48  }
   0xd   :  { %22 = dma.hbm_to_vmem [thread:$0]  %s6448_s0, 6144, %s17_s13, [#allocation4], %s3252_s15, %s3252_s15, %s3253_s16  }
   0xe   :  { %s3254_s19 = smov [#allocation6]  }
   0xf   :  { %s28_s20 = sshll.u32 %s3254_s19, 4  ;;  %s29_s20 = int_to_ptr.vmem [resolvable:$true] %s28_s20 }
  0x10   :  { %s3213_s21 = scalar_lea.vmem %s29_s20, 24576  ;;  %p3218_p6 = scmp.lt.s32.totalorder %s29_s20, %s29_s20 }
  0x11   :  { %p3214_p5 = scmp.ne.s32.totalorder %s29_s20, %s3213_s21  ;;  %p3219_p7 = scmp.lt.s32.totalorder %s3213_s21, %s3213_s21 }
  0x13   :  { %p3220_p8 = por %p3219_p7, %p3218_p6 }
  0x15   :  { %p3221_p9 = pnand %p3220_p8, %p3214_p5 }
  0x17   :  { %3224 = shalt.err (!%p3221_p9)
}
  0x18   :  { %34 = dma.hbm_to_vmem [thread:$0]  %s6449_s1, 24576, %s29_s20, [#allocation7], %s3252_s15, %s3252_s15, %s3253_s16  }
  0x19   :  { %3245 = dma.done.wait [#allocation4], 6144  }
  0x1a   :  { %3246 = vsyncadd [#allocation4], 4294961152 }
  0x1b   :  { %3247 = dma.done.wait [#allocation7], 24576  }
  0x1c   :  { %3248 = vsyncadd [#allocation7], 4294942720  ;;  %v6452_v0 = vmov 0.0   ;;  %v3287_v1 = vld [vmem:[#allocation6 + $0x2d8] sm:$0xff]  ;;  %v3289_v2 = vld [vmem:[#allocation6 + $0x2d0] sm:$0xff] }
  0x1d   :  { %325 = vmatprep.mubr.f32.mxu0 %v6452_v0  ;;  %396 = vmatprep.mubr.f32.mxu1 %v6452_v0  ;;  %v3291_v3 = vld [vmem:[#allocation6 + $0x2a8] sm:$0xff]  ;;  %v3294_v4 = vld [vmem:[#allocation6 + $0x2a0] sm:$0xff]  ;;  %v3297_v5 = vld [vmem:[#allocation6 + $0x278] sm:$0xff] }
  0x1e   :  { %261 = vmatprep.subr.mxu0 %v3287_v1  ;;  %v3300_v6 = vld [vmem:[#allocation6 + $0x270] sm:$0xff]  ;;  %v3303_v7 = vld [vmem:[#allocation6 + $0x248] sm:$0xff]  ;;  %v3306_v8 = vld [vmem:[#allocation6 + $0x240] sm:$0xff] }
  0x1f   :  { %262 = vmatpush1.msra.mxu0 %v3289_v2  ;;  %v3309_v9 = vld [vmem:[#allocation6 + $0x218] sm:$0xff]  ;;  %v3312_v10 = vld [vmem:[#allocation6 + $0x210] sm:$0xff]  ;;  %v3315_v11 = vld [vmem:[#allocation6 + $0x1e8] sm:$0xff] }
  0x20   :  { %263 = vmatprep.subr.mxu0 %v3291_v3  ;;  %v3318_v12 = vld [vmem:[#allocation6 + $0x1e0] sm:$0xff]  ;;  %v3321_v13 = vld [vmem:[#allocation6 + $0x1b8] sm:$0xff]  ;;  %v3324_v14 = vld [vmem:[#allocation6 + $0x1b0] sm:$0xff] }
  0x21   :  { %264 = vmatpush1.msra.mxu0 %v3294_v4  ;;  %v3327_v15 = vld [vmem:[#allocation6 + $0x188] sm:$0xff]  ;;  %v3330_v16 = vld [vmem:[#allocation6 + $0x180] sm:$0xff]  ;;  %v3333_v17 = vld [vmem:[#allocation6 + $0x158] sm:$0xff] }
  0x22   :  { %265 = vmatprep.subr.mxu0 %v3297_v5  ;;  %v3336_v18 = vld [vmem:[#allocation6 + $0x150] sm:$0xff]  ;;  %v3338_v19 = vld [vmem:[#allocation6 + $0x2e8] sm:$0xff]  ;;  %v3344_v21 = vld [vmem:[#allocation6 + $0x2e0] sm:$0xff] }
  0x23   :  { %266 = vmatpush1.msra.mxu0 %v3300_v6  ;;  %v3341_v20 = vld [vmem:[#allocation6 + $0x128] sm:$0xff]  ;;  %332 = vmatprep.subr.mxu1 %v3338_v19  ;;  %v3347_v22 = vld [vmem:[#allocation6 + $0x120] sm:$0xff]  ;;  %v3350_v23 = vld [vmem:[#allocation6 + $0x2b8] sm:$0xff] }
  0x24   :  { %267 = vmatprep.subr.mxu0 %v3303_v7  ;;  %333 = vmatpush1.msra.mxu1 %v3344_v21  ;;  %v3352_v24 = vld [vmem:[#allocation6 + $0x2b0] sm:$0xff]  ;;  %v3355_v25 = vld [vmem:[#allocation6 + $0xf8] sm:$0xff]  ;;  %v3358_v26 = vld [vmem:[#allocation6 + $0x288] sm:$0xff] }
  0x25   :  { %268 = vmatpush1.msra.mxu0 %v3306_v8  ;;  %334 = vmatprep.subr.mxu1 %v3350_v23  ;;  %6881 = vst [vmem:[#allocation12_spill] sm:$0xff] %v3358_v26  ;;  %v3361_v27 = vld [vmem:[#allocation6 + $0xf0] sm:$0xff]  ;;  %v3364_v28 = vld [vmem:[#allocation6 + $0x280] sm:$0xff]  ;;  %v3366_v29 = vld [vmem:[#allocation6 + $0x258] sm:$0xff] }
  0x26   :  { %269 = vmatprep.subr.mxu0 %v3309_v9  ;;  %335 = vmatpush1.msra.mxu1 %v3352_v24  ;;  %6882 = vst [vmem:[#allocation13_spill] sm:$0xff] %v3364_v28  ;;  %6883 = vst [vmem:[#allocation14_spill] sm:$0xff] %v3366_v29  ;;  %v3369_v30 = vld [vmem:[#allocation6 + $0xc8] sm:$0xff]  ;;  %v3372_v31 = vld [vmem:[#allocation6 + $0x250] sm:$0xff] }
  0x27   :  { %270 = vmatpush1.msra.mxu0 %v3312_v10  ;;  %336 = vmatprep.subr.mxu1 %v3358_v26  ;;  %6884 = vst [vmem:[#allocation15_spill] sm:$0xff] %v3372_v31  ;;  %v3375_v32 = vld [vmem:[#allocation6 + $0xc0] sm:$0xff]  ;;  %v3378_v33 = vld [vmem:[#allocation6 + $0x228] sm:$0xff]  ;;  %v3381_v34 = vld [vmem:[#allocation6 + $0x98] sm:$0xff] }
  0x28   :  { %271 = vmatprep.subr.mxu0 %v3315_v11  ;;  %337 = vmatpush1.msra.mxu1 %v3364_v28  ;;  %6885 = vst [vmem:[#allocation16_spill] sm:$0xff] %v3378_v33  ;;  %v3384_v35 = vld [vmem:[#allocation6 + $0x220] sm:$0xff]  ;;  %v3387_v36 = vld [vmem:[#allocation6 + $0x90] sm:$0xff]  ;;  %v3390_v37 = vld [vmem:[#allocation6 + $0x1f8] sm:$0xff] }
  0x29   :  { %272 = vmatpush1.msra.mxu0 %v3318_v12  ;;  %338 = vmatprep.subr.mxu1 %v3366_v29  ;;  %6886 = vst [vmem:[#allocation17_spill] sm:$0xff] %v3384_v35  ;;  %6887 = vst [vmem:[#allocation18_spill] sm:$0xff] %v3390_v37  ;;  %v3393_v38 = vld [vmem:[#allocation6 + $0x68] sm:$0xff]  ;;  %v3396_v39 = vld [vmem:[#allocation6 + $0x1f0] sm:$0xff] }
  0x2a   :  { %273 = vmatprep.subr.mxu0 %v3321_v13  ;;  %339 = vmatpush1.msra.mxu1 %v3372_v31  ;;  %6888 = vst [vmem:[#allocation19_spill] sm:$0xff] %v3396_v39  ;;  %v3399_v40 = vld [vmem:[#allocation6 + $0x60] sm:$0xff]  ;;  %v3402_v41 = vld [vmem:[#allocation6 + $0x1c8] sm:$0xff]  ;;  %v3405_v42 = vld [vmem:[#allocation6 + $0x38] sm:$0xff] }
  0x2b   :  { %274 = vmatpush1.msra.mxu0 %v3324_v14  ;;  %340 = vmatprep.subr.mxu1 %v3378_v33  ;;  %6889 = vst [vmem:[#allocation20_spill] sm:$0xff] %v3402_v41  ;;  %v3408_v43 = vld [vmem:[#allocation6 + $0x1c0] sm:$0xff]  ;;  %v3411_v44 = vld [vmem:[#allocation6 + $0x30] sm:$0xff]  ;;  %v3414_v45 = vld [vmem:[#allocation6 + $0x198] sm:$0xff] }
  0x2c   :  { %275 = vmatprep.subr.mxu0 %v3327_v15  ;;  %341 = vmatpush1.msra.mxu1 %v3384_v35  ;;  %6890 = vst [vmem:[#allocation21_spill] sm:$0xff] %v3408_v43  ;;  %6891 = vst [vmem:[#allocation22_spill] sm:$0xff] %v3414_v45  ;;  %v3417_v46 = vld [vmem:[#allocation6 + $0x8] sm:$0xff]  ;;  %v3420_v47 = vld [vmem:[#allocation6 + $0x190] sm:$0xff] }
  0x2d   :  { %276 = vmatpush1.msra.mxu0 %v3330_v16  ;;  %342 = vmatprep.subr.mxu1 %v3390_v37  ;;  %6892 = vst [vmem:[#allocation23_spill] sm:$0xff] %v3420_v47  ;;  %v3423_v48 = vld [vmem:[#allocation6] sm:$0xff]  ;;  %v3426_v49 = vld [vmem:[#allocation6 + $0x168] sm:$0xff]  ;;  %v3429_v50 = vld [vmem:[#allocation6 + $0x5d8] sm:$0xff] }
  0x2e   :  { %277 = vmatprep.subr.mxu0 %v3333_v17  ;;  %343 = vmatpush1.msra.mxu1 %v3396_v39  ;;  %6893 = vst [vmem:[#allocation24_spill] sm:$0xff] %v3426_v49  ;;  %v3432_v51 = vld [vmem:[#allocation6 + $0x160] sm:$0xff]  ;;  %v3435_v52 = vld [vmem:[#allocation6 + $0x5d0] sm:$0xff]  ;;  %v3438_v53 = vld [vmem:[#allocation6 + $0x138] sm:$0xff] }
  0x2f   :  { %278 = vmatpush1.msra.mxu0 %v3336_v18  ;;  %344 = vmatprep.subr.mxu1 %v3402_v41  ;;  %6894 = vst [vmem:[#allocation25_spill] sm:$0xff] %v3432_v51  ;;  %6895 = vst [vmem:[#allocation26_spill] sm:$0xff] %v3438_v53  ;;  %v3441_v54 = vld [vmem:[#allocation6 + $0x5a8] sm:$0xff]  ;;  %v3444_v55 = vld [vmem:[#allocation6 + $0x130] sm:$0xff] }
  0x30   :  { %279 = vmatprep.subr.mxu0 %v3341_v20  ;;  %345 = vmatpush1.msra.mxu1 %v3408_v43  ;;  %6896 = vst [vmem:[#allocation27_spill] sm:$0xff] %v3444_v55  ;;  %v3447_v56 = vld [vmem:[#allocation6 + $0x5a0] sm:$0xff]  ;;  %v3450_v57 = vld [vmem:[#allocation6 + $0x108] sm:$0xff]  ;;  %v3453_v58 = vld [vmem:[#allocation6 + $0x578] sm:$0xff] }
  0x31   :  { %280 = vmatpush1.msra.mxu0 %v3347_v22  ;;  %346 = vmatprep.subr.mxu1 %v3414_v45  ;;  %6897 = vst [vmem:[#allocation28_spill] sm:$0xff] %v3450_v57  ;;  %v3456_v59 = vld [vmem:[#allocation6 + $0x100] sm:$0xff]  ;;  %v3459_v60 = vld [vmem:[#allocation6 + $0x570] sm:$0xff]  ;;  %v3462_v61 = vld [vmem:[#allocation6 + $0xd8] sm:$0xff] }
  0x32   :  { %281 = vmatprep.subr.mxu0 %v3355_v25  ;;  %347 = vmatpush1.msra.mxu1 %v3420_v47  ;;  %6898 = vst [vmem:[#allocation29_spill] sm:$0xff] %v3456_v59  ;;  %6899 = vst [vmem:[#allocation30_spill] sm:$0xff] %v3462_v61  ;;  %v3465_v62 = vld [vmem:[#allocation6 + $0x548] sm:$0xff]  ;;  %v3468_v63 = vld [vmem:[#allocation6 + $0xd0] sm:$0xff] }
  0x33   :  { %282 = vmatpush1.msra.mxu0 %v3361_v27  ;;  %348 = vmatprep.subr.mxu1 %v3426_v49  ;;  %6900 = vst [vmem:[#allocation31_spill] sm:$0xff] %v3468_v63  ;;  %v3471_v0 = vld [vmem:[#allocation6 + $0x540] sm:$0xff]  ;;  %v3486_v49 = vld [vmem:[#allocation6 + $0x78] sm:$0xff]  ;;  %v3492_v47 = vld [vmem:[#allocation6 + $0x70] sm:$0xff] }
  0x34   :  { %283 = vmatprep.subr.mxu0 %v3369_v30  ;;  %349 = vmatpush1.msra.mxu1 %v3432_v51  ;;  %v3480_v51 = vld [vmem:[#allocation6 + $0xa0] sm:$0xff]  ;;  %6903 = vst [vmem:[#allocation34_spill] sm:$0xff] %v3486_v49  ;;  %6904 = vst [vmem:[#allocation35_spill] sm:$0xff] %v3492_v47  ;;  %v3498_v45 = vld [vmem:[#allocation6 + $0x48] sm:$0xff] }
  0x35   :  { %284 = vmatpush1.msra.mxu0 %v3375_v32  ;;  %350 = vmatprep.subr.mxu1 %v3438_v53  ;;  %v3474_v53 = vld [vmem:[#allocation6 + $0xa8] sm:$0xff]  ;;  %6902 = vst [vmem:[#allocation33_spill] sm:$0xff] %v3480_v51  ;;  %6905 = vst [vmem:[#allocation36_spill] sm:$0xff] %v3498_v45  ;;  %v3504_v43 = vld [vmem:[#allocation6 + $0x40] sm:$0xff] }
  0x36   :  { %285 = vmatprep.subr.mxu0 %v3381_v34  ;;  %351 = vmatpush1.msra.mxu1 %v3444_v55  ;;  %6901 = vst [vmem:[#allocation32_spill] sm:$0xff] %v3474_v53  ;;  %v3477_v55 = vld [vmem:[#allocation6 + $0x518] sm:$0xff]  ;;  %6906 = vst [vmem:[#allocation37_spill] sm:$0xff] %v3504_v43  ;;  %v3516_v39 = vld [vmem:[#allocation6 + $0x10] sm:$0xff] }
  0x37   :  { %286 = vmatpush1.msra.mxu0 %v3387_v36  ;;  %352 = vmatprep.subr.mxu1 %v3450_v57  ;;  %v3483_v57 = vld [vmem:[#allocation6 + $0x510] sm:$0xff]  ;;  %v3510_v41 = vld [vmem:[#allocation6 + $0x18] sm:$0xff]  ;;  %6908 = vst [vmem:[#allocation39_spill] sm:$0xff] %v3516_v39  ;;  %v3522_v37 = vld [vmem:[#allocation6 + $0x5e8] sm:$0xff] }
  0x38   :  { %287 = vmatprep.subr.mxu0 %v3393_v38  ;;  %353 = vmatpush1.msra.mxu1 %v3456_v59  ;;  %v3489_v59 = vld [vmem:[#allocation6 + $0x4e8] sm:$0xff]  ;;  %6907 = vst [vmem:[#allocation38_spill] sm:$0xff] %v3510_v41  ;;  %6909 = vst [vmem:[#allocation40_spill] sm:$0xff] %v3522_v37  ;;  %v3528_v35 = vld [vmem:[#allocation6 + $0x5e0] sm:$0xff] }
  0x39   :  { %288 = vmatpush1.msra.mxu0 %v3399_v40  ;;  %354 = vmatprep.subr.mxu1 %v3462_v61  ;;  %v3495_v61 = vld [vmem:[#allocation6 + $0x4e0] sm:$0xff]  ;;  %6911 = vst [vmem:[#allocation42_spill] sm:$0xff] %v3528_v35  ;;  %v3534_v33 = vld [vmem:[#allocation6 + $0x5b8] sm:$0xff]  ;;  %v3540_v31 = vld [vmem:[#allocation6 + $0x5b0] sm:$0xff] }
  0x3a   :  { %289 = vmatprep.subr.mxu0 %v3405_v42  ;;  %355 = vmatpush1.msra.mxu1 %v3468_v63  ;;  %v3501_v63 = vld [vmem:[#allocation6 + $0x4b8] sm:$0xff]  ;;  %6913 = vst [vmem:[#allocation44_spill] sm:$0xff] %v3534_v33  ;;  %6915 = vst [vmem:[#allocation46_spill] sm:$0xff] %v3540_v31  ;;  %v3546_v29 = vld [vmem:[#allocation6 + $0x588] sm:$0xff] }
  0x3b   :  { %290 = vmatpush1.msra.mxu0 %v3411_v44  ;;  %356 = vmatprep.subr.mxu1 %v3474_v53  ;;  %v3507_v53 = vld [vmem:[#allocation6 + $0x4b0] sm:$0xff]  ;;  %6917 = vst [vmem:[#allocation48_spill] sm:$0xff] %v3546_v29  ;;  %v3552_v28 = vld [vmem:[#allocation6 + $0x580] sm:$0xff]  ;;  %v3558_v26 = vld [vmem:[#allocation6 + $0x558] sm:$0xff] }
  0x3c   :  { %291 = vmatprep.subr.mxu0 %v3417_v46  ;;  %357 = vmatpush1.msra.mxu1 %v3480_v51  ;;  %v3513_v51 = vld [vmem:[#allocation6 + $0x488] sm:$0xff]  ;;  %6919 = vst [vmem:[#allocation50_spill] sm:$0xff] %v3552_v28  ;;  %6921 = vst [vmem:[#allocation52_spill] sm:$0xff] %v3558_v26 }
  0x3d   :  { %292 = vmatpush1.msra.mxu0 %v3423_v48  ;;  %358 = vmatprep.subr.mxu1 %v3486_v49  ;;  %v3519_v49 = vld [vmem:[#allocation6 + $0x480] sm:$0xff] }
  0x3e   :  { %293 = vmatprep.subr.mxu0 %v3429_v50  ;;  %359 = vmatpush1.msra.mxu1 %v3492_v47  ;;  %v3525_v47 = vld [vmem:[#allocation6 + $0x458] sm:$0xff] }
  0x3f   :  { %294 = vmatpush2.msra.mxu0 %v3435_v52  ;;  %360 = vmatprep.subr.mxu1 %v3498_v45  ;;  %6910 = vst [vmem:[#allocation41_spill] sm:$0xff] %v3525_v47  ;;  %v3531_v45 = vld [vmem:[#allocation6 + $0x450] sm:$0xff] }
  0x40   :  { %295 = vmatprep.subr.mxu0 %v3441_v54  ;;  %361 = vmatpush1.msra.mxu1 %v3504_v43  ;;  %6912 = vst [vmem:[#allocation43_spill] sm:$0xff] %v3531_v45  ;;  %v3537_v43 = vld [vmem:[#allocation6 + $0x428] sm:$0xff] }
  0x41   :  { %296 = vmatpush2.msra.mxu0 %v3447_v56  ;;  %362 = vmatprep.subr.mxu1 %v3510_v41  ;;  %6914 = vst [vmem:[#allocation45_spill] sm:$0xff] %v3537_v43  ;;  %v3543_v41 = vld [vmem:[#allocation6 + $0x420] sm:$0xff] }
  0x42   :  { %297 = vmatprep.subr.mxu0 %v3453_v58  ;;  %363 = vmatpush1.msra.mxu1 %v3516_v39  ;;  %6916 = vst [vmem:[#allocation47_spill] sm:$0xff] %v3543_v41  ;;  %v3549_v39 = vld [vmem:[#allocation6 + $0x3f8] sm:$0xff] }
  0x43   :  { %298 = vmatpush2.msra.mxu0 %v3459_v60  ;;  %364 = vmatprep.subr.mxu1 %v3522_v37  ;;  %6918 = vst [vmem:[#allocation49_spill] sm:$0xff] %v3549_v39  ;;  %v3555_v37 = vld [vmem:[#allocation6 + $0x3f0] sm:$0xff] }
  0x44   :  { %299 = vmatprep.subr.mxu0 %v3465_v62  ;;  %365 = vmatpush2.msra.mxu1 %v3528_v35  ;;  %6920 = vst [vmem:[#allocation51_spill] sm:$0xff] %v3555_v37  ;;  %v3561_v35 = vld [vmem:[#allocation6 + $0x3c8] sm:$0xff] }
  0x45   :  { %300 = vmatpush2.msra.mxu0 %v3471_v0  ;;  %366 = vmatprep.subr.mxu1 %v3534_v33  ;;  %6922 = vst [vmem:[#allocation53_spill] sm:$0xff] %v3561_v35  ;;  %v3567_v33 = vld [vmem:[#allocation6 + $0x3c0] sm:$0xff] }
  0x46   :  { %301 = vmatprep.subr.mxu0 %v3477_v55  ;;  %367 = vmatpush2.msra.mxu1 %v3540_v31  ;;  %6924 = vst [vmem:[#allocation55_spill] sm:$0xff] %v3567_v33  ;;  %v3573_v31 = vld [vmem:[#allocation6 + $0x398] sm:$0xff] }
  0x47   :  { %302 = vmatpush2.msra.mxu0 %v3483_v57  ;;  %368 = vmatprep.subr.mxu1 %v3546_v29  ;;  %6926 = vst [vmem:[#allocation57_spill] sm:$0xff] %v3573_v31  ;;  %v3579_v29 = vld [vmem:[#allocation6 + $0x390] sm:$0xff] }
  0x48   :  { %303 = vmatprep.subr.mxu0 %v3489_v59  ;;  %369 = vmatpush2.msra.mxu1 %v3552_v28  ;;  %6928 = vst [vmem:[#allocation59_spill] sm:$0xff] %v3579_v29  ;;  %v3585_v28 = vld [vmem:[#allocation6 + $0x368] sm:$0xff] }
  0x49   :  { %304 = vmatpush2.msra.mxu0 %v3495_v61  ;;  %370 = vmatprep.subr.mxu1 %v3558_v26  ;;  %6930 = vst [vmem:[#allocation61_spill] sm:$0xff] %v3585_v28  ;;  %v3591_v26 = vld [vmem:[#allocation6 + $0x360] sm:$0xff] }
  0x4a   :  { %305 = vmatprep.subr.mxu0 %v3501_v63  ;;  %6932 = vst [vmem:[#allocation63_spill] sm:$0xff] %v3591_v26 }
  0x4b   :  { %306 = vmatpush2.msra.mxu0 %v3507_v53 }
  0x4c   :  { %307 = vmatprep.subr.mxu0 %v3513_v51 }
  0x4d   :  { %308 = vmatpush2.msra.mxu0 %v3519_v49 }
  0x4e   :  { %309 = vmatprep.subr.mxu0 %v3525_v47  ;;  %v3652_v47 = vld [vmem:[#allocation6 + $0x400] sm:$0xff] }
  0x4f   :  { %310 = vmatpush2.msra.mxu0 %v3531_v45  ;;  %v3564_v45 = vld [vmem:[#allocation6 + $0x550] sm:$0xff]  ;;  %6953 = vst [vmem:[#allocation83_spill] sm:$0xff] %v3652_v47 }
  0x50   :  { %311 = vmatprep.subr.mxu0 %v3537_v43  ;;  %6923 = vst [vmem:[#allocation54_spill] sm:$0xff] %v3564_v45  ;;  %v3570_v43 = vld [vmem:[#allocation6 + $0x528] sm:$0xff]  ;;  %371 = vmatpush2.msra.mxu1 %v3564_v45  ;;  %v3597_v45 = vld [vmem:[#allocation6 + $0x338] sm:$0xff] }
  0x51   :  { %312 = vmatpush2.msra.mxu0 %v3543_v41  ;;  %6925 = vst [vmem:[#allocation56_spill] sm:$0xff] %v3570_v43  ;;  %v3576_v41 = vld [vmem:[#allocation6 + $0x520] sm:$0xff]  ;;  %372 = vmatprep.subr.mxu1 %v3570_v43  ;;  %6934 = vst [vmem:[#allocation65_spill] sm:$0xff] %v3597_v45  ;;  %v3603_v43 = vld [vmem:[#allocation6 + $0x330] sm:$0xff] }
  0x52   :  { %313 = vmatprep.subr.mxu0 %v3549_v39  ;;  %6927 = vst [vmem:[#allocation58_spill] sm:$0xff] %v3576_v41  ;;  %v3582_v39 = vld [vmem:[#allocation6 + $0x4f8] sm:$0xff]  ;;  %373 = vmatpush2.msra.mxu1 %v3576_v41  ;;  %6936 = vst [vmem:[#allocation67_spill] sm:$0xff] %v3603_v43  ;;  %v3609_v41 = vld [vmem:[#allocation6 + $0x308] sm:$0xff] }
  0x53   :  { %314 = vmatpush2.msra.mxu0 %v3555_v37  ;;  %6929 = vst [vmem:[#allocation60_spill] sm:$0xff] %v3582_v39  ;;  %v3588_v37 = vld [vmem:[#allocation6 + $0x4f0] sm:$0xff]  ;;  %374 = vmatprep.subr.mxu1 %v3582_v39  ;;  %6938 = vst [vmem:[#allocation69_spill] sm:$0xff] %v3609_v41  ;;  %v3615_v39 = vld [vmem:[#allocation6 + $0x300] sm:$0xff] }
  0x54   :  { %315 = vmatprep.subr.mxu0 %v3561_v35  ;;  %6931 = vst [vmem:[#allocation62_spill] sm:$0xff] %v3588_v37  ;;  %v3594_v35 = vld [vmem:[#allocation6 + $0x4c8] sm:$0xff]  ;;  %375 = vmatpush2.msra.mxu1 %v3588_v37  ;;  %6940 = vst [vmem:[#allocation71_spill] sm:$0xff] %v3615_v39  ;;  %v3621_v37 = vld [vmem:[#allocation6 + $0x2f8] sm:$0xff] }
  0x55   :  { %316 = vmatpush2.msra.mxu0 %v3567_v33  ;;  %6933 = vst [vmem:[#allocation64_spill] sm:$0xff] %v3594_v35  ;;  %v3600_v33 = vld [vmem:[#allocation6 + $0x4c0] sm:$0xff]  ;;  %376 = vmatprep.subr.mxu1 %v3594_v35  ;;  %6942 = vst [vmem:[#allocation73_spill] sm:$0xff] %v3621_v37 }
  0x56   :  { %317 = vmatprep.subr.mxu0 %v3573_v31  ;;  %6935 = vst [vmem:[#allocation66_spill] sm:$0xff] %v3600_v33  ;;  %v3606_v31 = vld [vmem:[#allocation6 + $0x498] sm:$0xff]  ;;  %377 = vmatpush2.msra.mxu1 %v3600_v33  ;;  %v3628_v35 = vld [vmem:[#allocation6 + $0x460] sm:$0xff] }
  0x57   :  { %318 = vmatpush2.msra.mxu0 %v3579_v29  ;;  %6937 = vst [vmem:[#allocation68_spill] sm:$0xff] %v3606_v31  ;;  %v3612_v29 = vld [vmem:[#allocation6 + $0x490] sm:$0xff]  ;;  %378 = vmatprep.subr.mxu1 %v3606_v31  ;;  %6944 = vst [vmem:[#allocation75_spill] sm:$0xff] %v3628_v35  ;;  %v3634_v33 = vld [vmem:[#allocation6 + $0x438] sm:$0xff] }
  0x58   :  { %319 = vmatprep.subr.mxu0 %v3585_v28  ;;  %6939 = vst [vmem:[#allocation70_spill] sm:$0xff] %v3612_v29  ;;  %v3618_v28 = vld [vmem:[#allocation6 + $0x468] sm:$0xff]  ;;  %379 = vmatpush2.msra.mxu1 %v3612_v29  ;;  %6946 = vst [vmem:[#allocation77_spill] sm:$0xff] %v3634_v33  ;;  %v3638_v31 = vld [vmem:[#allocation6 + $0x2c0] sm:$0xff] }
  0x59   :  { %320 = vmatpush2.msra.mxu0 %v3591_v26  ;;  %6941 = vst [vmem:[#allocation72_spill] sm:$0xff] %v3618_v28  ;;  %v3625_v26 = vld [vmem:[#allocation6 + $0x2f0] sm:$0xff]  ;;  %380 = vmatprep.subr.mxu1 %v3618_v28  ;;  %6948 = vst [vmem:[#allocation78_spill] sm:$0xff] %v3638_v31  ;;  %v3643_v29 = vld [vmem:[#allocation6 + $0x298] sm:$0xff] }
  0x5a   :  { %321 = vmatprep.subr.mxu0 %v3597_v45  ;;  %6943 = vst [vmem:[#allocation74_spill] sm:$0xff] %v3625_v26  ;;  %v3631_v45 = vld [vmem:[#allocation6 + $0x2c8] sm:$0xff]  ;;  %6950 = vst [vmem:[#allocation80_spill] sm:$0xff] %v3643_v29  ;;  %381 = vmatpush2.msra.mxu1 %v3628_v35  ;;  %v3649_v28 = vld [vmem:[#allocation6 + $0x290] sm:$0xff] }
  0x5b   :  { %322 = vmatpush2.msra.mxu0 %v3603_v43  ;;  %6945 = vst [vmem:[#allocation76_spill] sm:$0xff] %v3631_v45  ;;  %v6947_v43 = vmov 0.0   ;;  %6952 = vst [vmem:[#allocation82_spill] sm:$0xff] %v3649_v28  ;;  %382 = vmatprep.subr.mxu1 %v3634_v33  ;;  %v3661_v35 = vld [vmem:[#allocation6 + $0x260] sm:$0xff]  ;;  %v3667_v33 = vld [vmem:[#allocation6 + $0x238] sm:$0xff] }
  0x5c   :  { %323 = vmatprep.subr.mxu0 %v3609_v41  ;;  %v3640_v41 = vld [vmem:[#allocation6 + $0x430] sm:$0xff]  ;;  %6956 = vst [vmem:[#allocation86_spill] sm:$0xff] %v3661_v35  ;;  %6958 = vst [vmem:[#allocation88_spill] sm:$0xff] %v3667_v33 }
  0x5d   :  { %324 = vmatpush2.msra.mxu0 %v3615_v39  ;;  %6949 = vst [vmem:[#allocation79_spill] sm:$0xff] %v3640_v41  ;;  %v3646_v39 = vld [vmem:[#allocation6 + $0x408] sm:$0xff]  ;;  %383 = vmatpush2.msra.mxu1 %v3640_v41  ;;  %v3673_v41 = vld [vmem:[#allocation6 + $0x230] sm:$0xff] }
  0x5e   :  { %326 = vmatmul.mubr.f32.vlgmr.msra.gmra.mxu0 %v6947_v43  ;;  %403 = vmatprep.subr.mxu0 %v3621_v37  ;;  %6951 = vst [vmem:[#allocation81_spill] sm:$0xff] %v3646_v39  ;;  %v3655_v37 = vld [vmem:[#allocation6 + $0x268] sm:$0xff]  ;;  %6960 = vst [vmem:[#allocation90_spill] sm:$0xff] %v3673_v41 }
  0x5f   :  { %404 = vmatpush1.msra.mxu0 %v3625_v26  ;;  %6954 = vst [vmem:[#allocation84_spill] sm:$0xff] %v3655_v37  ;;  %v3658_v26 = vld [vmem:[#allocation6 + $0x3d8] sm:$0xff]  ;;  %384 = vmatprep.subr.mxu1 %v3646_v39  ;;  %v3679_v39 = vld [vmem:[#allocation6 + $0x208] sm:$0xff] }
  0x60   :  { %405 = vmatprep.subr.mxu0 %v3631_v45  ;;  %6955 = vst [vmem:[#allocation85_spill] sm:$0xff] %v3658_v26  ;;  %v3664_v45 = vld [vmem:[#allocation6 + $0x3d0] sm:$0xff]  ;;  %385 = vmatpush2.msra.mxu1 %v3652_v47  ;;  %6962 = vst [vmem:[#allocation92_spill] sm:$0xff] %v3679_v39  ;;  %v3685_v47 = vld [vmem:[#allocation6 + $0x200] sm:$0xff] }
  0x61   :  { %406 = vmatpush1.msra.mxu0 %v3638_v31  ;;  %6957 = vst [vmem:[#allocation87_spill] sm:$0xff] %v3664_v45  ;;  %v3670_v31 = vld [vmem:[#allocation6 + $0x3a8] sm:$0xff]  ;;  %386 = vmatprep.subr.mxu1 %v3658_v26  ;;  %6964 = vst [vmem:[#allocation94_spill] sm:$0xff] %v3685_v47  ;;  %v3691_v26 = vld [vmem:[#allocation6 + $0x1d8] sm:$0xff] }
  0x62   :  { %407 = vmatprep.subr.mxu0 %v3643_v29  ;;  %6959 = vst [vmem:[#allocation89_spill] sm:$0xff] %v3670_v31  ;;  %v3676_v29 = vld [vmem:[#allocation6 + $0x3a0] sm:$0xff]  ;;  %387 = vmatpush2.msra.mxu1 %v3664_v45  ;;  %6966 = vst [vmem:[#allocation96_spill] sm:$0xff] %v3691_v26  ;;  %v3697_v45 = vld [vmem:[#allocation6 + $0x1d0] sm:$0xff] }
  0x63   :  { %408 = vmatpush1.msra.mxu0 %v3649_v28  ;;  %6961 = vst [vmem:[#allocation91_spill] sm:$0xff] %v3676_v29  ;;  %v3682_v28 = vld [vmem:[#allocation6 + $0x378] sm:$0xff]  ;;  %388 = vmatprep.subr.mxu1 %v3670_v31  ;;  %6968 = vst [vmem:[#allocation98_spill] sm:$0xff] %v3697_v45  ;;  %v3703_v31 = vld [vmem:[#allocation6 + $0x1a8] sm:$0xff] }
  0x64   :  { %409 = vmatprep.subr.mxu0 %v3655_v37  ;;  %6963 = vst [vmem:[#allocation93_spill] sm:$0xff] %v3682_v28  ;;  %v3688_v37 = vld [vmem:[#allocation6 + $0x370] sm:$0xff]  ;;  %389 = vmatpush2.msra.mxu1 %v3676_v29  ;;  %6970 = vst [vmem:[#allocation100_spill] sm:$0xff] %v3703_v31  ;;  %v3709_v29 = vld [vmem:[#allocation6 + $0x1a0] sm:$0xff] }
  0x65   :  { %410 = vmatpush1.msra.mxu0 %v3661_v35  ;;  %6965 = vst [vmem:[#allocation95_spill] sm:$0xff] %v3688_v37  ;;  %v3694_v35 = vld [vmem:[#allocation6 + $0x348] sm:$0xff]  ;;  %390 = vmatprep.subr.mxu1 %v3682_v28  ;;  %6972 = vst [vmem:[#allocation102_spill] sm:$0xff] %v3709_v29  ;;  %v3715_v28 = vld [vmem:[#allocation6 + $0x178] sm:$0xff] }
  0x66   :  { %411 = vmatprep.subr.mxu0 %v3667_v33  ;;  %6967 = vst [vmem:[#allocation97_spill] sm:$0xff] %v3694_v35  ;;  %v3700_v33 = vld [vmem:[#allocation6 + $0x340] sm:$0xff]  ;;  %391 = vmatpush2.msra.mxu1 %v3688_v37  ;;  %6974 = vst [vmem:[#allocation104_spill] sm:$0xff] %v3715_v28 }
  0x67   :  { %412 = vmatpush1.msra.mxu0 %v3673_v41  ;;  %6969 = vst [vmem:[#allocation99_spill] sm:$0xff] %v3700_v33  ;;  %v3706_v41 = vld [vmem:[#allocation6 + $0x318] sm:$0xff]  ;;  %392 = vmatprep.subr.mxu1 %v3694_v35  ;;  %v3727_v35 = vld [vmem:[#allocation6 + $0x140] sm:$0xff] }
  0x68   :  { %413 = vmatprep.subr.mxu0 %v3679_v39  ;;  %6971 = vst [vmem:[#allocation101_spill] sm:$0xff] %v3706_v41  ;;  %v3712_v39 = vld [vmem:[#allocation6 + $0x310] sm:$0xff]  ;;  %393 = vmatpush2.msra.mxu1 %v3700_v33 }
  0x69   :  { %414 = vmatpush1.msra.mxu0 %v3685_v47  ;;  %6973 = vst [vmem:[#allocation103_spill] sm:$0xff] %v3712_v39  ;;  %v3719_v47 = vld [vmem:[#allocation6 + $0x170] sm:$0xff]  ;;  %394 = vmatprep.subr.mxu1 %v3706_v41 }
  0x6a   :  { %415 = vmatprep.subr.mxu0 %v3691_v26  ;;  %6975 = vst [vmem:[#allocation105_spill] sm:$0xff] %v3719_v47  ;;  %v3723_v26 = vld [vmem:[#allocation6 + $0x148] sm:$0xff]  ;;  %395 = vmatpush2.msra.mxu1 %v3712_v39 }
  0x6b   :  { %416 = vmatpush1.msra.mxu0 %v3697_v45  ;;  %397 = vmatmul.mubr.f32.vlgmr.msra.gmra.mxu1 %v6947_v43  ;;  %v3731_v45 = vld [vmem:[#allocation6 + $0x118] sm:$0xff] }
  0x6c   :  { %417 = vmatprep.subr.mxu0 %v3703_v31  ;;  %467 = vmatprep.mubr.f32.mxu0 %v6947_v43  ;;  %v3735_v31 = vld [vmem:[#allocation6 + $0x110] sm:$0xff] }
  0x6d   :  { %418 = vmatpush1.msra.mxu0 %v3709_v29  ;;  %527 = vmatprep.subr.mxu1 %v3287_v1  ;;  %v3739_v29 = vld [vmem:[#allocation6 + $0xe8] sm:$0xff]  ;;  %v3751_v1 = vld [vmem:[#allocation6 + $0xb0] sm:$0xff] }
  0x6e   :  { %419 = vmatprep.subr.mxu0 %v3715_v28  ;;  %528 = vmatpush1.msra.mxu1 %v3289_v2  ;;  %v3743_v28 = vld [vmem:[#allocation6 + $0xe0] sm:$0xff]  ;;  %v3755_v2 = vld [vmem:[#allocation6 + $0x88] sm:$0xff] }
  0x6f   :  { %420 = vmatpush1.msra.mxu0 %v3719_v47  ;;  %529 = vmatprep.subr.mxu1 %v3291_v3  ;;  %v3747_v47 = vld [vmem:[#allocation6 + $0xb8] sm:$0xff]  ;;  %v3759_v3 = vld [vmem:[#allocation6 + $0x80] sm:$0xff] }
  0x70   :  { %421 = vmatprep.subr.mxu0 %v3723_v26  ;;  %530 = vmatpush1.msra.mxu1 %v3294_v4  ;;  %v3763_v4 = vld [vmem:[#allocation6 + $0x58] sm:$0xff] }
  0x71   :  { %422 = vmatpush1.msra.mxu0 %v3727_v35  ;;  %531 = vmatprep.subr.mxu1 %v3297_v5  ;;  %v3767_v5 = vld [vmem:[#allocation6 + $0x50] sm:$0xff] }
  0x72   :  { %423 = vmatprep.subr.mxu0 %v3731_v45  ;;  %532 = vmatpush1.msra.mxu1 %v3300_v6  ;;  %v3771_v6 = vld [vmem:[#allocation6 + $0x28] sm:$0xff] }
  0x73   :  { %424 = vmatpush1.msra.mxu0 %v3735_v31  ;;  %533 = vmatprep.subr.mxu1 %v3303_v7  ;;  %v3775_v7 = vld [vmem:[#allocation6 + $0x20] sm:$0xff] }
  0x74   :  { %425 = vmatprep.subr.mxu0 %v3739_v29  ;;  %534 = vmatpush1.msra.mxu1 %v3306_v8  ;;  %v3779_v8 = vld [vmem:[#allocation6 + $0x5f8] sm:$0xff] }
  0x75   :  { %426 = vmatpush1.msra.mxu0 %v3743_v28  ;;  %535 = vmatprep.subr.mxu1 %v3309_v9  ;;  %v3783_v9 = vld [vmem:[#allocation6 + $0x5f0] sm:$0xff] }
  0x76   :  { %427 = vmatprep.subr.mxu0 %v3747_v47  ;;  %536 = vmatpush1.msra.mxu1 %v3312_v10  ;;  %v3787_v10 = vld [vmem:[#allocation6 + $0x5c8] sm:$0xff] }
  0x77   :  { %428 = vmatpush1.msra.mxu0 %v3751_v1  ;;  %537 = vmatprep.subr.mxu1 %v3315_v11  ;;  %v3791_v11 = vld [vmem:[#allocation6 + $0x5c0] sm:$0xff] }
  0x78   :  { %429 = vmatprep.subr.mxu0 %v3755_v2  ;;  %538 = vmatpush1.msra.mxu1 %v3318_v12  ;;  %v3795_v12 = vld [vmem:[#allocation6 + $0x598] sm:$0xff] }
  0x79   :  { %430 = vmatpush1.msra.mxu0 %v3759_v3  ;;  %539 = vmatprep.subr.mxu1 %v3321_v13  ;;  %v3799_v13 = vld [vmem:[#allocation6 + $0x590] sm:$0xff] }
  0x7a   :  { %431 = vmatprep.subr.mxu0 %v3763_v4  ;;  %540 = vmatpush1.msra.mxu1 %v3324_v14  ;;  %v3803_v14 = vld [vmem:[#allocation6 + $0x568] sm:$0xff] }
  0x7b   :  { %432 = vmatpush1.msra.mxu0 %v3767_v5  ;;  %541 = vmatprep.subr.mxu1 %v3327_v15  ;;  %v3807_v15 = vld [vmem:[#allocation6 + $0x560] sm:$0xff] }
  0x7c   :  { %433 = vmatprep.subr.mxu0 %v3771_v6  ;;  %542 = vmatpush1.msra.mxu1 %v3330_v16  ;;  %v3811_v16 = vld [vmem:[#allocation6 + $0x538] sm:$0xff] }
  0x7d   :  { %434 = vmatpush1.msra.mxu0 %v3775_v7  ;;  %543 = vmatprep.subr.mxu1 %v3333_v17  ;;  %v3815_v17 = vld [vmem:[#allocation6 + $0x530] sm:$0xff] }
  0x7e   :  { %435 = vmatprep.subr.mxu0 %v3779_v8  ;;  %544 = vmatpush1.msra.mxu1 %v3336_v18  ;;  %v3819_v18 = vld [vmem:[#allocation6 + $0x508] sm:$0xff] }
  0x7f   :  { %436 = vmatpush2.msra.mxu0 %v3783_v9  ;;  %545 = vmatprep.subr.mxu1 %v3341_v20  ;;  %v3823_v20 = vld [vmem:[#allocation6 + $0x500] sm:$0xff] }
  0x80   :  { %437 = vmatprep.subr.mxu0 %v3787_v10  ;;  %546 = vmatpush1.msra.mxu1 %v3347_v22  ;;  %v3827_v22 = vld [vmem:[#allocation6 + $0x4d8] sm:$0xff] }
  0x81   :  { %438 = vmatpush2.msra.mxu0 %v3791_v11  ;;  %547 = vmatprep.subr.mxu1 %v3355_v25  ;;  %v3831_v25 = vld [vmem:[#allocation6 + $0x4d0] sm:$0xff] }
  0x82   :  { %439 = vmatprep.subr.mxu0 %v3795_v12  ;;  %548 = vmatpush1.msra.mxu1 %v3361_v27  ;;  %v3835_v27 = vld [vmem:[#allocation6 + $0x4a8] sm:$0xff] }
  0x83   :  { %440 = vmatpush2.msra.mxu0 %v3799_v13  ;;  %549 = vmatprep.subr.mxu1 %v3369_v30  ;;  %v3839_v30 = vld [vmem:[#allocation6 + $0x4a0] sm:$0xff] }
  0x84   :  { %441 = vmatprep.subr.mxu0 %v3803_v14  ;;  %550 = vmatpush1.msra.mxu1 %v3375_v32  ;;  %v3843_v32 = vld [vmem:[#allocation6 + $0x478] sm:$0xff] }
  0x85   :  { %442 = vmatpush2.msra.mxu0 %v3807_v15  ;;  %551 = vmatprep.subr.mxu1 %v3381_v34  ;;  %v3847_v34 = vld [vmem:[#allocation6 + $0x470] sm:$0xff] }
  0x86   :  { %443 = vmatprep.subr.mxu0 %v3811_v16  ;;  %552 = vmatpush1.msra.mxu1 %v3387_v36  ;;  %v3851_v36 = vld [vmem:[#allocation6 + $0x448] sm:$0xff] }
  0x87   :  { %444 = vmatpush2.msra.mxu0 %v3815_v17  ;;  %553 = vmatprep.subr.mxu1 %v3393_v38  ;;  %v3855_v38 = vld [vmem:[#allocation6 + $0x440] sm:$0xff] }
  0x88   :  { %445 = vmatprep.subr.mxu0 %v3819_v18  ;;  %554 = vmatpush1.msra.mxu1 %v3399_v40  ;;  %v3859_v40 = vld [vmem:[#allocation6 + $0x418] sm:$0xff] }
  0x89   :  { %446 = vmatpush2.msra.mxu0 %v3823_v20  ;;  %555 = vmatprep.subr.mxu1 %v3405_v42  ;;  %v3863_v42 = vld [vmem:[#allocation6 + $0x410] sm:$0xff] }
  0x8a   :  { %447 = vmatprep.subr.mxu0 %v3827_v22  ;;  %556 = vmatpush1.msra.mxu1 %v3411_v44  ;;  %v3867_v44 = vld [vmem:[#allocation6 + $0x3e8] sm:$0xff] }
  0x8b   :  { %448 = vmatpush2.msra.mxu0 %v3831_v25  ;;  %557 = vmatprep.subr.mxu1 %v3417_v46  ;;  %v3871_v46 = vld [vmem:[#allocation6 + $0x3e0] sm:$0xff] }
  0x8c   :  { %449 = vmatprep.subr.mxu0 %v3835_v27  ;;  %558 = vmatpush1.msra.mxu1 %v3423_v48  ;;  %v3875_v48 = vld [vmem:[#allocation6 + $0x3b8] sm:$0xff] }
  0x8d   :  { %450 = vmatpush2.msra.mxu0 %v3839_v30  ;;  %559 = vmatprep.subr.mxu1 %v3429_v50  ;;  %v3879_v50 = vld [vmem:[#allocation6 + $0x3b0] sm:$0xff] }
  0x8e   :  { %451 = vmatprep.subr.mxu0 %v3843_v32  ;;  %560 = vmatpush2.msra.mxu1 %v3435_v52  ;;  %v3883_v52 = vld [vmem:[#allocation6 + $0x388] sm:$0xff] }
  0x8f   :  { %452 = vmatpush2.msra.mxu0 %v3847_v34  ;;  %561 = vmatprep.subr.mxu1 %v3441_v54  ;;  %v3887_v54 = vld [vmem:[#allocation6 + $0x380] sm:$0xff] }
  0x90   :  { %453 = vmatprep.subr.mxu0 %v3851_v36  ;;  %562 = vmatpush2.msra.mxu1 %v3447_v56  ;;  %6976 = vst [vmem:[#allocation106_spill] sm:$0xff] %v3887_v54  ;;  %v3891_v56 = vld [vmem:[#allocation6 + $0x358] sm:$0xff] }
  0x91   :  { %454 = vmatpush2.msra.mxu0 %v3855_v38  ;;  %563 = vmatprep.subr.mxu1 %v3453_v58  ;;  %6977 = vst [vmem:[#allocation107_spill] sm:$0xff] %v3891_v56  ;;  %v3895_v58 = vld [vmem:[#allocation6 + $0x350] sm:$0xff] }
  0x92   :  { %455 = vmatprep.subr.mxu0 %v3859_v40  ;;  %564 = vmatpush2.msra.mxu1 %v3459_v60  ;;  %6978 = vst [vmem:[#allocation108_spill] sm:$0xff] %v3895_v58  ;;  %v3899_v60 = vld [vmem:[#allocation6 + $0x328] sm:$0xff] }
  0x93   :  { %456 = vmatpush2.msra.mxu0 %v3863_v42  ;;  %565 = vmatprep.subr.mxu1 %v3465_v62  ;;  %6979 = vst [vmem:[#allocation109_spill] sm:$0xff] %v3899_v60  ;;  %v3903_v62 = vld [vmem:[#allocation6 + $0x320] sm:$0xff] }
  0x94   :  { %457 = vmatprep.subr.mxu0 %v3867_v44  ;;  %566 = vmatpush2.msra.mxu1 %v3471_v0  ;;  %6980 = vst [vmem:[#allocation110_spill] sm:$0xff] %v3903_v62  ;;  %v6981_v0 = vld [vmem:[#allocation41_spill] sm:$0xff] }
  0x95   :  { %458 = vmatpush2.msra.mxu0 %v3871_v46  ;;  %567 = vmatprep.subr.mxu1 %v3477_v55  ;;  %v6982_v55 = vld [vmem:[#allocation12_spill] sm:$0xff] }
  0x96   :  { %459 = vmatprep.subr.mxu0 %v3875_v48  ;;  %568 = vmatpush2.msra.mxu1 %v3483_v57  ;;  %v6983_v57 = vld [vmem:[#allocation43_spill] sm:$0xff] }
  0x97   :  { %460 = vmatpush2.msra.mxu0 %v3879_v50  ;;  %569 = vmatprep.subr.mxu1 %v3489_v59  ;;  %v6992_v59 = vld [vmem:[#allocation17_spill] sm:$0xff] }
  0x98   :  { %461 = vmatprep.subr.mxu0 %v3883_v52  ;;  %570 = vmatpush2.msra.mxu1 %v3495_v61  ;;  %v6993_v61 = vld [vmem:[#allocation53_spill] sm:$0xff] }
  0x99   :  { %462 = vmatpush2.msra.mxu0 %v3887_v54  ;;  %571 = vmatprep.subr.mxu1 %v3501_v63  ;;  %v6994_v63 = vld [vmem:[#allocation18_spill] sm:$0xff] }
  0x9a   :  { %463 = vmatprep.subr.mxu0 %v3891_v56  ;;  %572 = vmatpush2.msra.mxu1 %v3507_v53  ;;  %v6984_v53 = vld [vmem:[#allocation13_spill] sm:$0xff]  ;;  %v243_v56 = vlaneseq }
  0x9b   :  { %464 = vmatpush2.msra.mxu0 %v3895_v58  ;;  %573 = vmatprep.subr.mxu1 %v3513_v51  ;;  %v6988_v51 = vld [vmem:[#allocation15_spill] sm:$0xff] }
  0x9c   :  { %465 = vmatprep.subr.mxu0 %v3899_v60  ;;  %574 = vmatpush2.msra.mxu1 %v3519_v49  ;;  %v6990_v49 = vld [vmem:[#allocation16_spill] sm:$0xff] }
  0x9d   :  { %466 = vmatpush2.msra.mxu0 %v3903_v62  ;;  %575 = vmatprep.subr.mxu1 %v6981_v0  ;;  %v6995_v0 = vld [vmem:[#allocation55_spill] sm:$0xff]  ;;  %v7016_v62 = vld [vmem:[#allocation30_spill] sm:$0xff] }
  0x9e   :  { %468 = vmatmul.mubr.f32.vlgmr.msra.gmra.mxu0 %v6947_v43  ;;  %598 = vmatprep.subr.mxu0 %v3338_v19  ;;  %v6985_v43 = vld [vmem:[#allocation45_spill] sm:$0xff]  ;;  %v6986_v19 = vld [vmem:[#allocation14_spill] sm:$0xff] }
  0x9f   :  { %599 = vmatpush1.msra.mxu0 %v3344_v21  ;;  %576 = vmatpush2.msra.mxu1 %v6983_v57  ;;  %v6987_v21 = vld [vmem:[#allocation47_spill] sm:$0xff]  ;;  %v6997_v57 = vld [vmem:[#allocation57_spill] sm:$0xff] }
  0xa0   :  { %600 = vmatprep.subr.mxu0 %v3350_v23  ;;  %577 = vmatprep.subr.mxu1 %v6985_v43  ;;  %v6989_v23 = vld [vmem:[#allocation49_spill] sm:$0xff]  ;;  %v6999_v43 = vld [vmem:[#allocation59_spill] sm:$0xff] }
  0xa1   :  { %601 = vmatpush1.msra.mxu0 %v3352_v24  ;;  %578 = vmatpush2.msra.mxu1 %v6987_v21  ;;  %v6991_v24 = vld [vmem:[#allocation51_spill] sm:$0xff]  ;;  %v7001_v21 = vld [vmem:[#allocation61_spill] sm:$0xff] }
  0xa2   :  { %602 = vmatprep.subr.mxu0 %v6982_v55  ;;  %579 = vmatprep.subr.mxu1 %v6989_v23  ;;  %v6996_v55 = vld [vmem:[#allocation19_spill] sm:$0xff] }
  0xa3   :  { %603 = vmatpush1.msra.mxu0 %v6984_v53  ;;  %580 = vmatpush2.msra.mxu1 %v6991_v24  ;;  %v6998_v53 = vld [vmem:[#allocation20_spill] sm:$0xff]  ;;  %v7003_v23 = vld [vmem:[#allocation63_spill] sm:$0xff]  ;;  %v7005_v24 = vld [vmem:[#allocation65_spill] sm:$0xff] }
  0xa4   :  { %604 = vmatprep.subr.mxu0 %v6986_v19  ;;  %581 = vmatprep.subr.mxu1 %v6993_v61  ;;  %v7000_v19 = vld [vmem:[#allocation21_spill] sm:$0xff]  ;;  %v7007_v61 = vld [vmem:[#allocation67_spill] sm:$0xff] }
  0xa5   :  { %605 = vmatpush1.msra.mxu0 %v6988_v51  ;;  %582 = vmatpush2.msra.mxu1 %v6995_v0  ;;  %v7002_v51 = vld [vmem:[#allocation22_spill] sm:$0xff]  ;;  %v7009_v0 = vld [vmem:[#allocation69_spill] sm:$0xff] }
  0xa6   :  { %606 = vmatprep.subr.mxu0 %v6990_v49  ;;  %583 = vmatprep.subr.mxu1 %v6997_v57  ;;  %v7004_v49 = vld [vmem:[#allocation23_spill] sm:$0xff] }
  0xa7   :  { %607 = vmatpush1.msra.mxu0 %v6992_v59  ;;  %584 = vmatpush2.msra.mxu1 %v6999_v43  ;;  %v7006_v59 = vld [vmem:[#allocation24_spill] sm:$0xff]  ;;  %v7011_v57 = vld [vmem:[#allocation71_spill] sm:$0xff] }
  0xa8   :  { %608 = vmatprep.subr.mxu0 %v6994_v63  ;;  %585 = vmatprep.subr.mxu1 %v7001_v21  ;;  %v7008_v63 = vld [vmem:[#allocation25_spill] sm:$0xff] }
  0xa9   :  { %609 = vmatpush1.msra.mxu0 %v6996_v55  ;;  %586 = vmatpush2.msra.mxu1 %v7003_v23  ;;  %v7010_v55 = vld [vmem:[#allocation26_spill] sm:$0xff] }
  0xaa   :  { %610 = vmatprep.subr.mxu0 %v6998_v53  ;;  %587 = vmatprep.subr.mxu1 %v7005_v24  ;;  %v7012_v53 = vld [vmem:[#allocation27_spill] sm:$0xff] }
  0xab   :  { %611 = vmatpush1.msra.mxu0 %v7000_v19  ;;  %588 = vmatpush2.msra.mxu1 %v7007_v61  ;;  %v7013_v19 = vld [vmem:[#allocation73_spill] sm:$0xff]  ;;  %v7018_v61 = vld [vmem:[#allocation32_spill] sm:$0xff] }
  0xac   :  { %612 = vmatprep.subr.mxu0 %v7002_v51  ;;  %589 = vmatprep.subr.mxu1 %v7009_v0  ;;  %v7014_v51 = vld [vmem:[#allocation28_spill] sm:$0xff]  ;;  %v7020_v0 = vld [vmem:[#allocation34_spill] sm:$0xff] }
  0xad   :  { %613 = vmatpush1.msra.mxu0 %v7004_v49  ;;  %590 = vmatpush2.msra.mxu1 %v7011_v57  ;;  %v7015_v49 = vld [vmem:[#allocation29_spill] sm:$0xff]  ;;  %v7022_v57 = vld [vmem:[#allocation36_spill] sm:$0xff] }
  0xae   :  { %614 = vmatprep.subr.mxu0 %v7006_v59  ;;  %669 = vmatprep.subr.mxu1 %v7013_v19  ;;  %v7017_v59 = vld [vmem:[#allocation31_spill] sm:$0xff]  ;;  %v7024_v19 = vld [vmem:[#allocation38_spill] sm:$0xff] }
  0xaf   :  { %615 = vmatpush1.msra.mxu0 %v7008_v63  ;;  %v7019_v63 = vld [vmem:[#allocation33_spill] sm:$0xff] }
  0xb0   :  { %616 = vmatprep.subr.mxu0 %v7010_v55  ;;  %v7021_v55 = vld [vmem:[#allocation35_spill] sm:$0xff] }
  0xb1   :  { %617 = vmatpush1.msra.mxu0 %v7012_v53  ;;  %v7023_v53 = vld [vmem:[#allocation37_spill] sm:$0xff] }
  0xb2   :  { %618 = vmatprep.subr.mxu0 %v7014_v51  ;;  %v7025_v51 = vld [vmem:[#allocation39_spill] sm:$0xff] }
  0xb3   :  { %619 = vmatpush1.msra.mxu0 %v7015_v49  ;;  %v7026_v49 = vld [vmem:[#allocation40_spill] sm:$0xff] }
  0xb4   :  { %620 = vmatprep.subr.mxu0 %v7016_v62  ;;  %v7027_v62 = vld [vmem:[#allocation42_spill] sm:$0xff] }
  0xb5   :  { %621 = vmatpush1.msra.mxu0 %v7017_v59  ;;  %v7028_v59 = vld [vmem:[#allocation44_spill] sm:$0xff] }
  0xb6   :  { %622 = vmatprep.subr.mxu0 %v7018_v61  ;;  %v7029_v61 = vld [vmem:[#allocation46_spill] sm:$0xff] }
  0xb7   :  { %623 = vmatpush1.msra.mxu0 %v7019_v63  ;;  %v7030_v63 = vld [vmem:[#allocation48_spill] sm:$0xff] }
  0xb8   :  { %624 = vmatprep.subr.mxu0 %v7020_v0  ;;  %v7031_v0 = vld [vmem:[#allocation50_spill] sm:$0xff] }
  0xb9   :  { %625 = vmatpush1.msra.mxu0 %v7021_v55  ;;  %v7032_v55 = vld [vmem:[#allocation52_spill] sm:$0xff] }
  0xba   :  { %626 = vmatprep.subr.mxu0 %v7022_v57  ;;  %v7033_v57 = vld [vmem:[#allocation54_spill] sm:$0xff] }
  0xbb   :  { %627 = vmatpush1.msra.mxu0 %v7023_v53  ;;  %v7034_v53 = vld [vmem:[#allocation56_spill] sm:$0xff] }
  0xbc   :  { %628 = vmatprep.subr.mxu0 %v7024_v19  ;;  %v7035_v19 = vld [vmem:[#allocation58_spill] sm:$0xff] }
  0xbd   :  { %629 = vmatpush1.msra.mxu0 %v7025_v51  ;;  %v7036_v51 = vld [vmem:[#allocation60_spill] sm:$0xff] }
  0xbe   :  { %630 = vmatprep.subr.mxu0 %v7026_v49  ;;  %v7037_v49 = vld [vmem:[#allocation62_spill] sm:$0xff] }
  0xbf   :  { %631 = vmatpush2.msra.mxu0 %v7027_v62  ;;  %v7038_v62 = vld [vmem:[#allocation64_spill] sm:$0xff] }
  0xc0   :  { %632 = vmatprep.subr.mxu0 %v7028_v59  ;;  %v7039_v59 = vld [vmem:[#allocation66_spill] sm:$0xff] }
  0xc1   :  { %633 = vmatpush2.msra.mxu0 %v7029_v61  ;;  %v7040_v61 = vld [vmem:[#allocation68_spill] sm:$0xff] }
  0xc2   :  { %634 = vmatprep.subr.mxu0 %v7030_v63  ;;  %v7041_v63 = vld [vmem:[#allocation70_spill] sm:$0xff] }
  0xc3   :  { %635 = vmatpush2.msra.mxu0 %v7031_v0  ;;  %v7042_v0 = vld [vmem:[#allocation72_spill] sm:$0xff] }
  0xc4   :  { %636 = vmatprep.subr.mxu0 %v7032_v55  ;;  %v7043_v55 = vld [vmem:[#allocation75_spill] sm:$0xff] }
  0xc5   :  { %637 = vmatpush2.msra.mxu0 %v7033_v57  ;;  %v7044_v57 = vld [vmem:[#allocation77_spill] sm:$0xff] }
  0xc6   :  { %638 = vmatprep.subr.mxu0 %v7034_v53  ;;  %v7045_v53 = vld [vmem:[#allocation79_spill] sm:$0xff] }
  0xc7   :  { %639 = vmatpush2.msra.mxu0 %v7035_v19  ;;  %v7046_v19 = vld [vmem:[#allocation81_spill] sm:$0xff] }
  0xc8   :  { %640 = vmatprep.subr.mxu0 %v7036_v51  ;;  %v7047_v51 = vld [vmem:[#allocation83_spill] sm:$0xff] }
  0xc9   :  { %641 = vmatpush2.msra.mxu0 %v7037_v49  ;;  %v7048_v49 = vld [vmem:[#allocation85_spill] sm:$0xff] }
  0xca   :  { %642 = vmatprep.subr.mxu0 %v7038_v62  ;;  %v7049_v62 = vld [vmem:[#allocation87_spill] sm:$0xff] }
  0xcb   :  { %643 = vmatpush2.msra.mxu0 %v7039_v59  ;;  %v7050_v59 = vld [vmem:[#allocation89_spill] sm:$0xff] }
  0xcc   :  { %644 = vmatprep.subr.mxu0 %v7040_v61  ;;  %v7051_v61 = vld [vmem:[#allocation91_spill] sm:$0xff] }
  0xcd   :  { %645 = vmatpush2.msra.mxu0 %v7041_v63  ;;  %v7052_v63 = vld [vmem:[#allocation93_spill] sm:$0xff] }
  0xce   :  { %646 = vmatprep.subr.mxu0 %v7042_v0  ;;  %v7053_v0 = vld [vmem:[#allocation97_spill] sm:$0xff] }
  0xcf   :  { %647 = vmatpush2.msra.mxu0 %v7043_v55  ;;  %v3996_v55 = vld [vmem:[#allocation6 + $0x2d8] sm:$0xff] }
  0xd0   :  { %648 = vmatprep.subr.mxu0 %v7044_v57  ;;  %7054 = vst [vmem:[#allocation41_spill] sm:$0xff] %v3996_v55 }
  0xd1   :  { %649 = vmatpush2.msra.mxu0 %v7045_v53  ;;  %v255_v53 = vld [vmem:[#allocation3] sm:$0xff] }
  0xd2   :  { %650 = vmatprep.subr.mxu0 %v7046_v19  ;;  %v256_v19 = vld [vmem:[#allocation3 + $0x8] sm:$0xff] }
  0xd3   :  { %651 = vmatpush2.msra.mxu0 %v7047_v51 }
  0xd4   :  { %652 = vmatprep.subr.mxu0 %v7048_v49 }
  0xd5   :  { %653 = vmatpush2.msra.mxu0 %v7049_v62 }
  0xd6   :  { %654 = vmatprep.subr.mxu0 %v7050_v59 }
  0xd7   :  { %655 = vmatpush2.msra.mxu0 %v7051_v61 }
  0xd8   :  { %656 = vmatprep.subr.mxu0 %v7052_v63  ;;  %v257_v63 = vld [vmem:[#allocation3 + $0x10] sm:$0xff] }
  0xd9   :  { %657 = vmatpush2.msra.mxu0 %v3688_v37 }
  0xda   :  { %658 = vmatprep.subr.mxu0 %v7053_v0 }
  0xdb   :  { %659 = vmatpush2.msra.mxu0 %v3700_v33 }
  0xdc   :  { %660 = vmatprep.subr.mxu0 %v3706_v41  ;;  %v258_v41 = vld [vmem:[#allocation3 + $0x18] sm:$0xff] }
  0xdd   :  { %661 = vmatpush2.msra.mxu0 %v3712_v39 }
  0xde   :  { %794 = vmatprep.subr.mxu0 %v3996_v55 }
 0x11e   :  { %v327_v57 = vpop.f32.mrf.mxu0 }
 0x11f   :  { %v474_v49 = vadd.f32 %v327_v57, %v255_v53  ;;  %v244_v53 = vshrl.u32 %v243_v56, 7 }
 0x120   :  { %v329_v51 = vpop.f32.mrf.mxu0 }
 0x121   :  { %v475_v62 = vadd.f32 %v329_v51, %v256_v19  ;;  %v2409_v59 = vmul.f32 -1.442695, %v474_v49  ;;  %v245_v19 = vsub.s32 0, %v244_v53  ;;  %v249_v49 = vsub.s32 1, %v244_v53 }
 0x123   :  { %v2410_v61 = vmul.f32 -1.442695, %v475_v62  ;;  %2449 = vpow2.f32 %v2409_v59 }
 0x125   :  { %2451 = vpow2.f32 %v2410_v61 }
 0x12b   :  { %v398_v0 = vpop.f32.mrf.mxu1 }
 0x12c   :  { %v488_v33 = vadd.f32 %v398_v0, %v257_v63  ;;  %v241_v0 = vld [vmem:[%s6450_s2] sm:$0x3]  ;;  %v260_v63 = vld [vmem:[#allocation3 + $0x28] sm:$0xff]  ;;  %s3256_s2 = smov [#allocation8]  }
 0x12d   :  { %v400_v37 = vpop.f32.mrf.mxu1  ;;  %s2396_s24 = sshll.u32 %s3256_s2, 4  ;;  %s2397_s24 = int_to_ptr.vmem [resolvable:$true] %s2396_s24 }
 0x12e   :  { %v2411_v39 = vmul.f32 -1.442695, %v488_v33  ;;  %v489_v60 = vadd.f32 %v400_v37, %v258_v41  ;;  %v4002_v37 = vrot.slane %v241_v0, %v245_v19  ;;  %v4004_v41 = vrot.slane %v241_v0, %v249_v49  ;;  %s3225_s25 = scalar_lea.vmem %s2397_s24, 2048  ;;  %p3230_p11 = scmp.lt.s32.totalorder %s2397_s24, %s2397_s24 }
 0x12f   :  { %p3226_p10 = scmp.ne.s32.totalorder %s2397_s24, %s3225_s25  ;;  %p3231_p12 = scmp.lt.s32.totalorder %s3225_s25, %s3225_s25 }
 0x130   :  { %2453 = vpow2.f32 %v2411_v39  ;;  %v2412_v24 = vmul.f32 -1.442695, %v489_v60  ;;  %v2450_v55 = vpop.eup %2449  ;;  %7055 = vst [vmem:[#allocation12_spill] sm:$0xff] %v4002_v37 }
 0x131   :  { %v482_v23 = vadd.f32 1.0, %v2450_v55  ;;  %p3232_p13 = por %p3231_p12, %p3230_p11 }
 0x132   :  { %v2452_v58 = vpop.eup %2451  ;;  %2455 = vpow2.f32 %v2412_v24 }
 0x133   :  { %v483_v57 = vadd.f32 1.0, %v2452_v58  ;;  %2457 = vrcp.f32 %v482_v23  ;;  %v259_v23 = vld [vmem:[#allocation3 + $0x20] sm:$0xff]  ;;  %p3233_p0 = pnand %p3232_p13, %p3226_p10 }
 0x135   :  { %2459 = vrcp.f32 %v483_v57 }
 0x13d   :  { %v2454_v51 = vpop.eup %2453 }
 0x13e   :  { %v496_v33 = vadd.f32 1.0, %v2454_v51 }
 0x13f   :  { %v2456_v39 = vpop.eup %2455 }
 0x140   :  { %2461 = vrcp.f32 %v496_v33  ;;  %v497_v24 = vadd.f32 1.0, %v2456_v39  ;;  %v2458_v56 = vpop.eup %2457 }
 0x142   :  { %v2460_v61 = vpop.eup %2459  ;;  %2463 = vrcp.f32 %v497_v24  ;;  %v7056_v24 = vld [vmem:[#allocation74_spill] sm:$0xff] }
 0x14d   :  { %v2462_v51 = vpop.eup %2461 }
 0x14e   :  { %v510_v0 = vsub.f32 1.0, %v2462_v51 }
 0x14f   :  { %v2464_v49 = vpop.eup %2463 }
 0x150   :  { %v511_v39 = vsub.f32 1.0, %v2464_v49 }
 0x15e   :  { %v469_v60 = vpop.f32.mrf.mxu0 }
 0x15f   :  { %v502_v58 = vadd.f32 %v469_v60, %v4002_v37  ;;  %v514_v37 = vmul.f32 0.0, %v2462_v51  ;;  %v4041_v51 = vld [vmem:[#allocation6 + $0x248] sm:$0xff] }
 0x160   :  { %v471_v55 = vpop.f32.mrf.mxu0 }
 0x161   :  { %v504_v62 = vmul.f32 %v2458_v56, %v502_v58  ;;  %v503_v59 = vadd.f32 %v471_v55, %v4004_v41  ;;  %v515_v58 = vmul.f32 0.0, %v2464_v49  ;;  %v4045_v49 = vld [vmem:[#allocation6 + $0x240] sm:$0xff] }
 0x163   :  { %v506_v57 = vadd.f32 %v504_v62, %v259_v23  ;;  %v505_v53 = vmul.f32 %v2460_v61, %v503_v59  ;;  %v4025_v23 = vld [vmem:[#allocation6 + $0x2a8] sm:$0xff]  ;;  %v7059_v62 = vld [vmem:[#allocation80_spill] sm:$0xff]  ;;  %v7060_v61 = vld [vmem:[#allocation82_spill] sm:$0xff] }
 0x164   :  { %v4029_v59 = vld [vmem:[#allocation6 + $0x2a0] sm:$0xff] }
 0x165   :  { %2465 = vtanh.f32 %v506_v57  ;;  %v507_v19 = vadd.f32 %v505_v53, %v260_v63  ;;  %v4033_v63 = vld [vmem:[#allocation6 + $0x278] sm:$0xff]  ;;  %v7061_v57 = vld [vmem:[#allocation84_spill] sm:$0xff]  ;;  %v4037_v53 = vld [vmem:[#allocation6 + $0x270] sm:$0xff] }
 0x167   :  { %2467 = vtanh.f32 %v507_v19  ;;  %v7062_v19 = vld [vmem:[#allocation86_spill] sm:$0xff] }
 0x172   :  { %v2466_v33 = vpop.eup %2465 }
 0x173   :  { %v512_v60 = vmul.f32 %v2466_v33, %v510_v0  ;;  %v7063_v0 = vld [vmem:[#allocation88_spill] sm:$0xff]  ;;  %v7064_v33 = vld [vmem:[#allocation90_spill] sm:$0xff] }
 0x174   :  { %v2468_v21 = vpop.eup %2467 }
 0x175   :  { %v513_v54 = vmul.f32 %v2468_v21, %v511_v39  ;;  %v4008_v56 = vadd.f32 %v514_v37, %v512_v60  ;;  %v7057_v21 = vld [vmem:[#allocation76_spill] sm:$0xff]  ;;  %v7058_v37 = vld [vmem:[#allocation78_spill] sm:$0xff]  ;;  %v4049_v39 = vld [vmem:[#allocation6 + $0x218] sm:$0xff] }
 0x176   :  { %v7065_v60 = vld [vmem:[#allocation92_spill] sm:$0xff] }
 0x177   :  { %v4010_v55 = vadd.f32 %v515_v58, %v513_v54  ;;  %518 = vst [vmem:[#allocation8] sm:$0xff] %v4008_v56  ;;  %v4021_v54 = vld [vmem:[#allocation6 + $0x2d0] sm:$0xff] }
 0x178   :  { %v4053_v58 = vld [vmem:[#allocation6 + $0x210] sm:$0xff] }
 0x179   :  { %519 = vst [vmem:[#allocation8 + $0x8] sm:$0xff] %v4010_v55  ;;  %591 = vmatprep.mubr.f32.mxu1 %v4010_v55  ;;  %662 = vmatprep.mubr.f32.mxu0 %v4010_v55 }
 0x17a   :  { %592 = vmatmul.mubr.f32.vlgmr.msra.gmra.mxu1 %v4008_v56  ;;  %663 = vmatmul.mubr.f32.vlgmr.msra.gmra.mxu0 %v4008_v56 }
 0x17b   :  { %670 = vmatpush1.msra.mxu1 %v7056_v24  ;;  %733 = vmatprep.mubr.f32.mxu1 %v4010_v55  ;;  %v7066_v24 = vld [vmem:[#allocation94_spill] sm:$0xff] }
 0x17c   :  { %671 = vmatprep.subr.mxu1 %v7057_v21  ;;  %795 = vmatpush1.msra.mxu0 %v4021_v54  ;;  %v4057_v21 = vld [vmem:[#allocation6 + $0x1e8] sm:$0xff] }
 0x17d   :  { %672 = vmatpush1.msra.mxu1 %v7058_v37  ;;  %796 = vmatprep.subr.mxu0 %v4025_v23  ;;  %v7067_v37 = vld [vmem:[#allocation96_spill] sm:$0xff] }
 0x17e   :  { %673 = vmatprep.subr.mxu1 %v7059_v62  ;;  %797 = vmatpush1.msra.mxu0 %v4029_v59  ;;  %v4061_v62 = vld [vmem:[#allocation6 + $0x1e0] sm:$0xff] }
 0x17f   :  { %674 = vmatpush1.msra.mxu1 %v7060_v61  ;;  %798 = vmatprep.subr.mxu0 %v4033_v63  ;;  %v7068_v61 = vld [vmem:[#allocation98_spill] sm:$0xff] }
 0x180   :  { %675 = vmatprep.subr.mxu1 %v7061_v57  ;;  %799 = vmatpush1.msra.mxu0 %v4037_v53  ;;  %v4065_v57 = vld [vmem:[#allocation6 + $0x1b8] sm:$0xff] }
 0x181   :  { %676 = vmatpush1.msra.mxu1 %v7062_v19  ;;  %800 = vmatprep.subr.mxu0 %v4041_v51  ;;  %7069 = vst [vmem:[#allocation43_spill] sm:$0xff] %v4065_v57  ;;  %v7070_v19 = vld [vmem:[#allocation100_spill] sm:$0xff] }
 0x182   :  { %677 = vmatprep.subr.mxu1 %v7063_v0  ;;  %801 = vmatpush1.msra.mxu0 %v4045_v49  ;;  %v4069_v0 = vld [vmem:[#allocation6 + $0x1b0] sm:$0xff] }
 0x183   :  { %678 = vmatpush1.msra.mxu1 %v7064_v33  ;;  %802 = vmatprep.subr.mxu0 %v4049_v39  ;;  %v7071_v33 = vld [vmem:[#allocation102_spill] sm:$0xff] }
 0x184   :  { %679 = vmatprep.subr.mxu1 %v7065_v60  ;;  %803 = vmatpush1.msra.mxu0 %v4053_v58  ;;  %v4073_v60 = vld [vmem:[#allocation6 + $0x188] sm:$0xff] }
 0x185   :  { %680 = vmatpush1.msra.mxu1 %v7066_v24  ;;  %804 = vmatprep.subr.mxu0 %v4057_v21  ;;  %v7072_v24 = vld [vmem:[#allocation104_spill] sm:$0xff] }
 0x186   :  { %681 = vmatprep.subr.mxu1 %v7067_v37  ;;  %805 = vmatpush1.msra.mxu0 %v4061_v62  ;;  %v4077_v37 = vld [vmem:[#allocation6 + $0x180] sm:$0xff] }
 0x187   :  { %682 = vmatpush1.msra.mxu1 %v7068_v61  ;;  %806 = vmatprep.subr.mxu0 %v4065_v57  ;;  %v7073_v61 = vld [vmem:[#allocation105_spill] sm:$0xff]  ;;  %v4081_v57 = vld [vmem:[#allocation6 + $0x158] sm:$0xff] }
 0x188   :  { %683 = vmatprep.subr.mxu1 %v7070_v19  ;;  %807 = vmatpush1.msra.mxu0 %v4069_v0  ;;  %v4085_v19 = vld [vmem:[#allocation6 + $0x150] sm:$0xff] }
 0x189   :  { %684 = vmatpush1.msra.mxu1 %v7071_v33  ;;  %808 = vmatprep.subr.mxu0 %v4073_v60  ;;  %v4089_v33 = vld [vmem:[#allocation6 + $0x128] sm:$0xff] }
 0x18a   :  { %685 = vmatprep.subr.mxu1 %v7072_v24  ;;  %809 = vmatpush1.msra.mxu0 %v4077_v37  ;;  %v4093_v24 = vld [vmem:[#allocation6 + $0x120] sm:$0xff] }
 0x18b   :  { %686 = vmatpush1.msra.mxu1 %v7073_v61  ;;  %810 = vmatprep.subr.mxu0 %v4081_v57  ;;  %v4097_v61 = vld [vmem:[#allocation6 + $0xf8] sm:$0xff] }
 0x18c   :  { %687 = vmatprep.subr.mxu1 %v3723_v26  ;;  %811 = vmatpush1.msra.mxu0 %v4085_v19  ;;  %v4101_v26 = vld [vmem:[#allocation6 + $0xf0] sm:$0xff] }
 0x18d   :  { %688 = vmatpush1.msra.mxu1 %v3727_v35  ;;  %812 = vmatprep.subr.mxu0 %v4089_v33  ;;  %v4105_v35 = vld [vmem:[#allocation6 + $0xc8] sm:$0xff] }
 0x18e   :  { %689 = vmatprep.subr.mxu1 %v3731_v45  ;;  %813 = vmatpush1.msra.mxu0 %v4093_v24  ;;  %v4109_v45 = vld [vmem:[#allocation6 + $0xc0] sm:$0xff] }
 0x18f   :  { %690 = vmatpush1.msra.mxu1 %v3735_v31  ;;  %814 = vmatprep.subr.mxu0 %v4097_v61  ;;  %v4113_v31 = vld [vmem:[#allocation6 + $0x98] sm:$0xff] }
 0x190   :  { %691 = vmatprep.subr.mxu1 %v3739_v29  ;;  %815 = vmatpush1.msra.mxu0 %v4101_v26  ;;  %v4117_v29 = vld [vmem:[#allocation6 + $0x90] sm:$0xff] }
 0x191   :  { %692 = vmatpush1.msra.mxu1 %v3743_v28  ;;  %816 = vmatprep.subr.mxu0 %v4105_v35  ;;  %v4121_v28 = vld [vmem:[#allocation6 + $0x68] sm:$0xff] }
 0x192   :  { %693 = vmatprep.subr.mxu1 %v3747_v47  ;;  %817 = vmatpush1.msra.mxu0 %v4109_v45  ;;  %v4125_v47 = vld [vmem:[#allocation6 + $0x60] sm:$0xff] }
 0x193   :  { %694 = vmatpush1.msra.mxu1 %v3751_v1  ;;  %818 = vmatprep.subr.mxu0 %v4113_v31  ;;  %v4129_v1 = vld [vmem:[#allocation6 + $0x38] sm:$0xff] }
 0x194   :  { %695 = vmatprep.subr.mxu1 %v3755_v2  ;;  %819 = vmatpush1.msra.mxu0 %v4117_v29  ;;  %v4133_v2 = vld [vmem:[#allocation6 + $0x30] sm:$0xff] }
 0x195   :  { %696 = vmatpush1.msra.mxu1 %v3759_v3  ;;  %820 = vmatprep.subr.mxu0 %v4121_v28  ;;  %v4137_v3 = vld [vmem:[#allocation6 + $0x8] sm:$0xff] }
 0x196   :  { %697 = vmatprep.subr.mxu1 %v3763_v4  ;;  %821 = vmatpush1.msra.mxu0 %v4125_v47  ;;  %v4141_v4 = vld [vmem:[#allocation6] sm:$0xff] }
 0x197   :  { %698 = vmatpush1.msra.mxu1 %v3767_v5  ;;  %822 = vmatprep.subr.mxu0 %v4129_v1  ;;  %v4145_v5 = vld [vmem:[#allocation6 + $0x5d8] sm:$0xff] }
 0x198   :  { %699 = vmatprep.subr.mxu1 %v3771_v6  ;;  %823 = vmatpush1.msra.mxu0 %v4133_v2  ;;  %v4149_v6 = vld [vmem:[#allocation6 + $0x5d0] sm:$0xff] }
 0x199   :  { %700 = vmatpush1.msra.mxu1 %v3775_v7  ;;  %824 = vmatprep.subr.mxu0 %v4137_v3  ;;  %v4153_v7 = vld [vmem:[#allocation6 + $0x5a8] sm:$0xff] }
 0x19a   :  { %701 = vmatprep.subr.mxu1 %v3779_v8  ;;  %825 = vmatpush1.msra.mxu0 %v4141_v4  ;;  %v4157_v8 = vld [vmem:[#allocation6 + $0x5a0] sm:$0xff] }
 0x19b   :  { %702 = vmatpush2.msra.mxu1 %v3783_v9  ;;  %826 = vmatprep.subr.mxu0 %v4145_v5  ;;  %v4161_v9 = vld [vmem:[#allocation6 + $0x578] sm:$0xff] }
 0x19c   :  { %703 = vmatprep.subr.mxu1 %v3787_v10  ;;  %827 = vmatpush2.msra.mxu0 %v4149_v6  ;;  %v4165_v10 = vld [vmem:[#allocation6 + $0x570] sm:$0xff] }
 0x19d   :  { %704 = vmatpush2.msra.mxu1 %v3791_v11  ;;  %828 = vmatprep.subr.mxu0 %v4153_v7  ;;  %v4169_v11 = vld [vmem:[#allocation6 + $0x548] sm:$0xff] }
 0x19e   :  { %705 = vmatprep.subr.mxu1 %v3795_v12  ;;  %829 = vmatpush2.msra.mxu0 %v4157_v8  ;;  %v4173_v12 = vld [vmem:[#allocation6 + $0x540] sm:$0xff] }
 0x19f   :  { %706 = vmatpush2.msra.mxu1 %v3799_v13  ;;  %830 = vmatprep.subr.mxu0 %v4161_v9  ;;  %v4177_v13 = vld [vmem:[#allocation6 + $0x518] sm:$0xff] }
 0x1a0   :  { %707 = vmatprep.subr.mxu1 %v3803_v14  ;;  %831 = vmatpush2.msra.mxu0 %v4165_v10  ;;  %v4181_v14 = vld [vmem:[#allocation6 + $0x510] sm:$0xff] }
 0x1a1   :  { %708 = vmatpush2.msra.mxu1 %v3807_v15  ;;  %832 = vmatprep.subr.mxu0 %v4169_v11  ;;  %v4185_v15 = vld [vmem:[#allocation6 + $0x4e8] sm:$0xff] }
 0x1a2   :  { %709 = vmatprep.subr.mxu1 %v3811_v16  ;;  %833 = vmatpush2.msra.mxu0 %v4173_v12  ;;  %v4189_v16 = vld [vmem:[#allocation6 + $0x4e0] sm:$0xff] }
 0x1a3   :  { %710 = vmatpush2.msra.mxu1 %v3815_v17  ;;  %834 = vmatprep.subr.mxu0 %v4177_v13  ;;  %7074 = vst [vmem:[#allocation13_spill] sm:$0xff] %v4189_v16  ;;  %v4193_v17 = vld [vmem:[#allocation6 + $0x4b8] sm:$0xff] }
 0x1a4   :  { %711 = vmatprep.subr.mxu1 %v3819_v18  ;;  %835 = vmatpush2.msra.mxu0 %v4181_v14  ;;  %7075 = vst [vmem:[#allocation45_spill] sm:$0xff] %v4193_v17  ;;  %v4197_v18 = vld [vmem:[#allocation6 + $0x4b0] sm:$0xff] }
 0x1a5   :  { %712 = vmatpush2.msra.mxu1 %v3823_v20  ;;  %836 = vmatprep.subr.mxu0 %v4185_v15  ;;  %7076 = vst [vmem:[#allocation14_spill] sm:$0xff] %v4197_v18  ;;  %v4201_v20 = vld [vmem:[#allocation6 + $0x488] sm:$0xff] }
 0x1a6   :  { %713 = vmatprep.subr.mxu1 %v3827_v22  ;;  %837 = vmatpush2.msra.mxu0 %v4189_v16  ;;  %7077 = vst [vmem:[#allocation47_spill] sm:$0xff] %v4201_v20  ;;  %v4205_v22 = vld [vmem:[#allocation6 + $0x480] sm:$0xff] }
 0x1a7   :  { %714 = vmatpush2.msra.mxu1 %v3831_v25  ;;  %838 = vmatprep.subr.mxu0 %v4193_v17  ;;  %7078 = vst [vmem:[#allocation15_spill] sm:$0xff] %v4205_v22  ;;  %v4209_v25 = vld [vmem:[#allocation6 + $0x458] sm:$0xff] }
 0x1a8   :  { %715 = vmatprep.subr.mxu1 %v3835_v27  ;;  %839 = vmatpush2.msra.mxu0 %v4197_v18  ;;  %7079 = vst [vmem:[#allocation49_spill] sm:$0xff] %v4209_v25  ;;  %v4213_v27 = vld [vmem:[#allocation6 + $0x450] sm:$0xff] }
 0x1a9   :  { %716 = vmatpush2.msra.mxu1 %v3839_v30  ;;  %840 = vmatprep.subr.mxu0 %v4201_v20  ;;  %7080 = vst [vmem:[#allocation16_spill] sm:$0xff] %v4213_v27  ;;  %v4217_v30 = vld [vmem:[#allocation6 + $0x428] sm:$0xff] }
 0x1aa   :  { %717 = vmatprep.subr.mxu1 %v3843_v32  ;;  %841 = vmatpush2.msra.mxu0 %v4205_v22  ;;  %7081 = vst [vmem:[#allocation51_spill] sm:$0xff] %v4217_v30  ;;  %v4221_v32 = vld [vmem:[#allocation6 + $0x420] sm:$0xff] }
 0x1ab   :  { %718 = vmatpush2.msra.mxu1 %v3847_v34  ;;  %842 = vmatprep.subr.mxu0 %v4209_v25  ;;  %7082 = vst [vmem:[#allocation17_spill] sm:$0xff] %v4221_v32  ;;  %v4225_v34 = vld [vmem:[#allocation6 + $0x3f8] sm:$0xff]  ;;  %v524_v25 = vld [vmem:[#allocation3 + $0x48] sm:$0xff] }
 0x1ac   :  { %719 = vmatprep.subr.mxu1 %v3851_v36  ;;  %843 = vmatpush2.msra.mxu0 %v4213_v27  ;;  %7083 = vst [vmem:[#allocation53_spill] sm:$0xff] %v4225_v34  ;;  %v4229_v36 = vld [vmem:[#allocation6 + $0x3f0] sm:$0xff] }
 0x1ad   :  { %720 = vmatpush2.msra.mxu1 %v3855_v38  ;;  %844 = vmatprep.subr.mxu0 %v4217_v30  ;;  %7084 = vst [vmem:[#allocation18_spill] sm:$0xff] %v4229_v36  ;;  %v4233_v38 = vld [vmem:[#allocation6 + $0x3c8] sm:$0xff] }
 0x1ae   :  { %721 = vmatprep.subr.mxu1 %v3859_v40  ;;  %845 = vmatpush2.msra.mxu0 %v4221_v32  ;;  %7085 = vst [vmem:[#allocation55_spill] sm:$0xff] %v4233_v38  ;;  %v4237_v40 = vld [vmem:[#allocation6 + $0x3c0] sm:$0xff] }
 0x1af   :  { %722 = vmatpush2.msra.mxu1 %v3863_v42  ;;  %846 = vmatprep.subr.mxu0 %v4225_v34  ;;  %7086 = vst [vmem:[#allocation19_spill] sm:$0xff] %v4237_v40  ;;  %v4241_v42 = vld [vmem:[#allocation6 + $0x398] sm:$0xff] }
 0x1b0   :  { %723 = vmatprep.subr.mxu1 %v3867_v44  ;;  %847 = vmatpush2.msra.mxu0 %v4229_v36  ;;  %7087 = vst [vmem:[#allocation57_spill] sm:$0xff] %v4241_v42  ;;  %v7088_v44 = vld [vmem:[#allocation106_spill] sm:$0xff]  ;;  %v7092_v36 = vld [vmem:[#allocation108_spill] sm:$0xff]  ;;  %v7095_v34 = vld [vmem:[#allocation67_spill] sm:$0xff] }
 0x1b1   :  { %724 = vmatpush2.msra.mxu1 %v3871_v46  ;;  %848 = vmatprep.subr.mxu0 %v4233_v38  ;;  %v7089_v46 = vld [vmem:[#allocation61_spill] sm:$0xff]  ;;  %v7090_v38 = vld [vmem:[#allocation107_spill] sm:$0xff] }
 0x1b2   :  { %725 = vmatprep.subr.mxu1 %v3875_v48  ;;  %849 = vmatpush2.msra.mxu0 %v4237_v40  ;;  %v7091_v48 = vld [vmem:[#allocation63_spill] sm:$0xff]  ;;  %v7093_v40 = vld [vmem:[#allocation65_spill] sm:$0xff] }
 0x1b3   :  { %726 = vmatpush2.msra.mxu1 %v3879_v50  ;;  %850 = vmatprep.subr.mxu0 %v4241_v42  ;;  %v7094_v50 = vld [vmem:[#allocation109_spill] sm:$0xff]  ;;  %v7096_v42 = vld [vmem:[#allocation110_spill] sm:$0xff] }
 0x1b4   :  { %727 = vmatprep.subr.mxu1 %v3883_v52  ;;  %851 = vmatpush2.msra.mxu0 %v6999_v43  ;;  %v7097_v52 = vld [vmem:[#allocation69_spill] sm:$0xff] }
 0x1b5   :  { %728 = vmatpush2.msra.mxu1 %v7088_v44  ;;  %852 = vmatprep.subr.mxu0 %v7089_v46  ;;  %v4257_v43 = vld [vmem:[#allocation6 + $0x2e8] sm:$0xff]  ;;  %v4274_v46 = vld [vmem:[#allocation6 + $0x280] sm:$0xff] }
 0x1b6   :  { %729 = vmatprep.subr.mxu1 %v7090_v38  ;;  %853 = vmatpush2.msra.mxu0 %v7091_v48  ;;  %7098 = vst [vmem:[#allocation20_spill] sm:$0xff] %v4257_v43  ;;  %v4260_v38 = vld [vmem:[#allocation6 + $0x2e0] sm:$0xff]  ;;  %v4271_v44 = vld [vmem:[#allocation6 + $0x288] sm:$0xff]  ;;  %7105 = vst [vmem:[#allocation24_spill] sm:$0xff] %v4274_v46 }
 0x1b7   :  { %730 = vmatpush2.msra.mxu1 %v7092_v36  ;;  %854 = vmatprep.subr.mxu0 %v7093_v40  ;;  %7099 = vst [vmem:[#allocation59_spill] sm:$0xff] %v4260_v38  ;;  %v7100_v36 = vld [vmem:[#allocation71_spill] sm:$0xff]  ;;  %7104 = vst [vmem:[#allocation23_spill] sm:$0xff] %v4271_v44 }
 0x1b8   :  { %731 = vmatprep.subr.mxu1 %v7094_v50  ;;  %855 = vmatpush2.msra.mxu0 %v7095_v34  ;;  %v4264_v40 = vld [vmem:[#allocation6 + $0x2b8] sm:$0xff]  ;;  %v7102_v34 = vld [vmem:[#allocation73_spill] sm:$0xff]  ;;  %v4280_v50 = vld [vmem:[#allocation6 + $0x250] sm:$0xff] }
 0x1b9   :  { %732 = vmatpush2.msra.mxu1 %v7096_v42  ;;  %856 = vmatprep.subr.mxu0 %v7097_v52  ;;  %7101 = vst [vmem:[#allocation21_spill] sm:$0xff] %v4264_v40  ;;  %v4268_v42 = vld [vmem:[#allocation6 + $0x2b0] sm:$0xff]  ;;  %v4277_v48 = vld [vmem:[#allocation6 + $0x258] sm:$0xff]  ;;  %7107 = vst [vmem:[#allocation26_spill] sm:$0xff] %v4280_v50 }
 0x1ba   :  { %734 = vmatmul.mubr.f32.vlgmr.msra.gmra.mxu1 %v4008_v56  ;;  %865 = vmatprep.subr.mxu1 %v4257_v43  ;;  %7103 = vst [vmem:[#allocation22_spill] sm:$0xff] %v4268_v42  ;;  %7106 = vst [vmem:[#allocation25_spill] sm:$0xff] %v4277_v48  ;;  %v4283_v52 = vld [vmem:[#allocation6 + $0x228] sm:$0xff]  ;;  %v522_v43 = vld [vmem:[#allocation3 + $0x38] sm:$0xff] }
 0x1bb   :  { %866 = vmatpush1.msra.mxu1 %v4260_v38  ;;  %857 = vmatpush2.msra.mxu0 %v7100_v36  ;;  %7108 = vst [vmem:[#allocation27_spill] sm:$0xff] %v4283_v52  ;;  %v4286_v36 = vld [vmem:[#allocation6 + $0x220] sm:$0xff]  ;;  %v521_v38 = vld [vmem:[#allocation3 + $0x30] sm:$0xff] }
 0x1bc   :  { %867 = vmatprep.subr.mxu1 %v4264_v40  ;;  %936 = vmatprep.subr.mxu0 %v7102_v34  ;;  %7109 = vst [vmem:[#allocation28_spill] sm:$0xff] %v4286_v36  ;;  %v4289_v34 = vld [vmem:[#allocation6 + $0x1f8] sm:$0xff]  ;;  %v7164_v40 = vld [vmem:[#allocation41_spill] sm:$0xff] }
 0x1bd   :  { %868 = vmatpush1.msra.mxu1 %v4268_v42  ;;  %7110 = vst [vmem:[#allocation29_spill] sm:$0xff] %v4289_v34  ;;  %v7162_v42 = vld [vmem:[#allocation101_spill] sm:$0xff] }
 0x1be   :  { %869 = vmatprep.subr.mxu1 %v4271_v44  ;;  %v7160_v44 = vld [vmem:[#allocation97_spill] sm:$0xff] }
 0x1bf   :  { %870 = vmatpush1.msra.mxu1 %v4274_v46  ;;  %v4292_v46 = vld [vmem:[#allocation6 + $0x1f0] sm:$0xff] }
 0x1c0   :  { %871 = vmatprep.subr.mxu1 %v4277_v48  ;;  %7111 = vst [vmem:[#allocation30_spill] sm:$0xff] %v4292_v46  ;;  %v4295_v48 = vld [vmem:[#allocation6 + $0x1c8] sm:$0xff] }
 0x1c1   :  { %872 = vmatpush1.msra.mxu1 %v4280_v50  ;;  %7112 = vst [vmem:[#allocation31_spill] sm:$0xff] %v4295_v48  ;;  %v4298_v50 = vld [vmem:[#allocation6 + $0x1c0] sm:$0xff] }
 0x1c2   :  { %873 = vmatprep.subr.mxu1 %v4283_v52  ;;  %7113 = vst [vmem:[#allocation32_spill] sm:$0xff] %v4298_v50  ;;  %v4301_v52 = vld [vmem:[#allocation6 + $0x198] sm:$0xff] }
 0x1c3   :  { %874 = vmatpush1.msra.mxu1 %v4286_v36  ;;  %7114 = vst [vmem:[#allocation33_spill] sm:$0xff] %v4301_v52  ;;  %v4304_v36 = vld [vmem:[#allocation6 + $0x190] sm:$0xff] }
 0x1c4   :  { %875 = vmatprep.subr.mxu1 %v4289_v34  ;;  %7115 = vst [vmem:[#allocation34_spill] sm:$0xff] %v4304_v36  ;;  %v4307_v34 = vld [vmem:[#allocation6 + $0x168] sm:$0xff] }
 0x1c5   :  { %876 = vmatpush1.msra.mxu1 %v4292_v46  ;;  %7116 = vst [vmem:[#allocation35_spill] sm:$0xff] %v4307_v34  ;;  %v4310_v46 = vld [vmem:[#allocation6 + $0x160] sm:$0xff] }
 0x1c6   :  { %877 = vmatprep.subr.mxu1 %v4295_v48  ;;  %7117 = vst [vmem:[#allocation36_spill] sm:$0xff] %v4310_v46  ;;  %v4313_v48 = vld [vmem:[#allocation6 + $0x138] sm:$0xff] }
 0x1c7   :  { %878 = vmatpush1.msra.mxu1 %v4298_v50  ;;  %7118 = vst [vmem:[#allocation37_spill] sm:$0xff] %v4313_v48  ;;  %v4316_v50 = vld [vmem:[#allocation6 + $0x130] sm:$0xff] }
 0x1c8   :  { %879 = vmatprep.subr.mxu1 %v4301_v52  ;;  %7119 = vst [vmem:[#allocation38_spill] sm:$0xff] %v4316_v50  ;;  %v4319_v52 = vld [vmem:[#allocation6 + $0x108] sm:$0xff] }
 0x1c9   :  { %880 = vmatpush1.msra.mxu1 %v4304_v36  ;;  %7120 = vst [vmem:[#allocation39_spill] sm:$0xff] %v4319_v52  ;;  %v4322_v36 = vld [vmem:[#allocation6 + $0x100] sm:$0xff] }
 0x1ca   :  { %881 = vmatprep.subr.mxu1 %v4307_v34  ;;  %7121 = vst [vmem:[#allocation40_spill] sm:$0xff] %v4322_v36  ;;  %v4325_v34 = vld [vmem:[#allocation6 + $0xd8] sm:$0xff] }
 0x1cb   :  { %882 = vmatpush1.msra.mxu1 %v4310_v46  ;;  %7122 = vst [vmem:[#allocation42_spill] sm:$0xff] %v4325_v34  ;;  %v4328_v46 = vld [vmem:[#allocation6 + $0xd0] sm:$0xff] }
 0x1cc   :  { %883 = vmatprep.subr.mxu1 %v4313_v48  ;;  %7123 = vst [vmem:[#allocation44_spill] sm:$0xff] %v4328_v46  ;;  %v4331_v48 = vld [vmem:[#allocation6 + $0xa8] sm:$0xff] }
 0x1cd   :  { %884 = vmatpush1.msra.mxu1 %v4316_v50  ;;  %7124 = vst [vmem:[#allocation46_spill] sm:$0xff] %v4331_v48  ;;  %v4334_v50 = vld [vmem:[#allocation6 + $0xa0] sm:$0xff] }
 0x1ce   :  { %885 = vmatprep.subr.mxu1 %v4319_v52  ;;  %7125 = vst [vmem:[#allocation48_spill] sm:$0xff] %v4334_v50  ;;  %v4337_v52 = vld [vmem:[#allocation6 + $0x78] sm:$0xff] }
 0x1cf   :  { %886 = vmatpush1.msra.mxu1 %v4322_v36  ;;  %7126 = vst [vmem:[#allocation50_spill] sm:$0xff] %v4337_v52  ;;  %v4340_v36 = vld [vmem:[#allocation6 + $0x70] sm:$0xff] }
 0x1d0   :  { %887 = vmatprep.subr.mxu1 %v4325_v34  ;;  %7127 = vst [vmem:[#allocation52_spill] sm:$0xff] %v4340_v36  ;;  %v4343_v34 = vld [vmem:[#allocation6 + $0x48] sm:$0xff] }
 0x1d1   :  { %888 = vmatpush1.msra.mxu1 %v4328_v46  ;;  %7128 = vst [vmem:[#allocation54_spill] sm:$0xff] %v4343_v34  ;;  %v4346_v46 = vld [vmem:[#allocation6 + $0x40] sm:$0xff] }
 0x1d2   :  { %889 = vmatprep.subr.mxu1 %v4331_v48  ;;  %7129 = vst [vmem:[#allocation56_spill] sm:$0xff] %v4346_v46  ;;  %v4349_v48 = vld [vmem:[#allocation6 + $0x18] sm:$0xff] }
 0x1d3   :  { %890 = vmatpush1.msra.mxu1 %v4334_v50  ;;  %7130 = vst [vmem:[#allocation58_spill] sm:$0xff] %v4349_v48  ;;  %v4352_v50 = vld [vmem:[#allocation6 + $0x10] sm:$0xff] }
 0x1d4   :  { %891 = vmatprep.subr.mxu1 %v4337_v52  ;;  %7131 = vst [vmem:[#allocation60_spill] sm:$0xff] %v4352_v50  ;;  %v4355_v52 = vld [vmem:[#allocation6 + $0x5e8] sm:$0xff] }
 0x1d5   :  { %892 = vmatpush1.msra.mxu1 %v4340_v36  ;;  %7132 = vst [vmem:[#allocation62_spill] sm:$0xff] %v4355_v52  ;;  %v4358_v36 = vld [vmem:[#allocation6 + $0x5e0] sm:$0xff] }
 0x1d6   :  { %893 = vmatprep.subr.mxu1 %v4343_v34  ;;  %7133 = vst [vmem:[#allocation64_spill] sm:$0xff] %v4358_v36  ;;  %v4361_v34 = vld [vmem:[#allocation6 + $0x5b8] sm:$0xff] }
 0x1d7   :  { %894 = vmatpush1.msra.mxu1 %v4346_v46  ;;  %7134 = vst [vmem:[#allocation66_spill] sm:$0xff] %v4361_v34  ;;  %v4364_v46 = vld [vmem:[#allocation6 + $0x5b0] sm:$0xff] }
 0x1d8   :  { %895 = vmatprep.subr.mxu1 %v4349_v48  ;;  %7135 = vst [vmem:[#allocation68_spill] sm:$0xff] %v4364_v46  ;;  %v4367_v48 = vld [vmem:[#allocation6 + $0x588] sm:$0xff] }
 0x1d9   :  { %896 = vmatpush1.msra.mxu1 %v4352_v50  ;;  %7136 = vst [vmem:[#allocation70_spill] sm:$0xff] %v4367_v48  ;;  %v4370_v50 = vld [vmem:[#allocation6 + $0x580] sm:$0xff] }
 0x1da   :  { %897 = vmatprep.subr.mxu1 %v4355_v52  ;;  %7137 = vst [vmem:[#allocation72_spill] sm:$0xff] %v4370_v50  ;;  %v4373_v52 = vld [vmem:[#allocation6 + $0x558] sm:$0xff] }
 0x1db   :  { %898 = vmatpush2.msra.mxu1 %v4358_v36  ;;  %7138 = vst [vmem:[#allocation75_spill] sm:$0xff] %v4373_v52  ;;  %v4376_v36 = vld [vmem:[#allocation6 + $0x550] sm:$0xff] }
 0x1dc   :  { %899 = vmatprep.subr.mxu1 %v4361_v34  ;;  %7139 = vst [vmem:[#allocation77_spill] sm:$0xff] %v4376_v36  ;;  %v4379_v34 = vld [vmem:[#allocation6 + $0x528] sm:$0xff] }
 0x1dd   :  { %900 = vmatpush2.msra.mxu1 %v4364_v46  ;;  %7140 = vst [vmem:[#allocation79_spill] sm:$0xff] %v4379_v34  ;;  %v4382_v46 = vld [vmem:[#allocation6 + $0x520] sm:$0xff] }
 0x1de   :  { %901 = vmatprep.subr.mxu1 %v4367_v48  ;;  %7141 = vst [vmem:[#allocation81_spill] sm:$0xff] %v4382_v46  ;;  %v4385_v48 = vld [vmem:[#allocation6 + $0x4f8] sm:$0xff] }
 0x1df   :  { %902 = vmatpush2.msra.mxu1 %v4370_v50  ;;  %7142 = vst [vmem:[#allocation83_spill] sm:$0xff] %v4385_v48  ;;  %v4388_v50 = vld [vmem:[#allocation6 + $0x4f0] sm:$0xff] }
 0x1e0   :  { %903 = vmatprep.subr.mxu1 %v4373_v52  ;;  %7143 = vst [vmem:[#allocation85_spill] sm:$0xff] %v4388_v50  ;;  %v4391_v52 = vld [vmem:[#allocation6 + $0x4c8] sm:$0xff] }
 0x1e1   :  { %904 = vmatpush2.msra.mxu1 %v4376_v36  ;;  %7144 = vst [vmem:[#allocation87_spill] sm:$0xff] %v4391_v52  ;;  %v4394_v36 = vld [vmem:[#allocation6 + $0x4c0] sm:$0xff] }
 0x1e2   :  { %905 = vmatprep.subr.mxu1 %v4379_v34  ;;  %7145 = vst [vmem:[#allocation89_spill] sm:$0xff] %v4394_v36  ;;  %v4397_v34 = vld [vmem:[#allocation6 + $0x498] sm:$0xff] }
 0x1e3   :  { %906 = vmatpush2.msra.mxu1 %v4382_v46  ;;  %7146 = vst [vmem:[#allocation91_spill] sm:$0xff] %v4397_v34  ;;  %v4400_v46 = vld [vmem:[#allocation6 + $0x490] sm:$0xff] }
 0x1e4   :  { %907 = vmatprep.subr.mxu1 %v4385_v48  ;;  %7147 = vst [vmem:[#allocation93_spill] sm:$0xff] %v4400_v46  ;;  %v4403_v48 = vld [vmem:[#allocation6 + $0x468] sm:$0xff] }
 0x1e5   :  { %908 = vmatpush2.msra.mxu1 %v4388_v50  ;;  %7148 = vst [vmem:[#allocation74_spill] sm:$0xff] %v4403_v48  ;;  %v4406_v50 = vld [vmem:[#allocation6 + $0x460] sm:$0xff] }
 0x1e6   :  { %909 = vmatprep.subr.mxu1 %v4391_v52  ;;  %7149 = vst [vmem:[#allocation76_spill] sm:$0xff] %v4406_v50  ;;  %v4409_v52 = vld [vmem:[#allocation6 + $0x438] sm:$0xff] }
 0x1e7   :  { %910 = vmatpush2.msra.mxu1 %v4394_v36  ;;  %7150 = vst [vmem:[#allocation78_spill] sm:$0xff] %v4409_v52  ;;  %v4412_v36 = vld [vmem:[#allocation6 + $0x430] sm:$0xff] }
 0x1e8   :  { %911 = vmatprep.subr.mxu1 %v4397_v34  ;;  %7151 = vst [vmem:[#allocation80_spill] sm:$0xff] %v4412_v36  ;;  %v4415_v34 = vld [vmem:[#allocation6 + $0x408] sm:$0xff] }
 0x1e9   :  { %912 = vmatpush2.msra.mxu1 %v4400_v46  ;;  %7152 = vst [vmem:[#allocation82_spill] sm:$0xff] %v4415_v34  ;;  %v4418_v46 = vld [vmem:[#allocation6 + $0x400] sm:$0xff] }
 0x1ea   :  { %913 = vmatprep.subr.mxu1 %v4403_v48  ;;  %7153 = vst [vmem:[#allocation84_spill] sm:$0xff] %v4418_v46  ;;  %v4421_v48 = vld [vmem:[#allocation6 + $0x3d8] sm:$0xff] }
 0x1eb   :  { %914 = vmatpush2.msra.mxu1 %v4406_v50  ;;  %7154 = vst [vmem:[#allocation86_spill] sm:$0xff] %v4421_v48  ;;  %v4424_v50 = vld [vmem:[#allocation6 + $0x3d0] sm:$0xff] }
 0x1ec   :  { %915 = vmatprep.subr.mxu1 %v4409_v52  ;;  %7155 = vst [vmem:[#allocation88_spill] sm:$0xff] %v4424_v50  ;;  %v4427_v52 = vld [vmem:[#allocation6 + $0x3a8] sm:$0xff] }
 0x1ed   :  { %916 = vmatpush2.msra.mxu1 %v4412_v36  ;;  %7156 = vst [vmem:[#allocation90_spill] sm:$0xff] %v4427_v52  ;;  %v4430_v36 = vld [vmem:[#allocation6 + $0x3a0] sm:$0xff] }
 0x1ee   :  { %917 = vmatprep.subr.mxu1 %v4415_v34  ;;  %7157 = vst [vmem:[#allocation92_spill] sm:$0xff] %v4430_v36  ;;  %v4433_v34 = vld [vmem:[#allocation6 + $0x378] sm:$0xff] }
 0x1ef   :  { %918 = vmatpush2.msra.mxu1 %v4418_v46  ;;  %7158 = vst [vmem:[#allocation94_spill] sm:$0xff] %v4433_v34  ;;  %v7159_v46 = vld [vmem:[#allocation95_spill] sm:$0xff] }
 0x1f0   :  { %919 = vmatprep.subr.mxu1 %v4421_v48  ;;  %v7161_v48 = vld [vmem:[#allocation99_spill] sm:$0xff] }
 0x1f1   :  { %920 = vmatpush2.msra.mxu1 %v4424_v50  ;;  %v7163_v50 = vld [vmem:[#allocation103_spill] sm:$0xff] }
 0x1f2   :  { %921 = vmatprep.subr.mxu1 %v4427_v52 }
 0x1f3   :  { %922 = vmatpush2.msra.mxu1 %v4430_v36 }
 0x1f4   :  { %923 = vmatprep.subr.mxu1 %v4433_v34 }
 0x1f5   :  { %924 = vmatpush2.msra.mxu1 %v7159_v46 }
 0x1f6   :  { %925 = vmatprep.subr.mxu1 %v7160_v44  ;;  %v523_v44 = vld [vmem:[#allocation3 + $0x40] sm:$0xff] }
 0x1f7   :  { %926 = vmatpush2.msra.mxu1 %v7161_v48 }
 0x1f8   :  { %927 = vmatprep.subr.mxu1 %v7162_v42 }
 0x1f9   :  { %928 = vmatpush2.msra.mxu1 %v7163_v50 }
 0x1fa   :  { %1061 = vmatprep.subr.mxu1 %v7164_v40 }
 0x23a   :  { %v593_v52 = vpop.f32.mrf.mxu1  ;;  %v664_v46 = vpop.f32.mrf.mxu0 }
 0x23b   :  { %v740_v32 = vadd.f32 %v593_v52, %v521_v38  ;;  %v754_v22 = vadd.f32 %v664_v46, %v523_v44  ;;  %v7165_v52 = vld [vmem:[#allocation12_spill] sm:$0xff]  ;;  %v525_v46 = vld [vmem:[#allocation3 + $0x50] sm:$0xff] }
 0x23c   :  { %v595_v36 = vpop.f32.mrf.mxu1  ;;  %v666_v48 = vpop.f32.mrf.mxu0 }
 0x23d   :  { %v741_v30 = vadd.f32 %v595_v36, %v522_v43  ;;  %v2413_v27 = vmul.f32 -1.442695, %v740_v32  ;;  %v755_v42 = vadd.f32 %v666_v48, %v524_v25  ;;  %v2415_v20 = vmul.f32 -1.442695, %v754_v22 }
 0x23f   :  { %v2414_v34 = vmul.f32 -1.442695, %v741_v30  ;;  %2469 = vpow2.f32 %v2413_v27  ;;  %v2416_v50 = vmul.f32 -1.442695, %v755_v42 }
 0x241   :  { %2471 = vpow2.f32 %v2414_v34 }
 0x242   :  { %2473 = vpow2.f32 %v2415_v20 }
 0x243   :  { %2475 = vpow2.f32 %v2416_v50 }
 0x24c   :  { %v2470_v18 = vpop.eup %2469 }
 0x24d   :  { %v748_v17 = vadd.f32 1.0, %v2470_v18  ;;  %v526_v18 = vld [vmem:[#allocation3 + $0x58] sm:$0xff] }
 0x24e   :  { %v2472_v40 = vpop.eup %2471 }
 0x24f   :  { %v749_v16 = vadd.f32 1.0, %v2472_v40  ;;  %2477 = vrcp.f32 %v748_v17  ;;  %v2474_v32 = vpop.eup %2473 }
 0x250   :  { %v2476_v30 = vpop.eup %2475  ;;  %v762_v27 = vadd.f32 1.0, %v2474_v32 }
 0x251   :  { %2479 = vrcp.f32 %v749_v16  ;;  %v763_v38 = vadd.f32 1.0, %v2476_v30 }
 0x252   :  { %2481 = vrcp.f32 %v762_v27 }
 0x253   :  { %2483 = vrcp.f32 %v763_v38 }
 0x25c   :  { %v2478_v34 = vpop.eup %2477 }
 0x25e   :  { %v2480_v44 = vpop.eup %2479 }
 0x25f   :  { %v2482_v42 = vpop.eup %2481 }
 0x260   :  { %v2484_v50 = vpop.eup %2483  ;;  %v776_v40 = vsub.f32 1.0, %v2482_v42 }
 0x261   :  { %v777_v30 = vsub.f32 1.0, %v2484_v50 }
 0x27a   :  { %v735_v43 = vpop.f32.mrf.mxu1 }
 0x27b   :  { %v768_v36 = vadd.f32 %v735_v43, %v7165_v52  ;;  %v780_v52 = vmul.f32 %v2482_v42, %v4008_v56  ;;  %v4456_v56 = vld [vmem:[#allocation6 + $0x2f0] sm:$0xff]  ;;  %v4644_v42 = vld [vmem:[#allocation6 + $0x478] sm:$0xff] }
 0x27c   :  { %v737_v25 = vpop.f32.mrf.mxu1  ;;  %7177 = vst [vmem:[#allocation106_spill] sm:$0xff] %v4644_v42 }
 0x27d   :  { %v770_v22 = vmul.f32 %v2478_v34, %v768_v36  ;;  %v769_v20 = vadd.f32 %v737_v25, %v4004_v41  ;;  %v781_v34 = vmul.f32 %v2484_v50, %v4010_v55  ;;  %v4460_v55 = vld [vmem:[#allocation6 + $0x2c8] sm:$0xff]  ;;  %v7178_v50 = vld [vmem:[#allocation15_spill] sm:$0xff] }
 0x27f   :  { %v772_v48 = vadd.f32 %v770_v22, %v525_v46  ;;  %v771_v17 = vmul.f32 %v2480_v44, %v769_v20  ;;  %v4468_v46 = vld [vmem:[#allocation6 + $0x298] sm:$0xff]  ;;  %v4472_v22 = vld [vmem:[#allocation6 + $0x290] sm:$0xff]  ;;  %v4476_v20 = vld [vmem:[#allocation6 + $0x268] sm:$0xff] }
 0x280   :  { %v4508_v44 = vld [vmem:[#allocation6 + $0x1a8] sm:$0xff] }
 0x281   :  { %2485 = vtanh.f32 %v772_v48  ;;  %v773_v16 = vadd.f32 %v771_v17, %v526_v18  ;;  %v4524_v18 = vld [vmem:[#allocation6 + $0x148] sm:$0xff]  ;;  %v4632_v48 = vld [vmem:[#allocation6 + $0x4d0] sm:$0xff] }
 0x282   :  { %7171 = vst [vmem:[#allocation102_spill] sm:$0xff] %v4632_v48  ;;  %v4636_v17 = vld [vmem:[#allocation6 + $0x4a8] sm:$0xff] }
 0x283   :  { %2487 = vtanh.f32 %v773_v16  ;;  %7173 = vst [vmem:[#allocation104_spill] sm:$0xff] %v4636_v17  ;;  %v4640_v16 = vld [vmem:[#allocation6 + $0x4a0] sm:$0xff] }
 0x284   :  { %7175 = vst [vmem:[#allocation105_spill] sm:$0xff] %v4640_v16 }
 0x28e   :  { %v2486_v32 = vpop.eup %2485 }
 0x28f   :  { %v778_v43 = vmul.f32 %v2486_v32, %v776_v40  ;;  %v4648_v40 = vld [vmem:[#allocation6 + $0x470] sm:$0xff]  ;;  %v7180_v32 = vld [vmem:[#allocation49_spill] sm:$0xff] }
 0x290   :  { %v2488_v27 = vpop.eup %2487  ;;  %7179 = vst [vmem:[#allocation61_spill] sm:$0xff] %v4648_v40 }
 0x291   :  { %v779_v36 = vmul.f32 %v2488_v27, %v777_v30  ;;  %v4446_v25 = vadd.f32 %v780_v52, %v778_v43  ;;  %v4464_v52 = vld [vmem:[#allocation6 + $0x2c0] sm:$0xff]  ;;  %v4652_v30 = vld [vmem:[#allocation6 + $0x448] sm:$0xff] }
 0x292   :  { %7181 = vst [vmem:[#allocation107_spill] sm:$0xff] %v4652_v30  ;;  %v7182_v43 = vld [vmem:[#allocation16_spill] sm:$0xff] }
 0x293   :  { %v4448_v38 = vadd.f32 %v781_v34, %v779_v36  ;;  %785 = vst [vmem:[#allocation8 + $0x10] sm:$0xff] %v4446_v25  ;;  %v4656_v27 = vld [vmem:[#allocation6 + $0x440] sm:$0xff]  ;;  %v7184_v36 = vld [vmem:[#allocation51_spill] sm:$0xff] }
 0x294   :  { %7183 = vst [vmem:[#allocation63_spill] sm:$0xff] %v4656_v27  ;;  %v4660_v34 = vld [vmem:[#allocation6 + $0x418] sm:$0xff] }
 0x295   :  { %786 = vst [vmem:[#allocation8 + $0x18] sm:$0xff] %v4448_v38  ;;  %858 = vmatprep.mubr.f32.mxu0 %v4448_v38  ;;  %929 = vmatprep.mubr.f32.mxu1 %v4448_v38  ;;  %7185 = vst [vmem:[#allocation108_spill] sm:$0xff] %v4660_v34 }
 0x296   :  { %859 = vmatmul.mubr.f32.vlgmr.msra.gmra.mxu0 %v4446_v25  ;;  %930 = vmatmul.mubr.f32.vlgmr.msra.gmra.mxu1 %v4446_v25 }
 0x297   :  { %937 = vmatpush1.msra.mxu0 %v4456_v56  ;;  %1000 = vmatprep.mubr.f32.mxu0 %v4448_v38 }
 0x298   :  { %938 = vmatprep.subr.mxu0 %v4460_v55  ;;  %1062 = vmatpush1.msra.mxu1 %v4021_v54  ;;  %v4480_v54 = vld [vmem:[#allocation6 + $0x260] sm:$0xff] }
 0x299   :  { %939 = vmatpush1.msra.mxu0 %v4464_v52  ;;  %1063 = vmatprep.subr.mxu1 %v4025_v23  ;;  %v4484_v23 = vld [vmem:[#allocation6 + $0x238] sm:$0xff] }
 0x29a   :  { %940 = vmatprep.subr.mxu0 %v4468_v46  ;;  %1064 = vmatpush1.msra.mxu1 %v4029_v59  ;;  %v4488_v59 = vld [vmem:[#allocation6 + $0x230] sm:$0xff] }
 0x29b   :  { %941 = vmatpush1.msra.mxu0 %v4472_v22  ;;  %1065 = vmatprep.subr.mxu1 %v4033_v63  ;;  %v4492_v63 = vld [vmem:[#allocation6 + $0x208] sm:$0xff] }
 0x29c   :  { %942 = vmatprep.subr.mxu0 %v4476_v20  ;;  %1066 = vmatpush1.msra.mxu1 %v4037_v53  ;;  %v4496_v53 = vld [vmem:[#allocation6 + $0x200] sm:$0xff] }
 0x29d   :  { %943 = vmatpush1.msra.mxu0 %v4480_v54  ;;  %1067 = vmatprep.subr.mxu1 %v4041_v51  ;;  %v4500_v51 = vld [vmem:[#allocation6 + $0x1d8] sm:$0xff] }
 0x29e   :  { %944 = vmatprep.subr.mxu0 %v4484_v23  ;;  %1068 = vmatpush1.msra.mxu1 %v4045_v49  ;;  %v4504_v49 = vld [vmem:[#allocation6 + $0x1d0] sm:$0xff] }
 0x29f   :  { %945 = vmatpush1.msra.mxu0 %v4488_v59  ;;  %1069 = vmatprep.subr.mxu1 %v4049_v39  ;;  %v7166_v39 = vld [vmem:[#allocation43_spill] sm:$0xff] }
 0x2a0   :  { %946 = vmatprep.subr.mxu0 %v4492_v63  ;;  %1070 = vmatpush1.msra.mxu1 %v4053_v58  ;;  %v4512_v58 = vld [vmem:[#allocation6 + $0x1a0] sm:$0xff] }
 0x2a1   :  { %947 = vmatpush1.msra.mxu0 %v4496_v53  ;;  %1071 = vmatprep.subr.mxu1 %v4057_v21  ;;  %v4516_v21 = vld [vmem:[#allocation6 + $0x178] sm:$0xff] }
 0x2a2   :  { %948 = vmatprep.subr.mxu0 %v4500_v51  ;;  %1072 = vmatpush1.msra.mxu1 %v4061_v62  ;;  %v4520_v62 = vld [vmem:[#allocation6 + $0x170] sm:$0xff] }
 0x2a3   :  { %949 = vmatpush1.msra.mxu0 %v4504_v49  ;;  %1073 = vmatprep.subr.mxu1 %v7166_v39  ;;  %v7186_v39 = vld [vmem:[#allocation17_spill] sm:$0xff] }
 0x2a4   :  { %950 = vmatprep.subr.mxu0 %v4508_v44  ;;  %1074 = vmatpush1.msra.mxu1 %v4069_v0  ;;  %v4528_v0 = vld [vmem:[#allocation6 + $0x140] sm:$0xff] }
 0x2a5   :  { %951 = vmatpush1.msra.mxu0 %v4512_v58  ;;  %1075 = vmatprep.subr.mxu1 %v4073_v60  ;;  %v4532_v60 = vld [vmem:[#allocation6 + $0x118] sm:$0xff] }
 0x2a6   :  { %952 = vmatprep.subr.mxu0 %v4516_v21  ;;  %1076 = vmatpush1.msra.mxu1 %v4077_v37  ;;  %v4536_v37 = vld [vmem:[#allocation6 + $0x110] sm:$0xff] }
 0x2a7   :  { %953 = vmatpush1.msra.mxu0 %v4520_v62  ;;  %1077 = vmatprep.subr.mxu1 %v4081_v57  ;;  %v4540_v57 = vld [vmem:[#allocation6 + $0xe8] sm:$0xff] }
 0x2a8   :  { %954 = vmatprep.subr.mxu0 %v4524_v18  ;;  %1078 = vmatpush1.msra.mxu1 %v4085_v19  ;;  %v4544_v19 = vld [vmem:[#allocation6 + $0xe0] sm:$0xff] }
 0x2a9   :  { %955 = vmatpush1.msra.mxu0 %v4528_v0  ;;  %1079 = vmatprep.subr.mxu1 %v4089_v33  ;;  %v4548_v33 = vld [vmem:[#allocation6 + $0xb8] sm:$0xff] }
 0x2aa   :  { %956 = vmatprep.subr.mxu0 %v4532_v60  ;;  %1080 = vmatpush1.msra.mxu1 %v4093_v24  ;;  %v4552_v24 = vld [vmem:[#allocation6 + $0xb0] sm:$0xff] }
 0x2ab   :  { %957 = vmatpush1.msra.mxu0 %v4536_v37  ;;  %1081 = vmatprep.subr.mxu1 %v4097_v61  ;;  %v4556_v61 = vld [vmem:[#allocation6 + $0x88] sm:$0xff] }
 0x2ac   :  { %958 = vmatprep.subr.mxu0 %v4540_v57  ;;  %1082 = vmatpush1.msra.mxu1 %v4101_v26  ;;  %v4560_v26 = vld [vmem:[#allocation6 + $0x80] sm:$0xff] }
 0x2ad   :  { %959 = vmatpush1.msra.mxu0 %v4544_v19  ;;  %1083 = vmatprep.subr.mxu1 %v4105_v35  ;;  %v4564_v35 = vld [vmem:[#allocation6 + $0x58] sm:$0xff] }
 0x2ae   :  { %960 = vmatprep.subr.mxu0 %v4548_v33  ;;  %1084 = vmatpush1.msra.mxu1 %v4109_v45  ;;  %v4568_v45 = vld [vmem:[#allocation6 + $0x50] sm:$0xff] }
 0x2af   :  { %961 = vmatpush1.msra.mxu0 %v4552_v24  ;;  %1085 = vmatprep.subr.mxu1 %v4113_v31  ;;  %v4572_v31 = vld [vmem:[#allocation6 + $0x28] sm:$0xff] }
 0x2b0   :  { %962 = vmatprep.subr.mxu0 %v4556_v61  ;;  %1086 = vmatpush1.msra.mxu1 %v4117_v29  ;;  %v4576_v29 = vld [vmem:[#allocation6 + $0x20] sm:$0xff] }
 0x2b1   :  { %963 = vmatpush1.msra.mxu0 %v4560_v26  ;;  %1087 = vmatprep.subr.mxu1 %v4121_v28  ;;  %v4580_v28 = vld [vmem:[#allocation6 + $0x5f8] sm:$0xff] }
 0x2b2   :  { %964 = vmatprep.subr.mxu0 %v4564_v35  ;;  %1088 = vmatpush1.msra.mxu1 %v4125_v47  ;;  %v4584_v47 = vld [vmem:[#allocation6 + $0x5f0] sm:$0xff] }
 0x2b3   :  { %965 = vmatpush1.msra.mxu0 %v4568_v45  ;;  %1089 = vmatprep.subr.mxu1 %v4129_v1  ;;  %v4588_v1 = vld [vmem:[#allocation6 + $0x5c8] sm:$0xff] }
 0x2b4   :  { %966 = vmatprep.subr.mxu0 %v4572_v31  ;;  %1090 = vmatpush1.msra.mxu1 %v4133_v2  ;;  %v4592_v2 = vld [vmem:[#allocation6 + $0x5c0] sm:$0xff] }
 0x2b5   :  { %967 = vmatpush1.msra.mxu0 %v4576_v29  ;;  %1091 = vmatprep.subr.mxu1 %v4137_v3  ;;  %v4596_v3 = vld [vmem:[#allocation6 + $0x598] sm:$0xff] }
 0x2b6   :  { %968 = vmatprep.subr.mxu0 %v4580_v28  ;;  %1092 = vmatpush1.msra.mxu1 %v4141_v4  ;;  %v4600_v4 = vld [vmem:[#allocation6 + $0x590] sm:$0xff] }
 0x2b7   :  { %969 = vmatpush2.msra.mxu0 %v4584_v47  ;;  %1093 = vmatprep.subr.mxu1 %v4145_v5  ;;  %v4604_v5 = vld [vmem:[#allocation6 + $0x568] sm:$0xff] }
 0x2b8   :  { %970 = vmatprep.subr.mxu0 %v4588_v1  ;;  %1094 = vmatpush2.msra.mxu1 %v4149_v6  ;;  %v4608_v6 = vld [vmem:[#allocation6 + $0x560] sm:$0xff] }
 0x2b9   :  { %971 = vmatpush2.msra.mxu0 %v4592_v2  ;;  %1095 = vmatprep.subr.mxu1 %v4153_v7  ;;  %v4612_v7 = vld [vmem:[#allocation6 + $0x538] sm:$0xff] }
 0x2ba   :  { %972 = vmatprep.subr.mxu0 %v4596_v3  ;;  %1096 = vmatpush2.msra.mxu1 %v4157_v8  ;;  %v4616_v8 = vld [vmem:[#allocation6 + $0x530] sm:$0xff] }
 0x2bb   :  { %973 = vmatpush2.msra.mxu0 %v4600_v4  ;;  %1097 = vmatprep.subr.mxu1 %v4161_v9  ;;  %v4620_v9 = vld [vmem:[#allocation6 + $0x508] sm:$0xff] }
 0x2bc   :  { %974 = vmatprep.subr.mxu0 %v4604_v5  ;;  %1098 = vmatpush2.msra.mxu1 %v4165_v10  ;;  %7167 = vst [vmem:[#allocation96_spill] sm:$0xff] %v4620_v9  ;;  %v4624_v10 = vld [vmem:[#allocation6 + $0x500] sm:$0xff] }
 0x2bd   :  { %975 = vmatpush2.msra.mxu0 %v4608_v6  ;;  %1099 = vmatprep.subr.mxu1 %v4169_v11  ;;  %7168 = vst [vmem:[#allocation98_spill] sm:$0xff] %v4624_v10  ;;  %v4628_v11 = vld [vmem:[#allocation6 + $0x4d8] sm:$0xff] }
 0x2be   :  { %976 = vmatprep.subr.mxu0 %v4612_v7  ;;  %1100 = vmatpush2.msra.mxu1 %v4173_v12  ;;  %7169 = vst [vmem:[#allocation100_spill] sm:$0xff] %v4628_v11  ;;  %v7170_v12 = vld [vmem:[#allocation13_spill] sm:$0xff] }
 0x2bf   :  { %977 = vmatpush2.msra.mxu0 %v4616_v8  ;;  %1101 = vmatprep.subr.mxu1 %v4177_v13  ;;  %v7172_v13 = vld [vmem:[#allocation45_spill] sm:$0xff] }
 0x2c0   :  { %978 = vmatprep.subr.mxu0 %v4620_v9  ;;  %1102 = vmatpush2.msra.mxu1 %v4181_v14  ;;  %v7174_v14 = vld [vmem:[#allocation14_spill] sm:$0xff] }
 0x2c1   :  { %979 = vmatpush2.msra.mxu0 %v4624_v10  ;;  %1103 = vmatprep.subr.mxu1 %v4185_v15  ;;  %v7176_v15 = vld [vmem:[#allocation47_spill] sm:$0xff] }
 0x2c2   :  { %980 = vmatprep.subr.mxu0 %v4628_v11  ;;  %1104 = vmatpush2.msra.mxu1 %v7170_v12  ;;  %v4664_v12 = vld [vmem:[#allocation6 + $0x410] sm:$0xff] }
 0x2c3   :  { %981 = vmatpush2.msra.mxu0 %v4632_v48  ;;  %1105 = vmatprep.subr.mxu1 %v7172_v13  ;;  %7187 = vst [vmem:[#allocation65_spill] sm:$0xff] %v4664_v12  ;;  %v7188_v13 = vld [vmem:[#allocation53_spill] sm:$0xff] }
 0x2c4   :  { %982 = vmatprep.subr.mxu0 %v4636_v17  ;;  %1106 = vmatpush2.msra.mxu1 %v7174_v14  ;;  %v4668_v14 = vld [vmem:[#allocation6 + $0x3e8] sm:$0xff] }
 0x2c5   :  { %983 = vmatpush2.msra.mxu0 %v4640_v16  ;;  %1107 = vmatprep.subr.mxu1 %v7176_v15  ;;  %7189 = vst [vmem:[#allocation109_spill] sm:$0xff] %v4668_v14  ;;  %v7190_v15 = vld [vmem:[#allocation18_spill] sm:$0xff] }
 0x2c6   :  { %984 = vmatprep.subr.mxu0 %v4644_v42  ;;  %1108 = vmatpush2.msra.mxu1 %v7178_v50  ;;  %v4672_v50 = vld [vmem:[#allocation6 + $0x3e0] sm:$0xff] }
 0x2c7   :  { %985 = vmatpush2.msra.mxu0 %v4648_v40  ;;  %1109 = vmatprep.subr.mxu1 %v7180_v32  ;;  %7191 = vst [vmem:[#allocation67_spill] sm:$0xff] %v4672_v50  ;;  %v7192_v32 = vld [vmem:[#allocation55_spill] sm:$0xff] }
 0x2c8   :  { %986 = vmatprep.subr.mxu0 %v4652_v30  ;;  %1110 = vmatpush2.msra.mxu1 %v7182_v43  ;;  %v4676_v43 = vld [vmem:[#allocation6 + $0x3b8] sm:$0xff] }
 0x2c9   :  { %987 = vmatpush2.msra.mxu0 %v4656_v27  ;;  %1111 = vmatprep.subr.mxu1 %v7184_v36  ;;  %7193 = vst [vmem:[#allocation110_spill] sm:$0xff] %v4676_v43  ;;  %v7194_v36 = vld [vmem:[#allocation19_spill] sm:$0xff] }
 0x2ca   :  { %988 = vmatprep.subr.mxu0 %v4660_v34  ;;  %1112 = vmatpush2.msra.mxu1 %v7186_v39  ;;  %v4680_v39 = vld [vmem:[#allocation6 + $0x3b0] sm:$0xff]  ;;  %v7220_v34 = vld [vmem:[#allocation28_spill] sm:$0xff]  ;;  %v7223_v27 = vld [vmem:[#allocation31_spill] sm:$0xff] }
 0x2cb   :  { %989 = vmatpush2.msra.mxu0 %v4664_v12  ;;  %1113 = vmatprep.subr.mxu1 %v7188_v13  ;;  %7195 = vst [vmem:[#allocation69_spill] sm:$0xff] %v4680_v39  ;;  %v7196_v13 = vld [vmem:[#allocation57_spill] sm:$0xff]  ;;  %v791_v40 = vld [vmem:[#allocation3 + $0x78] sm:$0xff] }
 0x2cc   :  { %990 = vmatprep.subr.mxu0 %v4668_v14  ;;  %1114 = vmatpush2.msra.mxu1 %v7190_v15  ;;  %v4684_v14 = vld [vmem:[#allocation6 + $0x388] sm:$0xff]  ;;  %v4687_v15 = vld [vmem:[#allocation6 + $0x390] sm:$0xff] }
 0x2cd   :  { %991 = vmatpush2.msra.mxu0 %v4672_v50  ;;  %1115 = vmatprep.subr.mxu1 %v7192_v32  ;;  %7197 = vst [vmem:[#allocation71_spill] sm:$0xff] %v4684_v14  ;;  %7198 = vst [vmem:[#allocation73_spill] sm:$0xff] %v4687_v15  ;;  %v4690_v32 = vld [vmem:[#allocation6 + $0x380] sm:$0xff]  ;;  %v7215_v50 = vld [vmem:[#allocation23_spill] sm:$0xff] }
 0x2ce   :  { %992 = vmatprep.subr.mxu0 %v4676_v43  ;;  %1116 = vmatpush2.msra.mxu1 %v7194_v36  ;;  %7199 = vst [vmem:[#allocation95_spill] sm:$0xff] %v4690_v32  ;;  %v4693_v43 = vld [vmem:[#allocation6 + $0x368] sm:$0xff]  ;;  %v4696_v36 = vld [vmem:[#allocation6 + $0x358] sm:$0xff] }
 0x2cf   :  { %993 = vmatpush2.msra.mxu0 %v4680_v39  ;;  %1117 = vmatprep.subr.mxu1 %v7196_v13  ;;  %7200 = vst [vmem:[#allocation97_spill] sm:$0xff] %v4693_v43  ;;  %7201 = vst [vmem:[#allocation99_spill] sm:$0xff] %v4696_v36  ;;  %v4699_v13 = vld [vmem:[#allocation6 + $0x360] sm:$0xff]  ;;  %v7217_v12 = vld [vmem:[#allocation25_spill] sm:$0xff] }
 0x2d0   :  { %994 = vmatprep.subr.mxu0 %v4684_v14  ;;  %1118 = vmatpush2.msra.mxu1 %v4687_v15  ;;  %7202 = vst [vmem:[#allocation101_spill] sm:$0xff] %v4699_v13  ;;  %v4702_v14 = vld [vmem:[#allocation6 + $0x350] sm:$0xff]  ;;  %v4705_v15 = vld [vmem:[#allocation6 + $0x338] sm:$0xff]  ;;  %v4723_v39 = vld [vmem:[#allocation6 + $0x300] sm:$0xff] }
 0x2d1   :  { %995 = vmatpush2.msra.mxu0 %v4690_v32  ;;  %1119 = vmatprep.subr.mxu1 %v4693_v43  ;;  %7203 = vst [vmem:[#allocation103_spill] sm:$0xff] %v4702_v14  ;;  %7204 = vst [vmem:[#allocation41_spill] sm:$0xff] %v4705_v15  ;;  %v4708_v32 = vld [vmem:[#allocation6 + $0x328] sm:$0xff]  ;;  %v4711_v43 = vld [vmem:[#allocation6 + $0x330] sm:$0xff] }
 0x2d2   :  { %996 = vmatprep.subr.mxu0 %v4696_v36  ;;  %1120 = vmatpush2.msra.mxu1 %v4699_v13  ;;  %7205 = vst [vmem:[#allocation43_spill] sm:$0xff] %v4708_v32  ;;  %7206 = vst [vmem:[#allocation13_spill] sm:$0xff] %v4711_v43  ;;  %v4714_v36 = vld [vmem:[#allocation6 + $0x320] sm:$0xff]  ;;  %v4717_v13 = vld [vmem:[#allocation6 + $0x308] sm:$0xff] }
 0x2d3   :  { %997 = vmatpush2.msra.mxu0 %v4702_v14  ;;  %1121 = vmatprep.subr.mxu1 %v4705_v15  ;;  %7207 = vst [vmem:[#allocation45_spill] sm:$0xff] %v4714_v36  ;;  %7208 = vst [vmem:[#allocation14_spill] sm:$0xff] %v4717_v13  ;;  %v7209_v14 = vld [vmem:[#allocation20_spill] sm:$0xff]  ;;  %v7210_v15 = vld [vmem:[#allocation59_spill] sm:$0xff] }
 0x2d4   :  { %998 = vmatprep.subr.mxu0 %v4708_v32  ;;  %1122 = vmatpush2.msra.mxu1 %v4711_v43  ;;  %7211 = vst [vmem:[#allocation47_spill] sm:$0xff] %v4723_v39  ;;  %v7212_v32 = vld [vmem:[#allocation21_spill] sm:$0xff]  ;;  %v4727_v43 = vld [vmem:[#allocation6 + $0x2f8] sm:$0xff] }
 0x2d5   :  { %999 = vmatpush2.msra.mxu0 %v4714_v36  ;;  %1123 = vmatprep.subr.mxu1 %v4717_v13  ;;  %7213 = vst [vmem:[#allocation15_spill] sm:$0xff] %v4727_v43  ;;  %v7214_v36 = vld [vmem:[#allocation22_spill] sm:$0xff]  ;;  %v7216_v13 = vld [vmem:[#allocation24_spill] sm:$0xff] }
 0x2d6   :  { %1001 = vmatmul.mubr.f32.vlgmr.msra.gmra.mxu0 %v4446_v25  ;;  %1132 = vmatprep.subr.mxu0 %v7209_v14  ;;  %v7218_v14 = vld [vmem:[#allocation26_spill] sm:$0xff] }
 0x2d7   :  { %1133 = vmatpush1.msra.mxu0 %v7210_v15  ;;  %1124 = vmatpush2.msra.mxu1 %v4723_v39  ;;  %v7219_v15 = vld [vmem:[#allocation27_spill] sm:$0xff]  ;;  %v7221_v39 = vld [vmem:[#allocation29_spill] sm:$0xff] }
 0x2d8   :  { %1134 = vmatprep.subr.mxu0 %v7212_v32  ;;  %1203 = vmatprep.subr.mxu1 %v4727_v43  ;;  %v7222_v32 = vld [vmem:[#allocation30_spill] sm:$0xff]  ;;  %v7224_v43 = vld [vmem:[#allocation32_spill] sm:$0xff] }
 0x2d9   :  { %1135 = vmatpush1.msra.mxu0 %v7214_v36  ;;  %v7225_v36 = vld [vmem:[#allocation33_spill] sm:$0xff] }
 0x2da   :  { %1136 = vmatprep.subr.mxu0 %v7215_v50  ;;  %v7226_v50 = vld [vmem:[#allocation34_spill] sm:$0xff] }
 0x2db   :  { %1137 = vmatpush1.msra.mxu0 %v7216_v13  ;;  %v7227_v13 = vld [vmem:[#allocation35_spill] sm:$0xff] }
 0x2dc   :  { %1138 = vmatprep.subr.mxu0 %v7217_v12  ;;  %v7228_v12 = vld [vmem:[#allocation36_spill] sm:$0xff] }
 0x2dd   :  { %1139 = vmatpush1.msra.mxu0 %v7218_v14  ;;  %v7229_v14 = vld [vmem:[#allocation37_spill] sm:$0xff] }
 0x2de   :  { %1140 = vmatprep.subr.mxu0 %v7219_v15  ;;  %v7230_v15 = vld [vmem:[#allocation38_spill] sm:$0xff] }
 0x2df   :  { %1141 = vmatpush1.msra.mxu0 %v7220_v34  ;;  %v7231_v34 = vld [vmem:[#allocation39_spill] sm:$0xff] }
 0x2e0   :  { %1142 = vmatprep.subr.mxu0 %v7221_v39  ;;  %v7232_v39 = vld [vmem:[#allocation40_spill] sm:$0xff] }
 0x2e1   :  { %1143 = vmatpush1.msra.mxu0 %v7222_v32  ;;  %v7233_v32 = vld [vmem:[#allocation42_spill] sm:$0xff] }
 0x2e2   :  { %1144 = vmatprep.subr.mxu0 %v7223_v27  ;;  %v7234_v27 = vld [vmem:[#allocation44_spill] sm:$0xff] }
 0x2e3   :  { %1145 = vmatpush1.msra.mxu0 %v7224_v43  ;;  %v7235_v43 = vld [vmem:[#allocation46_spill] sm:$0xff] }
 0x2e4   :  { %1146 = vmatprep.subr.mxu0 %v7225_v36  ;;  %v7236_v36 = vld [vmem:[#allocation48_spill] sm:$0xff] }
 0x2e5   :  { %1147 = vmatpush1.msra.mxu0 %v7226_v50  ;;  %v7237_v50 = vld [vmem:[#allocation50_spill] sm:$0xff] }
 0x2e6   :  { %1148 = vmatprep.subr.mxu0 %v7227_v13  ;;  %v7238_v13 = vld [vmem:[#allocation52_spill] sm:$0xff] }
 0x2e7   :  { %1149 = vmatpush1.msra.mxu0 %v7228_v12  ;;  %v7239_v12 = vld [vmem:[#allocation54_spill] sm:$0xff] }
 0x2e8   :  { %1150 = vmatprep.subr.mxu0 %v7229_v14  ;;  %v7240_v14 = vld [vmem:[#allocation56_spill] sm:$0xff] }
 0x2e9   :  { %1151 = vmatpush1.msra.mxu0 %v7230_v15  ;;  %v7241_v15 = vld [vmem:[#allocation58_spill] sm:$0xff] }
 0x2ea   :  { %1152 = vmatprep.subr.mxu0 %v7231_v34  ;;  %v7242_v34 = vld [vmem:[#allocation60_spill] sm:$0xff] }
 0x2eb   :  { %1153 = vmatpush1.msra.mxu0 %v7232_v39  ;;  %v7243_v39 = vld [vmem:[#allocation62_spill] sm:$0xff] }
 0x2ec   :  { %1154 = vmatprep.subr.mxu0 %v7233_v32  ;;  %v7244_v32 = vld [vmem:[#allocation64_spill] sm:$0xff] }
 0x2ed   :  { %1155 = vmatpush1.msra.mxu0 %v7234_v27  ;;  %v7245_v27 = vld [vmem:[#allocation66_spill] sm:$0xff] }
 0x2ee   :  { %1156 = vmatprep.subr.mxu0 %v7235_v43  ;;  %v7246_v43 = vld [vmem:[#allocation68_spill] sm:$0xff] }
 0x2ef   :  { %1157 = vmatpush1.msra.mxu0 %v7236_v36  ;;  %v7247_v36 = vld [vmem:[#allocation70_spill] sm:$0xff] }
 0x2f0   :  { %1158 = vmatprep.subr.mxu0 %v7237_v50  ;;  %v7248_v50 = vld [vmem:[#allocation72_spill] sm:$0xff] }
 0x2f1   :  { %1159 = vmatpush1.msra.mxu0 %v7238_v13  ;;  %v7249_v13 = vld [vmem:[#allocation75_spill] sm:$0xff] }
 0x2f2   :  { %1160 = vmatprep.subr.mxu0 %v7239_v12  ;;  %v7250_v12 = vld [vmem:[#allocation77_spill] sm:$0xff] }
 0x2f3   :  { %1161 = vmatpush1.msra.mxu0 %v7240_v14  ;;  %v7251_v14 = vld [vmem:[#allocation79_spill] sm:$0xff] }
 0x2f4   :  { %1162 = vmatprep.subr.mxu0 %v7241_v15  ;;  %v7252_v15 = vld [vmem:[#allocation81_spill] sm:$0xff] }
 0x2f5   :  { %1163 = vmatpush1.msra.mxu0 %v7242_v34  ;;  %v7253_v34 = vld [vmem:[#allocation83_spill] sm:$0xff] }
 0x2f6   :  { %1164 = vmatprep.subr.mxu0 %v7243_v39  ;;  %v7254_v39 = vld [vmem:[#allocation85_spill] sm:$0xff] }
 0x2f7   :  { %1165 = vmatpush2.msra.mxu0 %v7244_v32  ;;  %v7255_v32 = vld [vmem:[#allocation87_spill] sm:$0xff] }
 0x2f8   :  { %1166 = vmatprep.subr.mxu0 %v7245_v27  ;;  %v7256_v27 = vld [vmem:[#allocation89_spill] sm:$0xff] }
 0x2f9   :  { %1167 = vmatpush2.msra.mxu0 %v7246_v43  ;;  %v7257_v43 = vld [vmem:[#allocation91_spill] sm:$0xff] }
 0x2fa   :  { %1168 = vmatprep.subr.mxu0 %v7247_v36  ;;  %v7258_v36 = vld [vmem:[#allocation93_spill] sm:$0xff] }
 0x2fb   :  { %1169 = vmatpush2.msra.mxu0 %v7248_v50  ;;  %v7259_v50 = vld [vmem:[#allocation74_spill] sm:$0xff] }
 0x2fc   :  { %1170 = vmatprep.subr.mxu0 %v7249_v13  ;;  %v7260_v13 = vld [vmem:[#allocation76_spill] sm:$0xff] }
 0x2fd   :  { %1171 = vmatpush2.msra.mxu0 %v7250_v12  ;;  %v7261_v12 = vld [vmem:[#allocation78_spill] sm:$0xff] }
 0x2fe   :  { %1172 = vmatprep.subr.mxu0 %v7251_v14  ;;  %v7262_v14 = vld [vmem:[#allocation80_spill] sm:$0xff] }
 0x2ff   :  { %1173 = vmatpush2.msra.mxu0 %v7252_v15  ;;  %v7263_v15 = vld [vmem:[#allocation82_spill] sm:$0xff] }
 0x300   :  { %1174 = vmatprep.subr.mxu0 %v7253_v34  ;;  %v7264_v34 = vld [vmem:[#allocation84_spill] sm:$0xff] }
 0x301   :  { %1175 = vmatpush2.msra.mxu0 %v7254_v39  ;;  %v7265_v39 = vld [vmem:[#allocation86_spill] sm:$0xff] }
 0x302   :  { %1176 = vmatprep.subr.mxu0 %v7255_v32  ;;  %v7266_v32 = vld [vmem:[#allocation88_spill] sm:$0xff] }
 0x303   :  { %1177 = vmatpush2.msra.mxu0 %v7256_v27  ;;  %v7267_v27 = vld [vmem:[#allocation90_spill] sm:$0xff] }
 0x304   :  { %1178 = vmatprep.subr.mxu0 %v7257_v43  ;;  %v7268_v43 = vld [vmem:[#allocation92_spill] sm:$0xff] }
 0x305   :  { %1179 = vmatpush2.msra.mxu0 %v7258_v36  ;;  %v7269_v36 = vld [vmem:[#allocation94_spill] sm:$0xff] }
 0x306   :  { %1180 = vmatprep.subr.mxu0 %v7259_v50  ;;  %v4786_v50 = vld [vmem:[#allocation6 + $0x370] sm:$0xff] }
 0x307   :  { %1181 = vmatpush2.msra.mxu0 %v7260_v13  ;;  %7270 = vst [vmem:[#allocation49_spill] sm:$0xff] %v4786_v50  ;;  %v4789_v13 = vld [vmem:[#allocation6 + $0x348] sm:$0xff] }
 0x308   :  { %1182 = vmatprep.subr.mxu0 %v7261_v12  ;;  %7271 = vst [vmem:[#allocation16_spill] sm:$0xff] %v4789_v13  ;;  %v4792_v12 = vld [vmem:[#allocation6 + $0x340] sm:$0xff] }
 0x309   :  { %1183 = vmatpush2.msra.mxu0 %v7262_v14  ;;  %7272 = vst [vmem:[#allocation51_spill] sm:$0xff] %v4792_v12  ;;  %v4795_v14 = vld [vmem:[#allocation6 + $0x318] sm:$0xff] }
 0x30a   :  { %1184 = vmatprep.subr.mxu0 %v7263_v15  ;;  %7273 = vst [vmem:[#allocation17_spill] sm:$0xff] %v4795_v14  ;;  %v4798_v15 = vld [vmem:[#allocation6 + $0x310] sm:$0xff] }
 0x30b   :  { %1185 = vmatpush2.msra.mxu0 %v7264_v34  ;;  %7274 = vst [vmem:[#allocation53_spill] sm:$0xff] %v4798_v15  ;;  %v4801_v34 = vld [vmem:[#allocation6 + $0x2d8] sm:$0xff] }
 0x30c   :  { %1186 = vmatprep.subr.mxu0 %v7265_v39  ;;  %7275 = vst [vmem:[#allocation18_spill] sm:$0xff] %v4801_v34 }
 0x30d   :  { %1187 = vmatpush2.msra.mxu0 %v7266_v32  ;;  %v788_v32 = vld [vmem:[#allocation3 + $0x60] sm:$0xff] }
 0x30e   :  { %1188 = vmatprep.subr.mxu0 %v7267_v27  ;;  %v789_v27 = vld [vmem:[#allocation3 + $0x68] sm:$0xff] }
 0x30f   :  { %1189 = vmatpush2.msra.mxu0 %v7268_v43 }
 0x310   :  { %1190 = vmatprep.subr.mxu0 %v7269_v36 }
 0x311   :  { %1191 = vmatpush2.msra.mxu0 %v4786_v50 }
 0x312   :  { %1192 = vmatprep.subr.mxu0 %v4789_v13 }
 0x313   :  { %1193 = vmatpush2.msra.mxu0 %v4792_v12 }
 0x314   :  { %1194 = vmatprep.subr.mxu0 %v4795_v14  ;;  %v790_v14 = vld [vmem:[#allocation3 + $0x70] sm:$0xff] }
 0x315   :  { %1195 = vmatpush2.msra.mxu0 %v4798_v15 }
 0x316   :  { %1328 = vmatprep.subr.mxu0 %v4801_v34 }
 0x356   :  { %v860_v39 = vpop.f32.mrf.mxu0  ;;  %v931_v30 = vpop.f32.mrf.mxu1 }
 0x357   :  { %v1007_v36 = vadd.f32 %v860_v39, %v788_v32  ;;  %v1021_v16 = vadd.f32 %v931_v30, %v790_v14  ;;  %v792_v30 = vld [vmem:[#allocation3 + $0x80] sm:$0xff] }
 0x358   :  { %v862_v43 = vpop.f32.mrf.mxu0  ;;  %v933_v42 = vpop.f32.mrf.mxu1 }
 0x359   :  { %v1008_v13 = vadd.f32 %v862_v43, %v789_v27  ;;  %v2417_v50 = vmul.f32 -1.442695, %v1007_v36  ;;  %v1022_v15 = vadd.f32 %v933_v42, %v791_v40  ;;  %v2419_v17 = vmul.f32 -1.442695, %v1021_v16  ;;  %v7276_v27 = vld [vmem:[#allocation12_spill] sm:$0xff] }
 0x35b   :  { %v2418_v12 = vmul.f32 -1.442695, %v1008_v13  ;;  %2489 = vpow2.f32 %v2417_v50  ;;  %v2420_v48 = vmul.f32 -1.442695, %v1022_v15 }
 0x35d   :  { %2491 = vpow2.f32 %v2418_v12 }
 0x35e   :  { %2493 = vpow2.f32 %v2419_v17 }
 0x35f   :  { %2495 = vpow2.f32 %v2420_v48 }
 0x368   :  { %v2490_v11 = vpop.eup %2489 }
 0x369   :  { %v1015_v10 = vadd.f32 1.0, %v2490_v11  ;;  %v793_v11 = vld [vmem:[#allocation3 + $0x88] sm:$0xff] }
 0x36a   :  { %v2492_v34 = vpop.eup %2491 }
 0x36b   :  { %v1016_v9 = vadd.f32 1.0, %v2492_v34  ;;  %2497 = vrcp.f32 %v1015_v10  ;;  %v2494_v39 = vpop.eup %2493 }
 0x36c   :  { %v2496_v13 = vpop.eup %2495  ;;  %v1029_v50 = vadd.f32 1.0, %v2494_v39 }
 0x36d   :  { %2499 = vrcp.f32 %v1016_v9  ;;  %v1030_v12 = vadd.f32 1.0, %v2496_v13 }
 0x36e   :  { %2501 = vrcp.f32 %v1029_v50 }
 0x36f   :  { %2503 = vrcp.f32 %v1030_v12 }
 0x378   :  { %v2498_v36 = vpop.eup %2497 }
 0x37a   :  { %v2500_v40 = vpop.eup %2499 }
 0x37b   :  { %v2502_v14 = vpop.eup %2501 }
 0x37c   :  { %v2504_v15 = vpop.eup %2503  ;;  %v1043_v34 = vsub.f32 1.0, %v2502_v14 }
 0x37d   :  { %v1044_v13 = vsub.f32 1.0, %v2504_v15 }
 0x396   :  { %v1002_v32 = vpop.f32.mrf.mxu0 }
 0x397   :  { %v1035_v43 = vadd.f32 %v1002_v32, %v7276_v27  ;;  %v1047_v27 = vmul.f32 %v2502_v14, %v4446_v25  ;;  %v4821_v25 = vld [vmem:[#allocation6 + $0x2d0] sm:$0xff] }
 0x398   :  { %v1004_v42 = vpop.f32.mrf.mxu0  ;;  %v7288_v14 = vld [vmem:[#allocation106_spill] sm:$0xff] }
 0x399   :  { %v1037_v16 = vmul.f32 %v2498_v36, %v1035_v43  ;;  %v1036_v17 = vadd.f32 %v1004_v42, %v4004_v41  ;;  %v1048_v36 = vmul.f32 %v2504_v15, %v4448_v38  ;;  %v4825_v38 = vld [vmem:[#allocation6 + $0x2a8] sm:$0xff]  ;;  %v5005_v15 = vld [vmem:[#allocation6 + $0x480] sm:$0xff] }
 0x39a   :  { %7289 = vst [vmem:[#allocation21_spill] sm:$0xff] %v5005_v15 }
 0x39b   :  { %v1039_v48 = vadd.f32 %v1037_v16, %v792_v30  ;;  %v1038_v10 = vmul.f32 %v2500_v40, %v1036_v17  ;;  %v4981_v30 = vld [vmem:[#allocation6 + $0x510] sm:$0xff]  ;;  %v4985_v16 = vld [vmem:[#allocation6 + $0x4e8] sm:$0xff]  ;;  %v4989_v17 = vld [vmem:[#allocation6 + $0x4e0] sm:$0xff] }
 0x39c   :  { %7279 = vst [vmem:[#allocation55_spill] sm:$0xff] %v4985_v16  ;;  %7281 = vst [vmem:[#allocation19_spill] sm:$0xff] %v4989_v17  ;;  %v4993_v40 = vld [vmem:[#allocation6 + $0x4b8] sm:$0xff] }
 0x39d   :  { %2505 = vtanh.f32 %v1039_v48  ;;  %v1040_v9 = vadd.f32 %v1038_v10, %v793_v11  ;;  %7283 = vst [vmem:[#allocation57_spill] sm:$0xff] %v4993_v40  ;;  %v7284_v11 = vld [vmem:[#allocation104_spill] sm:$0xff]  ;;  %v4997_v48 = vld [vmem:[#allocation6 + $0x4b0] sm:$0xff]  ;;  %v7286_v10 = vld [vmem:[#allocation105_spill] sm:$0xff] }
 0x39e   :  { %7285 = vst [vmem:[#allocation20_spill] sm:$0xff] %v4997_v48 }
 0x39f   :  { %2507 = vtanh.f32 %v1040_v9  ;;  %v5001_v9 = vld [vmem:[#allocation6 + $0x488] sm:$0xff] }
 0x3a0   :  { %7287 = vst [vmem:[#allocation59_spill] sm:$0xff] %v5001_v9 }
 0x3aa   :  { %v2506_v39 = vpop.eup %2505 }
 0x3ab   :  { %v1045_v32 = vmul.f32 %v2506_v39, %v1043_v34  ;;  %v7290_v34 = vld [vmem:[#allocation61_spill] sm:$0xff]  ;;  %v5009_v39 = vld [vmem:[#allocation6 + $0x458] sm:$0xff] }
 0x3ac   :  { %v2508_v50 = vpop.eup %2507  ;;  %7291 = vst [vmem:[#allocation22_spill] sm:$0xff] %v5009_v39 }
 0x3ad   :  { %v1046_v43 = vmul.f32 %v2508_v50, %v1044_v13  ;;  %v4808_v42 = vadd.f32 %v1047_v27, %v1045_v32  ;;  %v4829_v27 = vld [vmem:[#allocation6 + $0x2a0] sm:$0xff]  ;;  %v7292_v13 = vld [vmem:[#allocation107_spill] sm:$0xff]  ;;  %v5013_v32 = vld [vmem:[#allocation6 + $0x450] sm:$0xff] }
 0x3ae   :  { %7293 = vst [vmem:[#allocation23_spill] sm:$0xff] %v5013_v32  ;;  %v7294_v50 = vld [vmem:[#allocation63_spill] sm:$0xff] }
 0x3af   :  { %v4810_v12 = vadd.f32 %v1048_v36, %v1046_v43  ;;  %1052 = vst [vmem:[#allocation8 + $0x20] sm:$0xff] %v4808_v42  ;;  %v5017_v43 = vld [vmem:[#allocation6 + $0x428] sm:$0xff]  ;;  %v7296_v36 = vld [vmem:[#allocation108_spill] sm:$0xff] }
 0x3b0   :  { %7295 = vst [vmem:[#allocation24_spill] sm:$0xff] %v5017_v43 }
 0x3b1   :  { %1053 = vst [vmem:[#allocation8 + $0x28] sm:$0xff] %v4810_v12  ;;  %1125 = vmatprep.mubr.f32.mxu1 %v4810_v12  ;;  %1196 = vmatprep.mubr.f32.mxu0 %v4810_v12 }
 0x3b2   :  { %1126 = vmatmul.mubr.f32.vlgmr.msra.gmra.mxu1 %v4808_v42  ;;  %1197 = vmatmul.mubr.f32.vlgmr.msra.gmra.mxu0 %v4808_v42 }
 0x3b3   :  { %1204 = vmatpush1.msra.mxu1 %v4456_v56  ;;  %1267 = vmatprep.mubr.f32.mxu1 %v4810_v12  ;;  %v4833_v56 = vld [vmem:[#allocation6 + $0x278] sm:$0xff] }
 0x3b4   :  { %1205 = vmatprep.subr.mxu1 %v4460_v55  ;;  %1329 = vmatpush1.msra.mxu0 %v4821_v25  ;;  %v4837_v55 = vld [vmem:[#allocation6 + $0x270] sm:$0xff] }
 0x3b5   :  { %1206 = vmatpush1.msra.mxu1 %v4464_v52  ;;  %1330 = vmatprep.subr.mxu0 %v4825_v38  ;;  %v4841_v52 = vld [vmem:[#allocation6 + $0x248] sm:$0xff] }
 0x3b6   :  { %1207 = vmatprep.subr.mxu1 %v4468_v46  ;;  %1331 = vmatpush1.msra.mxu0 %v4829_v27  ;;  %v4845_v46 = vld [vmem:[#allocation6 + $0x240] sm:$0xff] }
 0x3b7   :  { %1208 = vmatpush1.msra.mxu1 %v4472_v22  ;;  %1332 = vmatprep.subr.mxu0 %v4833_v56  ;;  %v4849_v22 = vld [vmem:[#allocation6 + $0x218] sm:$0xff] }
 0x3b8   :  { %1209 = vmatprep.subr.mxu1 %v4476_v20  ;;  %1333 = vmatpush1.msra.mxu0 %v4837_v55  ;;  %v4853_v20 = vld [vmem:[#allocation6 + $0x210] sm:$0xff] }
 0x3b9   :  { %1210 = vmatpush1.msra.mxu1 %v4480_v54  ;;  %1334 = vmatprep.subr.mxu0 %v4841_v52  ;;  %v4857_v54 = vld [vmem:[#allocation6 + $0x1e8] sm:$0xff] }
 0x3ba   :  { %1211 = vmatprep.subr.mxu1 %v4484_v23  ;;  %1335 = vmatpush1.msra.mxu0 %v4845_v46  ;;  %v4861_v23 = vld [vmem:[#allocation6 + $0x1e0] sm:$0xff] }
 0x3bb   :  { %1212 = vmatpush1.msra.mxu1 %v4488_v59  ;;  %1336 = vmatprep.subr.mxu0 %v4849_v22  ;;  %v4865_v59 = vld [vmem:[#allocation6 + $0x1b8] sm:$0xff] }
 0x3bc   :  { %1213 = vmatprep.subr.mxu1 %v4492_v63  ;;  %1337 = vmatpush1.msra.mxu0 %v4853_v20  ;;  %v4869_v63 = vld [vmem:[#allocation6 + $0x1b0] sm:$0xff] }
 0x3bd   :  { %1214 = vmatpush1.msra.mxu1 %v4496_v53  ;;  %1338 = vmatprep.subr.mxu0 %v4857_v54  ;;  %v4873_v53 = vld [vmem:[#allocation6 + $0x188] sm:$0xff] }
 0x3be   :  { %1215 = vmatprep.subr.mxu1 %v4500_v51  ;;  %1339 = vmatpush1.msra.mxu0 %v4861_v23  ;;  %v4877_v51 = vld [vmem:[#allocation6 + $0x180] sm:$0xff] }
 0x3bf   :  { %1216 = vmatpush1.msra.mxu1 %v4504_v49  ;;  %1340 = vmatprep.subr.mxu0 %v4865_v59  ;;  %v4881_v49 = vld [vmem:[#allocation6 + $0x158] sm:$0xff] }
 0x3c0   :  { %1217 = vmatprep.subr.mxu1 %v4508_v44  ;;  %1341 = vmatpush1.msra.mxu0 %v4869_v63  ;;  %v4885_v44 = vld [vmem:[#allocation6 + $0x150] sm:$0xff] }
 0x3c1   :  { %1218 = vmatpush1.msra.mxu1 %v4512_v58  ;;  %1342 = vmatprep.subr.mxu0 %v4873_v53  ;;  %v4889_v58 = vld [vmem:[#allocation6 + $0x128] sm:$0xff] }
 0x3c2   :  { %1219 = vmatprep.subr.mxu1 %v4516_v21  ;;  %1343 = vmatpush1.msra.mxu0 %v4877_v51  ;;  %v4893_v21 = vld [vmem:[#allocation6 + $0x120] sm:$0xff] }
 0x3c3   :  { %1220 = vmatpush1.msra.mxu1 %v4520_v62  ;;  %1344 = vmatprep.subr.mxu0 %v4881_v49  ;;  %v4897_v62 = vld [vmem:[#allocation6 + $0xf8] sm:$0xff] }
 0x3c4   :  { %1221 = vmatprep.subr.mxu1 %v4524_v18  ;;  %1345 = vmatpush1.msra.mxu0 %v4885_v44  ;;  %v4901_v18 = vld [vmem:[#allocation6 + $0xf0] sm:$0xff] }
 0x3c5   :  { %1222 = vmatpush1.msra.mxu1 %v4528_v0  ;;  %1346 = vmatprep.subr.mxu0 %v4889_v58  ;;  %v4905_v0 = vld [vmem:[#allocation6 + $0xc8] sm:$0xff] }
 0x3c6   :  { %1223 = vmatprep.subr.mxu1 %v4532_v60  ;;  %1347 = vmatpush1.msra.mxu0 %v4893_v21  ;;  %v4909_v60 = vld [vmem:[#allocation6 + $0xc0] sm:$0xff] }
 0x3c7   :  { %1224 = vmatpush1.msra.mxu1 %v4536_v37  ;;  %1348 = vmatprep.subr.mxu0 %v4897_v62  ;;  %v4913_v37 = vld [vmem:[#allocation6 + $0x98] sm:$0xff] }
 0x3c8   :  { %1225 = vmatprep.subr.mxu1 %v4540_v57  ;;  %1349 = vmatpush1.msra.mxu0 %v4901_v18  ;;  %v4917_v57 = vld [vmem:[#allocation6 + $0x90] sm:$0xff] }
 0x3c9   :  { %1226 = vmatpush1.msra.mxu1 %v4544_v19  ;;  %1350 = vmatprep.subr.mxu0 %v4905_v0  ;;  %v4921_v19 = vld [vmem:[#allocation6 + $0x68] sm:$0xff] }
 0x3ca   :  { %1227 = vmatprep.subr.mxu1 %v4548_v33  ;;  %1351 = vmatpush1.msra.mxu0 %v4909_v60  ;;  %v4925_v33 = vld [vmem:[#allocation6 + $0x60] sm:$0xff] }
 0x3cb   :  { %1228 = vmatpush1.msra.mxu1 %v4552_v24  ;;  %1352 = vmatprep.subr.mxu0 %v4913_v37  ;;  %v4929_v24 = vld [vmem:[#allocation6 + $0x38] sm:$0xff] }
 0x3cc   :  { %1229 = vmatprep.subr.mxu1 %v4556_v61  ;;  %1353 = vmatpush1.msra.mxu0 %v4917_v57  ;;  %v4933_v61 = vld [vmem:[#allocation6 + $0x30] sm:$0xff] }
 0x3cd   :  { %1230 = vmatpush1.msra.mxu1 %v4560_v26  ;;  %1354 = vmatprep.subr.mxu0 %v4921_v19  ;;  %v4937_v26 = vld [vmem:[#allocation6 + $0x8] sm:$0xff] }
 0x3ce   :  { %1231 = vmatprep.subr.mxu1 %v4564_v35  ;;  %1355 = vmatpush1.msra.mxu0 %v4925_v33  ;;  %v4941_v35 = vld [vmem:[#allocation6] sm:$0xff] }
 0x3cf   :  { %1232 = vmatpush1.msra.mxu1 %v4568_v45  ;;  %1356 = vmatprep.subr.mxu0 %v4929_v24  ;;  %v4945_v45 = vld [vmem:[#allocation6 + $0x5d8] sm:$0xff] }
 0x3d0   :  { %1233 = vmatprep.subr.mxu1 %v4572_v31  ;;  %1357 = vmatpush1.msra.mxu0 %v4933_v61  ;;  %v4949_v31 = vld [vmem:[#allocation6 + $0x5d0] sm:$0xff] }
 0x3d1   :  { %1234 = vmatpush1.msra.mxu1 %v4576_v29  ;;  %1358 = vmatprep.subr.mxu0 %v4937_v26  ;;  %v4953_v29 = vld [vmem:[#allocation6 + $0x5a8] sm:$0xff] }
 0x3d2   :  { %1235 = vmatprep.subr.mxu1 %v4580_v28  ;;  %1359 = vmatpush1.msra.mxu0 %v4941_v35  ;;  %v4957_v28 = vld [vmem:[#allocation6 + $0x5a0] sm:$0xff] }
 0x3d3   :  { %1236 = vmatpush2.msra.mxu1 %v4584_v47  ;;  %1360 = vmatprep.subr.mxu0 %v4945_v45  ;;  %v4961_v47 = vld [vmem:[#allocation6 + $0x578] sm:$0xff] }
 0x3d4   :  { %1237 = vmatprep.subr.mxu1 %v4588_v1  ;;  %1361 = vmatpush2.msra.mxu0 %v4949_v31  ;;  %v4965_v1 = vld [vmem:[#allocation6 + $0x570] sm:$0xff] }
 0x3d5   :  { %1238 = vmatpush2.msra.mxu1 %v4592_v2  ;;  %1362 = vmatprep.subr.mxu0 %v4953_v29  ;;  %v4969_v2 = vld [vmem:[#allocation6 + $0x548] sm:$0xff] }
 0x3d6   :  { %1239 = vmatprep.subr.mxu1 %v4596_v3  ;;  %1363 = vmatpush2.msra.mxu0 %v4957_v28  ;;  %v4973_v3 = vld [vmem:[#allocation6 + $0x540] sm:$0xff] }
 0x3d7   :  { %1240 = vmatpush2.msra.mxu1 %v4600_v4  ;;  %1364 = vmatprep.subr.mxu0 %v4961_v47  ;;  %v4977_v4 = vld [vmem:[#allocation6 + $0x518] sm:$0xff] }
 0x3d8   :  { %1241 = vmatprep.subr.mxu1 %v4604_v5  ;;  %1365 = vmatpush2.msra.mxu0 %v4965_v1  ;;  %v7277_v5 = vld [vmem:[#allocation96_spill] sm:$0xff] }
 0x3d9   :  { %1242 = vmatpush2.msra.mxu1 %v4608_v6  ;;  %1366 = vmatprep.subr.mxu0 %v4969_v2  ;;  %v7278_v6 = vld [vmem:[#allocation98_spill] sm:$0xff] }
 0x3da   :  { %1243 = vmatprep.subr.mxu1 %v4612_v7  ;;  %1367 = vmatpush2.msra.mxu0 %v4973_v3  ;;  %v7280_v7 = vld [vmem:[#allocation100_spill] sm:$0xff] }
 0x3db   :  { %1244 = vmatpush2.msra.mxu1 %v4616_v8  ;;  %1368 = vmatprep.subr.mxu0 %v4977_v4  ;;  %v7282_v8 = vld [vmem:[#allocation102_spill] sm:$0xff] }
 0x3dc   :  { %1245 = vmatprep.subr.mxu1 %v7277_v5  ;;  %1369 = vmatpush2.msra.mxu0 %v4981_v30  ;;  %v5021_v5 = vld [vmem:[#allocation6 + $0x420] sm:$0xff] }
 0x3dd   :  { %1246 = vmatpush2.msra.mxu1 %v7278_v6  ;;  %1370 = vmatprep.subr.mxu0 %v4985_v16  ;;  %7297 = vst [vmem:[#allocation25_spill] sm:$0xff] %v5021_v5  ;;  %v7298_v6 = vld [vmem:[#allocation65_spill] sm:$0xff] }
 0x3de   :  { %1247 = vmatprep.subr.mxu1 %v7280_v7  ;;  %1371 = vmatpush2.msra.mxu0 %v4989_v17  ;;  %v5025_v7 = vld [vmem:[#allocation6 + $0x3f8] sm:$0xff] }
 0x3df   :  { %1248 = vmatpush2.msra.mxu1 %v7282_v8  ;;  %1372 = vmatprep.subr.mxu0 %v4993_v40  ;;  %7299 = vst [vmem:[#allocation26_spill] sm:$0xff] %v5025_v7  ;;  %v7300_v8 = vld [vmem:[#allocation109_spill] sm:$0xff] }
 0x3e0   :  { %1249 = vmatprep.subr.mxu1 %v7284_v11  ;;  %1373 = vmatpush2.msra.mxu0 %v4997_v48  ;;  %v5029_v11 = vld [vmem:[#allocation6 + $0x3f0] sm:$0xff] }
 0x3e1   :  { %1250 = vmatpush2.msra.mxu1 %v7286_v10  ;;  %1374 = vmatprep.subr.mxu0 %v5001_v9  ;;  %7301 = vst [vmem:[#allocation27_spill] sm:$0xff] %v5029_v11  ;;  %v7302_v10 = vld [vmem:[#allocation67_spill] sm:$0xff] }
 0x3e2   :  { %1251 = vmatprep.subr.mxu1 %v7288_v14  ;;  %1375 = vmatpush2.msra.mxu0 %v5005_v15  ;;  %v5033_v14 = vld [vmem:[#allocation6 + $0x3c8] sm:$0xff] }
 0x3e3   :  { %1252 = vmatpush2.msra.mxu1 %v7290_v34  ;;  %1376 = vmatprep.subr.mxu0 %v5009_v39  ;;  %7303 = vst [vmem:[#allocation28_spill] sm:$0xff] %v5033_v14  ;;  %v7304_v34 = vld [vmem:[#allocation110_spill] sm:$0xff]  ;;  %v1058_v15 = vld [vmem:[#allocation3 + $0xa8] sm:$0xff] }
 0x3e4   :  { %1253 = vmatprep.subr.mxu1 %v7292_v13  ;;  %1377 = vmatpush2.msra.mxu0 %v5013_v32  ;;  %v5037_v13 = vld [vmem:[#allocation6 + $0x3c0] sm:$0xff] }
 0x3e5   :  { %1254 = vmatpush2.msra.mxu1 %v7294_v50  ;;  %1378 = vmatprep.subr.mxu0 %v5017_v43  ;;  %7305 = vst [vmem:[#allocation29_spill] sm:$0xff] %v5037_v13  ;;  %v7306_v50 = vld [vmem:[#allocation69_spill] sm:$0xff] }
 0x3e6   :  { %1255 = vmatprep.subr.mxu1 %v7296_v36  ;;  %1379 = vmatpush2.msra.mxu0 %v5021_v5  ;;  %v5041_v36 = vld [vmem:[#allocation6 + $0x398] sm:$0xff]  ;;  %v7317_v5 = vld [vmem:[#allocation13_spill] sm:$0xff] }
 0x3e7   :  { %1256 = vmatpush2.msra.mxu1 %v7298_v6  ;;  %1380 = vmatprep.subr.mxu0 %v5025_v7  ;;  %7307 = vst [vmem:[#allocation30_spill] sm:$0xff] %v5041_v36  ;;  %v7308_v6 = vld [vmem:[#allocation71_spill] sm:$0xff] }
 0x3e8   :  { %1257 = vmatprep.subr.mxu1 %v7300_v8  ;;  %1381 = vmatpush2.msra.mxu0 %v5029_v11  ;;  %v7309_v8 = vld [vmem:[#allocation73_spill] sm:$0xff]  ;;  %v7314_v7 = vld [vmem:[#allocation103_spill] sm:$0xff] }
 0x3e9   :  { %1258 = vmatpush2.msra.mxu1 %v7302_v10  ;;  %1382 = vmatprep.subr.mxu0 %v5033_v14  ;;  %v7310_v10 = vld [vmem:[#allocation95_spill] sm:$0xff]  ;;  %v7311_v11 = vld [vmem:[#allocation97_spill] sm:$0xff] }
 0x3ea   :  { %1259 = vmatprep.subr.mxu1 %v7304_v34  ;;  %1383 = vmatpush2.msra.mxu0 %v5037_v13  ;;  %v7312_v14 = vld [vmem:[#allocation99_spill] sm:$0xff]  ;;  %v7313_v34 = vld [vmem:[#allocation101_spill] sm:$0xff] }
 0x3eb   :  { %1260 = vmatpush2.msra.mxu1 %v7306_v50  ;;  %1384 = vmatprep.subr.mxu0 %v5041_v36  ;;  %v7315_v13 = vld [vmem:[#allocation41_spill] sm:$0xff]  ;;  %v7316_v50 = vld [vmem:[#allocation43_spill] sm:$0xff] }
 0x3ec   :  { %1261 = vmatprep.subr.mxu1 %v7308_v6  ;;  %1385 = vmatpush2.msra.mxu0 %v7309_v8  ;;  %v7318_v36 = vld [vmem:[#allocation45_spill] sm:$0xff]  ;;  %v7319_v6 = vld [vmem:[#allocation14_spill] sm:$0xff] }
 0x3ed   :  { %1262 = vmatpush2.msra.mxu1 %v7310_v10  ;;  %1386 = vmatprep.subr.mxu0 %v7311_v11  ;;  %v5057_v8 = vld [vmem:[#allocation6 + $0x2e8] sm:$0xff]  ;;  %v5060_v11 = vld [vmem:[#allocation6 + $0x2e0] sm:$0xff] }
 0x3ee   :  { %1263 = vmatprep.subr.mxu1 %v7312_v14  ;;  %1387 = vmatpush2.msra.mxu0 %v7313_v34  ;;  %7320 = vst [vmem:[#allocation31_spill] sm:$0xff] %v5057_v8  ;;  %7321 = vst [vmem:[#allocation32_spill] sm:$0xff] %v5060_v11  ;;  %v5064_v14 = vld [vmem:[#allocation6 + $0x2b8] sm:$0xff]  ;;  %v5074_v10 = vld [vmem:[#allocation6 + $0x280] sm:$0xff] }
 0x3ef   :  { %1264 = vmatpush2.msra.mxu1 %v7314_v7  ;;  %1388 = vmatprep.subr.mxu0 %v7315_v13  ;;  %v7322_v7 = vld [vmem:[#allocation47_spill] sm:$0xff]  ;;  %7323 = vst [vmem:[#allocation33_spill] sm:$0xff] %v5064_v14  ;;  %v5068_v13 = vld [vmem:[#allocation6 + $0x2b0] sm:$0xff]  ;;  %7327 = vst [vmem:[#allocation36_spill] sm:$0xff] %v5074_v10 }
 0x3f0   :  { %1265 = vmatprep.subr.mxu1 %v7316_v50  ;;  %1389 = vmatpush2.msra.mxu0 %v7317_v5  ;;  %v7324_v5 = vld [vmem:[#allocation15_spill] sm:$0xff]  ;;  %7325 = vst [vmem:[#allocation34_spill] sm:$0xff] %v5068_v13  ;;  %v5080_v50 = vld [vmem:[#allocation6 + $0x250] sm:$0xff] }
 0x3f1   :  { %1266 = vmatpush2.msra.mxu1 %v7318_v36  ;;  %1390 = vmatprep.subr.mxu0 %v7319_v6  ;;  %v5071_v36 = vld [vmem:[#allocation6 + $0x288] sm:$0xff]  ;;  %v5077_v34 = vld [vmem:[#allocation6 + $0x258] sm:$0xff]  ;;  %7329 = vst [vmem:[#allocation38_spill] sm:$0xff] %v5080_v50 }
 0x3f2   :  { %1268 = vmatmul.mubr.f32.vlgmr.msra.gmra.mxu1 %v4808_v42  ;;  %1399 = vmatprep.subr.mxu1 %v5057_v8  ;;  %7326 = vst [vmem:[#allocation35_spill] sm:$0xff] %v5071_v36  ;;  %7328 = vst [vmem:[#allocation37_spill] sm:$0xff] %v5077_v34  ;;  %v5083_v6 = vld [vmem:[#allocation6 + $0x228] sm:$0xff]  ;;  %v1056_v8 = vld [vmem:[#allocation3 + $0x98] sm:$0xff] }
 0x3f3   :  { %1400 = vmatpush1.msra.mxu1 %v5060_v11  ;;  %1391 = vmatpush2.msra.mxu0 %v7322_v7  ;;  %7330 = vst [vmem:[#allocation39_spill] sm:$0xff] %v5083_v6  ;;  %v5086_v7 = vld [vmem:[#allocation6 + $0x220] sm:$0xff]  ;;  %v1055_v11 = vld [vmem:[#allocation3 + $0x90] sm:$0xff] }
 0x3f4   :  { %1401 = vmatprep.subr.mxu1 %v5064_v14  ;;  %1470 = vmatprep.subr.mxu0 %v7324_v5  ;;  %7331 = vst [vmem:[#allocation40_spill] sm:$0xff] %v5086_v7  ;;  %v5089_v5 = vld [vmem:[#allocation6 + $0x1f8] sm:$0xff]  ;;  %v7386_v14 = vld [vmem:[#allocation18_spill] sm:$0xff] }
 0x3f5   :  { %1402 = vmatpush1.msra.mxu1 %v5068_v13  ;;  %7332 = vst [vmem:[#allocation42_spill] sm:$0xff] %v5089_v5  ;;  %v7384_v13 = vld [vmem:[#allocation17_spill] sm:$0xff] }
 0x3f6   :  { %1403 = vmatprep.subr.mxu1 %v5071_v36  ;;  %v7382_v36 = vld [vmem:[#allocation16_spill] sm:$0xff] }
 0x3f7   :  { %1404 = vmatpush1.msra.mxu1 %v5074_v10  ;;  %v5092_v10 = vld [vmem:[#allocation6 + $0x1f0] sm:$0xff] }
 0x3f8   :  { %1405 = vmatprep.subr.mxu1 %v5077_v34  ;;  %7333 = vst [vmem:[#allocation44_spill] sm:$0xff] %v5092_v10  ;;  %v5095_v34 = vld [vmem:[#allocation6 + $0x1c8] sm:$0xff] }
 0x3f9   :  { %1406 = vmatpush1.msra.mxu1 %v5080_v50  ;;  %7334 = vst [vmem:[#allocation46_spill] sm:$0xff] %v5095_v34  ;;  %v5098_v50 = vld [vmem:[#allocation6 + $0x1c0] sm:$0xff] }
 0x3fa   :  { %1407 = vmatprep.subr.mxu1 %v5083_v6  ;;  %7335 = vst [vmem:[#allocation48_spill] sm:$0xff] %v5098_v50  ;;  %v5101_v6 = vld [vmem:[#allocation6 + $0x198] sm:$0xff] }
 0x3fb   :  { %1408 = vmatpush1.msra.mxu1 %v5086_v7  ;;  %7336 = vst [vmem:[#allocation50_spill] sm:$0xff] %v5101_v6  ;;  %v5104_v7 = vld [vmem:[#allocation6 + $0x190] sm:$0xff] }
 0x3fc   :  { %1409 = vmatprep.subr.mxu1 %v5089_v5  ;;  %7337 = vst [vmem:[#allocation52_spill] sm:$0xff] %v5104_v7  ;;  %v5107_v5 = vld [vmem:[#allocation6 + $0x168] sm:$0xff] }
 0x3fd   :  { %1410 = vmatpush1.msra.mxu1 %v5092_v10  ;;  %7338 = vst [vmem:[#allocation54_spill] sm:$0xff] %v5107_v5  ;;  %v5110_v10 = vld [vmem:[#allocation6 + $0x160] sm:$0xff] }
 0x3fe   :  { %1411 = vmatprep.subr.mxu1 %v5095_v34  ;;  %7339 = vst [vmem:[#allocation56_spill] sm:$0xff] %v5110_v10  ;;  %v5113_v34 = vld [vmem:[#allocation6 + $0x138] sm:$0xff] }
 0x3ff   :  { %1412 = vmatpush1.msra.mxu1 %v5098_v50  ;;  %7340 = vst [vmem:[#allocation58_spill] sm:$0xff] %v5113_v34  ;;  %v5116_v50 = vld [vmem:[#allocation6 + $0x130] sm:$0xff] }
 0x400   :  { %1413 = vmatprep.subr.mxu1 %v5101_v6  ;;  %7341 = vst [vmem:[#allocation60_spill] sm:$0xff] %v5116_v50  ;;  %v5119_v6 = vld [vmem:[#allocation6 + $0x108] sm:$0xff] }
 0x401   :  { %1414 = vmatpush1.msra.mxu1 %v5104_v7  ;;  %7342 = vst [vmem:[#allocation62_spill] sm:$0xff] %v5119_v6  ;;  %v5122_v7 = vld [vmem:[#allocation6 + $0x100] sm:$0xff] }
 0x402   :  { %1415 = vmatprep.subr.mxu1 %v5107_v5  ;;  %7343 = vst [vmem:[#allocation64_spill] sm:$0xff] %v5122_v7  ;;  %v5125_v5 = vld [vmem:[#allocation6 + $0xd8] sm:$0xff] }
 0x403   :  { %1416 = vmatpush1.msra.mxu1 %v5110_v10  ;;  %7344 = vst [vmem:[#allocation66_spill] sm:$0xff] %v5125_v5  ;;  %v5128_v10 = vld [vmem:[#allocation6 + $0xd0] sm:$0xff] }
 0x404   :  { %1417 = vmatprep.subr.mxu1 %v5113_v34  ;;  %7345 = vst [vmem:[#allocation68_spill] sm:$0xff] %v5128_v10  ;;  %v5131_v34 = vld [vmem:[#allocation6 + $0xa8] sm:$0xff] }
 0x405   :  { %1418 = vmatpush1.msra.mxu1 %v5116_v50  ;;  %7346 = vst [vmem:[#allocation70_spill] sm:$0xff] %v5131_v34  ;;  %v5134_v50 = vld [vmem:[#allocation6 + $0xa0] sm:$0xff] }
 0x406   :  { %1419 = vmatprep.subr.mxu1 %v5119_v6  ;;  %7347 = vst [vmem:[#allocation72_spill] sm:$0xff] %v5134_v50  ;;  %v5137_v6 = vld [vmem:[#allocation6 + $0x78] sm:$0xff] }
 0x407   :  { %1420 = vmatpush1.msra.mxu1 %v5122_v7  ;;  %7348 = vst [vmem:[#allocation75_spill] sm:$0xff] %v5137_v6  ;;  %v5140_v7 = vld [vmem:[#allocation6 + $0x70] sm:$0xff] }
 0x408   :  { %1421 = vmatprep.subr.mxu1 %v5125_v5  ;;  %7349 = vst [vmem:[#allocation77_spill] sm:$0xff] %v5140_v7  ;;  %v5143_v5 = vld [vmem:[#allocation6 + $0x48] sm:$0xff] }
 0x409   :  { %1422 = vmatpush1.msra.mxu1 %v5128_v10  ;;  %7350 = vst [vmem:[#allocation79_spill] sm:$0xff] %v5143_v5  ;;  %v5146_v10 = vld [vmem:[#allocation6 + $0x40] sm:$0xff] }
 0x40a   :  { %1423 = vmatprep.subr.mxu1 %v5131_v34  ;;  %7351 = vst [vmem:[#allocation81_spill] sm:$0xff] %v5146_v10  ;;  %v5149_v34 = vld [vmem:[#allocation6 + $0x18] sm:$0xff] }
 0x40b   :  { %1424 = vmatpush1.msra.mxu1 %v5134_v50  ;;  %7352 = vst [vmem:[#allocation83_spill] sm:$0xff] %v5149_v34  ;;  %v5152_v50 = vld [vmem:[#allocation6 + $0x10] sm:$0xff] }
 0x40c   :  { %1425 = vmatprep.subr.mxu1 %v5137_v6  ;;  %7353 = vst [vmem:[#allocation85_spill] sm:$0xff] %v5152_v50  ;;  %v5155_v6 = vld [vmem:[#allocation6 + $0x5e8] sm:$0xff] }
 0x40d   :  { %1426 = vmatpush1.msra.mxu1 %v5140_v7  ;;  %7354 = vst [vmem:[#allocation87_spill] sm:$0xff] %v5155_v6  ;;  %v5158_v7 = vld [vmem:[#allocation6 + $0x5e0] sm:$0xff] }
 0x40e   :  { %1427 = vmatprep.subr.mxu1 %v5143_v5  ;;  %7355 = vst [vmem:[#allocation89_spill] sm:$0xff] %v5158_v7  ;;  %v5161_v5 = vld [vmem:[#allocation6 + $0x5b8] sm:$0xff] }
 0x40f   :  { %1428 = vmatpush1.msra.mxu1 %v5146_v10  ;;  %7356 = vst [vmem:[#allocation91_spill] sm:$0xff] %v5161_v5  ;;  %v5164_v10 = vld [vmem:[#allocation6 + $0x5b0] sm:$0xff] }
 0x410   :  { %1429 = vmatprep.subr.mxu1 %v5149_v34  ;;  %7357 = vst [vmem:[#allocation93_spill] sm:$0xff] %v5164_v10  ;;  %v5167_v34 = vld [vmem:[#allocation6 + $0x588] sm:$0xff] }
 0x411   :  { %1430 = vmatpush1.msra.mxu1 %v5152_v50  ;;  %7358 = vst [vmem:[#allocation74_spill] sm:$0xff] %v5167_v34  ;;  %v5170_v50 = vld [vmem:[#allocation6 + $0x580] sm:$0xff] }
 0x412   :  { %1431 = vmatprep.subr.mxu1 %v5155_v6  ;;  %7359 = vst [vmem:[#allocation76_spill] sm:$0xff] %v5170_v50  ;;  %v5173_v6 = vld [vmem:[#allocation6 + $0x558] sm:$0xff] }
 0x413   :  { %1432 = vmatpush2.msra.mxu1 %v5158_v7  ;;  %7360 = vst [vmem:[#allocation78_spill] sm:$0xff] %v5173_v6  ;;  %v5176_v7 = vld [vmem:[#allocation6 + $0x550] sm:$0xff] }
 0x414   :  { %1433 = vmatprep.subr.mxu1 %v5161_v5  ;;  %7361 = vst [vmem:[#allocation80_spill] sm:$0xff] %v5176_v7  ;;  %v5179_v5 = vld [vmem:[#allocation6 + $0x528] sm:$0xff] }
 0x415   :  { %1434 = vmatpush2.msra.mxu1 %v5164_v10  ;;  %7362 = vst [vmem:[#allocation82_spill] sm:$0xff] %v5179_v5  ;;  %v5182_v10 = vld [vmem:[#allocation6 + $0x520] sm:$0xff] }
 0x416   :  { %1435 = vmatprep.subr.mxu1 %v5167_v34  ;;  %7363 = vst [vmem:[#allocation84_spill] sm:$0xff] %v5182_v10  ;;  %v5185_v34 = vld [vmem:[#allocation6 + $0x4f8] sm:$0xff] }
 0x417   :  { %1436 = vmatpush2.msra.mxu1 %v5170_v50  ;;  %7364 = vst [vmem:[#allocation86_spill] sm:$0xff] %v5185_v34  ;;  %v5188_v50 = vld [vmem:[#allocation6 + $0x4f0] sm:$0xff] }
 0x418   :  { %1437 = vmatprep.subr.mxu1 %v5173_v6  ;;  %7365 = vst [vmem:[#allocation88_spill] sm:$0xff] %v5188_v50  ;;  %v5191_v6 = vld [vmem:[#allocation6 + $0x4c8] sm:$0xff] }
 0x419   :  { %1438 = vmatpush2.msra.mxu1 %v5176_v7  ;;  %7366 = vst [vmem:[#allocation90_spill] sm:$0xff] %v5191_v6  ;;  %v5194_v7 = vld [vmem:[#allocation6 + $0x4c0] sm:$0xff] }
 0x41a   :  { %1439 = vmatprep.subr.mxu1 %v5179_v5  ;;  %7367 = vst [vmem:[#allocation92_spill] sm:$0xff] %v5194_v7  ;;  %v5197_v5 = vld [vmem:[#allocation6 + $0x498] sm:$0xff] }
 0x41b   :  { %1440 = vmatpush2.msra.mxu1 %v5182_v10  ;;  %7368 = vst [vmem:[#allocation94_spill] sm:$0xff] %v5197_v5  ;;  %v5200_v10 = vld [vmem:[#allocation6 + $0x490] sm:$0xff] }
 0x41c   :  { %1441 = vmatprep.subr.mxu1 %v5185_v34  ;;  %7369 = vst [vmem:[#allocation96_spill] sm:$0xff] %v5200_v10  ;;  %v5203_v34 = vld [vmem:[#allocation6 + $0x468] sm:$0xff] }
 0x41d   :  { %1442 = vmatpush2.msra.mxu1 %v5188_v50  ;;  %7370 = vst [vmem:[#allocation98_spill] sm:$0xff] %v5203_v34  ;;  %v5206_v50 = vld [vmem:[#allocation6 + $0x460] sm:$0xff] }
 0x41e   :  { %1443 = vmatprep.subr.mxu1 %v5191_v6  ;;  %7371 = vst [vmem:[#allocation100_spill] sm:$0xff] %v5206_v50  ;;  %v5209_v6 = vld [vmem:[#allocation6 + $0x438] sm:$0xff] }
 0x41f   :  { %1444 = vmatpush2.msra.mxu1 %v5194_v7  ;;  %7372 = vst [vmem:[#allocation102_spill] sm:$0xff] %v5209_v6  ;;  %v5212_v7 = vld [vmem:[#allocation6 + $0x430] sm:$0xff] }
 0x420   :  { %1445 = vmatprep.subr.mxu1 %v5197_v5  ;;  %7373 = vst [vmem:[#allocation104_spill] sm:$0xff] %v5212_v7  ;;  %v5215_v5 = vld [vmem:[#allocation6 + $0x408] sm:$0xff] }
 0x421   :  { %1446 = vmatpush2.msra.mxu1 %v5200_v10  ;;  %7374 = vst [vmem:[#allocation105_spill] sm:$0xff] %v5215_v5  ;;  %v5218_v10 = vld [vmem:[#allocation6 + $0x400] sm:$0xff] }
 0x422   :  { %1447 = vmatprep.subr.mxu1 %v5203_v34  ;;  %7375 = vst [vmem:[#allocation106_spill] sm:$0xff] %v5218_v10  ;;  %v5221_v34 = vld [vmem:[#allocation6 + $0x3d8] sm:$0xff] }
 0x423   :  { %1448 = vmatpush2.msra.mxu1 %v5206_v50  ;;  %7376 = vst [vmem:[#allocation61_spill] sm:$0xff] %v5221_v34  ;;  %v5224_v50 = vld [vmem:[#allocation6 + $0x3d0] sm:$0xff] }
 0x424   :  { %1449 = vmatprep.subr.mxu1 %v5209_v6  ;;  %7377 = vst [vmem:[#allocation107_spill] sm:$0xff] %v5224_v50  ;;  %v5227_v6 = vld [vmem:[#allocation6 + $0x3a8] sm:$0xff] }
 0x425   :  { %1450 = vmatpush2.msra.mxu1 %v5212_v7  ;;  %7378 = vst [vmem:[#allocation63_spill] sm:$0xff] %v5227_v6  ;;  %v5230_v7 = vld [vmem:[#allocation6 + $0x3a0] sm:$0xff] }
 0x426   :  { %1451 = vmatprep.subr.mxu1 %v5215_v5  ;;  %7379 = vst [vmem:[#allocation108_spill] sm:$0xff] %v5230_v7  ;;  %v5233_v5 = vld [vmem:[#allocation6 + $0x378] sm:$0xff] }
 0x427   :  { %1452 = vmatpush2.msra.mxu1 %v5218_v10  ;;  %7380 = vst [vmem:[#allocation65_spill] sm:$0xff] %v5233_v5  ;;  %v7381_v10 = vld [vmem:[#allocation49_spill] sm:$0xff] }
 0x428   :  { %1453 = vmatprep.subr.mxu1 %v5221_v34  ;;  %v7383_v34 = vld [vmem:[#allocation51_spill] sm:$0xff] }
 0x429   :  { %1454 = vmatpush2.msra.mxu1 %v5224_v50  ;;  %v7385_v50 = vld [vmem:[#allocation53_spill] sm:$0xff] }
 0x42a   :  { %1455 = vmatprep.subr.mxu1 %v5227_v6 }
 0x42b   :  { %1456 = vmatpush2.msra.mxu1 %v5230_v7 }
 0x42c   :  { %1457 = vmatprep.subr.mxu1 %v5233_v5 }
 0x42d   :  { %1458 = vmatpush2.msra.mxu1 %v7381_v10 }
 0x42e   :  { %1459 = vmatprep.subr.mxu1 %v7382_v36  ;;  %v1057_v36 = vld [vmem:[#allocation3 + $0xa0] sm:$0xff] }
 0x42f   :  { %1460 = vmatpush2.msra.mxu1 %v7383_v34 }
 0x430   :  { %1461 = vmatprep.subr.mxu1 %v7384_v13 }
 0x431   :  { %1462 = vmatpush2.msra.mxu1 %v7385_v50 }
 0x432   :  { %1595 = vmatprep.subr.mxu1 %v7386_v14 }
 0x472   :  { %v1127_v6 = vpop.f32.mrf.mxu1  ;;  %v1198_v10 = vpop.f32.mrf.mxu0 }
 0x473   :  { %v1274_v43 = vadd.f32 %v1127_v6, %v1055_v11  ;;  %v1288_v9 = vadd.f32 %v1198_v10, %v1057_v36  ;;  %v7387_v6 = vld [vmem:[#allocation12_spill] sm:$0xff]  ;;  %v1059_v10 = vld [vmem:[#allocation3 + $0xb0] sm:$0xff] }
 0x474   :  { %v1129_v7 = vpop.f32.mrf.mxu1  ;;  %v1200_v34 = vpop.f32.mrf.mxu0 }
 0x475   :  { %v1275_v32 = vadd.f32 %v1129_v7, %v1056_v8  ;;  %v2421_v39 = vmul.f32 -1.442695, %v1274_v43  ;;  %v1289_v13 = vadd.f32 %v1200_v34, %v1058_v15  ;;  %v2423_v48 = vmul.f32 -1.442695, %v1288_v9 }
 0x477   :  { %v2422_v5 = vmul.f32 -1.442695, %v1275_v32  ;;  %2509 = vpow2.f32 %v2421_v39  ;;  %v2424_v50 = vmul.f32 -1.442695, %v1289_v13 }
 0x479   :  { %2511 = vpow2.f32 %v2422_v5 }
 0x47a   :  { %2513 = vpow2.f32 %v2423_v48 }
 0x47b   :  { %2515 = vpow2.f32 %v2424_v50 }
 0x484   :  { %v2510_v40 = vpop.eup %2509 }
 0x485   :  { %v1282_v17 = vadd.f32 1.0, %v2510_v40  ;;  %v1060_v40 = vld [vmem:[#allocation3 + $0xb8] sm:$0xff] }
 0x486   :  { %v2512_v14 = vpop.eup %2511 }
 0x487   :  { %v1283_v16 = vadd.f32 1.0, %v2512_v14  ;;  %2517 = vrcp.f32 %v1282_v17  ;;  %v2514_v43 = vpop.eup %2513 }
 0x488   :  { %v2516_v32 = vpop.eup %2515  ;;  %v1296_v39 = vadd.f32 1.0, %v2514_v43 }
 0x489   :  { %2519 = vrcp.f32 %v1283_v16  ;;  %v1297_v11 = vadd.f32 1.0, %v2516_v32 }
 0x48a   :  { %2521 = vrcp.f32 %v1296_v39 }
 0x48b   :  { %2523 = vrcp.f32 %v1297_v11 }
 0x494   :  { %v2518_v5 = vpop.eup %2517 }
 0x496   :  { %v2520_v36 = vpop.eup %2519 }
 0x497   :  { %v2522_v13 = vpop.eup %2521 }
 0x498   :  { %v2524_v50 = vpop.eup %2523  ;;  %v1310_v14 = vsub.f32 1.0, %v2522_v13 }
 0x499   :  { %v1311_v32 = vsub.f32 1.0, %v2524_v50 }
 0x4b2   :  { %v1269_v8 = vpop.f32.mrf.mxu1 }
 0x4b3   :  { %v1302_v7 = vadd.f32 %v1269_v8, %v7387_v6  ;;  %v1314_v6 = vmul.f32 %v2522_v13, %v4808_v42  ;;  %v5256_v42 = vld [vmem:[#allocation6 + $0x2f0] sm:$0xff]  ;;  %v5444_v13 = vld [vmem:[#allocation6 + $0x478] sm:$0xff] }
 0x4b4   :  { %v1271_v15 = vpop.f32.mrf.mxu1  ;;  %7399 = vst [vmem:[#allocation95_spill] sm:$0xff] %v5444_v13 }
 0x4b5   :  { %v1304_v9 = vmul.f32 %v2518_v5, %v1302_v7  ;;  %v1303_v48 = vadd.f32 %v1271_v15, %v4004_v41  ;;  %v1315_v5 = vmul.f32 %v2524_v50, %v4810_v12  ;;  %v5260_v12 = vld [vmem:[#allocation6 + $0x2c8] sm:$0xff] }
 0x4b6   :  { %v7400_v50 = vld [vmem:[#allocation21_spill] sm:$0xff] }
 0x4b7   :  { %v1306_v34 = vadd.f32 %v1304_v9, %v1059_v10  ;;  %v1305_v17 = vmul.f32 %v2520_v36, %v1303_v48  ;;  %v5268_v10 = vld [vmem:[#allocation6 + $0x298] sm:$0xff]  ;;  %v5272_v9 = vld [vmem:[#allocation6 + $0x290] sm:$0xff]  ;;  %v5276_v48 = vld [vmem:[#allocation6 + $0x268] sm:$0xff] }
 0x4b8   :  { %v5428_v36 = vld [vmem:[#allocation6 + $0x4d8] sm:$0xff] }
 0x4b9   :  { %2525 = vtanh.f32 %v1306_v34  ;;  %v1307_v16 = vadd.f32 %v1305_v17, %v1060_v40  ;;  %7391 = vst [vmem:[#allocation110_spill] sm:$0xff] %v5428_v36  ;;  %v5432_v40 = vld [vmem:[#allocation6 + $0x4d0] sm:$0xff]  ;;  %v5436_v34 = vld [vmem:[#allocation6 + $0x4a8] sm:$0xff]  ;;  %v5440_v17 = vld [vmem:[#allocation6 + $0x4a0] sm:$0xff] }
 0x4ba   :  { %7393 = vst [vmem:[#allocation69_spill] sm:$0xff] %v5432_v40  ;;  %7395 = vst [vmem:[#allocation71_spill] sm:$0xff] %v5436_v34 }
 0x4bb   :  { %2527 = vtanh.f32 %v1307_v16  ;;  %7397 = vst [vmem:[#allocation73_spill] sm:$0xff] %v5440_v17  ;;  %v7398_v16 = vld [vmem:[#allocation59_spill] sm:$0xff] }
 0x4c6   :  { %v2526_v43 = vpop.eup %2525 }
 0x4c7   :  { %v1312_v8 = vmul.f32 %v2526_v43, %v1310_v14  ;;  %v5448_v14 = vld [vmem:[#allocation6 + $0x470] sm:$0xff] }
 0x4c8   :  { %v2528_v39 = vpop.eup %2527  ;;  %7401 = vst [vmem:[#allocation97_spill] sm:$0xff] %v5448_v14  ;;  %v7402_v43 = vld [vmem:[#allocation22_spill] sm:$0xff] }
 0x4c9   :  { %v1313_v7 = vmul.f32 %v2528_v39, %v1311_v32  ;;  %v5246_v15 = vadd.f32 %v1314_v6, %v1312_v8  ;;  %v5264_v6 = vld [vmem:[#allocation6 + $0x2c0] sm:$0xff]  ;;  %v5452_v32 = vld [vmem:[#allocation6 + $0x448] sm:$0xff]  ;;  %v7404_v8 = vld [vmem:[#allocation23_spill] sm:$0xff] }
 0x4ca   :  { %7403 = vst [vmem:[#allocation99_spill] sm:$0xff] %v5452_v32  ;;  %v5456_v39 = vld [vmem:[#allocation6 + $0x440] sm:$0xff] }
 0x4cb   :  { %v5248_v11 = vadd.f32 %v1315_v5, %v1313_v7  ;;  %1319 = vst [vmem:[#allocation8 + $0x30] sm:$0xff] %v5246_v15  ;;  %7405 = vst [vmem:[#allocation101_spill] sm:$0xff] %v5456_v39  ;;  %v7406_v7 = vld [vmem:[#allocation24_spill] sm:$0xff]  ;;  %v5460_v5 = vld [vmem:[#allocation6 + $0x418] sm:$0xff] }
 0x4cc   :  { %7407 = vst [vmem:[#allocation103_spill] sm:$0xff] %v5460_v5 }
 0x4cd   :  { %1320 = vst [vmem:[#allocation8 + $0x38] sm:$0xff] %v5248_v11  ;;  %1392 = vmatprep.mubr.f32.mxu0 %v5248_v11  ;;  %1463 = vmatprep.mubr.f32.mxu1 %v5248_v11 }
 0x4ce   :  { %1393 = vmatmul.mubr.f32.vlgmr.msra.gmra.mxu0 %v5246_v15  ;;  %1464 = vmatmul.mubr.f32.vlgmr.msra.gmra.mxu1 %v5246_v15 }
 0x4cf   :  { %1471 = vmatpush1.msra.mxu0 %v5256_v42  ;;  %1534 = vmatprep.mubr.f32.mxu0 %v5248_v11 }
 0x4d0   :  { %1472 = vmatprep.subr.mxu0 %v5260_v12  ;;  %1596 = vmatpush1.msra.mxu1 %v4821_v25  ;;  %v5280_v25 = vld [vmem:[#allocation6 + $0x260] sm:$0xff] }
 0x4d1   :  { %1473 = vmatpush1.msra.mxu0 %v5264_v6  ;;  %1597 = vmatprep.subr.mxu1 %v4825_v38  ;;  %v5284_v38 = vld [vmem:[#allocation6 + $0x238] sm:$0xff] }
 0x4d2   :  { %1474 = vmatprep.subr.mxu0 %v5268_v10  ;;  %1598 = vmatpush1.msra.mxu1 %v4829_v27  ;;  %v5288_v27 = vld [vmem:[#allocation6 + $0x230] sm:$0xff] }
 0x4d3   :  { %1475 = vmatpush1.msra.mxu0 %v5272_v9  ;;  %1599 = vmatprep.subr.mxu1 %v4833_v56  ;;  %v5292_v56 = vld [vmem:[#allocation6 + $0x208] sm:$0xff] }
 0x4d4   :  { %1476 = vmatprep.subr.mxu0 %v5276_v48  ;;  %1600 = vmatpush1.msra.mxu1 %v4837_v55  ;;  %v5296_v55 = vld [vmem:[#allocation6 + $0x200] sm:$0xff] }
 0x4d5   :  { %1477 = vmatpush1.msra.mxu0 %v5280_v25  ;;  %1601 = vmatprep.subr.mxu1 %v4841_v52  ;;  %v5300_v52 = vld [vmem:[#allocation6 + $0x1d8] sm:$0xff] }
 0x4d6   :  { %1478 = vmatprep.subr.mxu0 %v5284_v38  ;;  %1602 = vmatpush1.msra.mxu1 %v4845_v46  ;;  %v5304_v46 = vld [vmem:[#allocation6 + $0x1d0] sm:$0xff] }
 0x4d7   :  { %1479 = vmatpush1.msra.mxu0 %v5288_v27  ;;  %1603 = vmatprep.subr.mxu1 %v4849_v22  ;;  %v5308_v22 = vld [vmem:[#allocation6 + $0x1a8] sm:$0xff] }
 0x4d8   :  { %1480 = vmatprep.subr.mxu0 %v5292_v56  ;;  %1604 = vmatpush1.msra.mxu1 %v4853_v20  ;;  %v5312_v20 = vld [vmem:[#allocation6 + $0x1a0] sm:$0xff] }
 0x4d9   :  { %1481 = vmatpush1.msra.mxu0 %v5296_v55  ;;  %1605 = vmatprep.subr.mxu1 %v4857_v54  ;;  %v5316_v54 = vld [vmem:[#allocation6 + $0x178] sm:$0xff] }
 0x4da   :  { %1482 = vmatprep.subr.mxu0 %v5300_v52  ;;  %1606 = vmatpush1.msra.mxu1 %v4861_v23  ;;  %v5320_v23 = vld [vmem:[#allocation6 + $0x170] sm:$0xff] }
 0x4db   :  { %1483 = vmatpush1.msra.mxu0 %v5304_v46  ;;  %1607 = vmatprep.subr.mxu1 %v4865_v59  ;;  %v5324_v59 = vld [vmem:[#allocation6 + $0x148] sm:$0xff] }
 0x4dc   :  { %1484 = vmatprep.subr.mxu0 %v5308_v22  ;;  %1608 = vmatpush1.msra.mxu1 %v4869_v63  ;;  %v5328_v63 = vld [vmem:[#allocation6 + $0x140] sm:$0xff] }
 0x4dd   :  { %1485 = vmatpush1.msra.mxu0 %v5312_v20  ;;  %1609 = vmatprep.subr.mxu1 %v4873_v53  ;;  %v5332_v53 = vld [vmem:[#allocation6 + $0x118] sm:$0xff] }
 0x4de   :  { %1486 = vmatprep.subr.mxu0 %v5316_v54  ;;  %1610 = vmatpush1.msra.mxu1 %v4877_v51  ;;  %v5336_v51 = vld [vmem:[#allocation6 + $0x110] sm:$0xff] }
 0x4df   :  { %1487 = vmatpush1.msra.mxu0 %v5320_v23  ;;  %1611 = vmatprep.subr.mxu1 %v4881_v49  ;;  %v5340_v49 = vld [vmem:[#allocation6 + $0xe8] sm:$0xff] }
 0x4e0   :  { %1488 = vmatprep.subr.mxu0 %v5324_v59  ;;  %1612 = vmatpush1.msra.mxu1 %v4885_v44  ;;  %v5344_v44 = vld [vmem:[#allocation6 + $0xe0] sm:$0xff] }
 0x4e1   :  { %1489 = vmatpush1.msra.mxu0 %v5328_v63  ;;  %1613 = vmatprep.subr.mxu1 %v4889_v58  ;;  %v5348_v58 = vld [vmem:[#allocation6 + $0xb8] sm:$0xff] }
 0x4e2   :  { %1490 = vmatprep.subr.mxu0 %v5332_v53  ;;  %1614 = vmatpush1.msra.mxu1 %v4893_v21  ;;  %v5352_v21 = vld [vmem:[#allocation6 + $0xb0] sm:$0xff] }
 0x4e3   :  { %1491 = vmatpush1.msra.mxu0 %v5336_v51  ;;  %1615 = vmatprep.subr.mxu1 %v4897_v62  ;;  %v5356_v62 = vld [vmem:[#allocation6 + $0x88] sm:$0xff] }
 0x4e4   :  { %1492 = vmatprep.subr.mxu0 %v5340_v49  ;;  %1616 = vmatpush1.msra.mxu1 %v4901_v18  ;;  %v5360_v18 = vld [vmem:[#allocation6 + $0x80] sm:$0xff] }
 0x4e5   :  { %1493 = vmatpush1.msra.mxu0 %v5344_v44  ;;  %1617 = vmatprep.subr.mxu1 %v4905_v0  ;;  %v5364_v0 = vld [vmem:[#allocation6 + $0x58] sm:$0xff] }
 0x4e6   :  { %1494 = vmatprep.subr.mxu0 %v5348_v58  ;;  %1618 = vmatpush1.msra.mxu1 %v4909_v60  ;;  %v5368_v60 = vld [vmem:[#allocation6 + $0x50] sm:$0xff] }
 0x4e7   :  { %1495 = vmatpush1.msra.mxu0 %v5352_v21  ;;  %1619 = vmatprep.subr.mxu1 %v4913_v37  ;;  %v5372_v37 = vld [vmem:[#allocation6 + $0x28] sm:$0xff] }
 0x4e8   :  { %1496 = vmatprep.subr.mxu0 %v5356_v62  ;;  %1620 = vmatpush1.msra.mxu1 %v4917_v57  ;;  %v5376_v57 = vld [vmem:[#allocation6 + $0x20] sm:$0xff] }
 0x4e9   :  { %1497 = vmatpush1.msra.mxu0 %v5360_v18  ;;  %1621 = vmatprep.subr.mxu1 %v4921_v19  ;;  %v5380_v19 = vld [vmem:[#allocation6 + $0x5f8] sm:$0xff] }
 0x4ea   :  { %1498 = vmatprep.subr.mxu0 %v5364_v0  ;;  %1622 = vmatpush1.msra.mxu1 %v4925_v33  ;;  %v5384_v33 = vld [vmem:[#allocation6 + $0x5f0] sm:$0xff] }
 0x4eb   :  { %1499 = vmatpush1.msra.mxu0 %v5368_v60  ;;  %1623 = vmatprep.subr.mxu1 %v4929_v24  ;;  %v5388_v24 = vld [vmem:[#allocation6 + $0x5c8] sm:$0xff] }
 0x4ec   :  { %1500 = vmatprep.subr.mxu0 %v5372_v37  ;;  %1624 = vmatpush1.msra.mxu1 %v4933_v61  ;;  %v5392_v61 = vld [vmem:[#allocation6 + $0x5c0] sm:$0xff] }
 0x4ed   :  { %1501 = vmatpush1.msra.mxu0 %v5376_v57  ;;  %1625 = vmatprep.subr.mxu1 %v4937_v26  ;;  %v5396_v26 = vld [vmem:[#allocation6 + $0x598] sm:$0xff] }
 0x4ee   :  { %1502 = vmatprep.subr.mxu0 %v5380_v19  ;;  %1626 = vmatpush1.msra.mxu1 %v4941_v35  ;;  %v5400_v35 = vld [vmem:[#allocation6 + $0x590] sm:$0xff] }
 0x4ef   :  { %1503 = vmatpush2.msra.mxu0 %v5384_v33  ;;  %1627 = vmatprep.subr.mxu1 %v4945_v45  ;;  %v5404_v45 = vld [vmem:[#allocation6 + $0x568] sm:$0xff] }
 0x4f0   :  { %1504 = vmatprep.subr.mxu0 %v5388_v24  ;;  %1628 = vmatpush2.msra.mxu1 %v4949_v31  ;;  %v5408_v31 = vld [vmem:[#allocation6 + $0x560] sm:$0xff] }
 0x4f1   :  { %1505 = vmatpush2.msra.mxu0 %v5392_v61  ;;  %1629 = vmatprep.subr.mxu1 %v4953_v29  ;;  %v5412_v29 = vld [vmem:[#allocation6 + $0x538] sm:$0xff] }
 0x4f2   :  { %1506 = vmatprep.subr.mxu0 %v5396_v26  ;;  %1630 = vmatpush2.msra.mxu1 %v4957_v28  ;;  %v5416_v28 = vld [vmem:[#allocation6 + $0x530] sm:$0xff] }
 0x4f3   :  { %1507 = vmatpush2.msra.mxu0 %v5400_v35  ;;  %1631 = vmatprep.subr.mxu1 %v4961_v47  ;;  %v5420_v47 = vld [vmem:[#allocation6 + $0x508] sm:$0xff] }
 0x4f4   :  { %1508 = vmatprep.subr.mxu0 %v5404_v45  ;;  %1632 = vmatpush2.msra.mxu1 %v4965_v1  ;;  %7388 = vst [vmem:[#allocation109_spill] sm:$0xff] %v5420_v47  ;;  %v5424_v1 = vld [vmem:[#allocation6 + $0x500] sm:$0xff] }
 0x4f5   :  { %1509 = vmatpush2.msra.mxu0 %v5408_v31  ;;  %1633 = vmatprep.subr.mxu1 %v4969_v2  ;;  %7389 = vst [vmem:[#allocation67_spill] sm:$0xff] %v5424_v1  ;;  %v7390_v2 = vld [vmem:[#allocation55_spill] sm:$0xff] }
 0x4f6   :  { %1510 = vmatprep.subr.mxu0 %v5412_v29  ;;  %1634 = vmatpush2.msra.mxu1 %v4973_v3  ;;  %v7392_v3 = vld [vmem:[#allocation19_spill] sm:$0xff] }
 0x4f7   :  { %1511 = vmatpush2.msra.mxu0 %v5416_v28  ;;  %1635 = vmatprep.subr.mxu1 %v4977_v4  ;;  %v7394_v4 = vld [vmem:[#allocation57_spill] sm:$0xff] }
 0x4f8   :  { %1512 = vmatprep.subr.mxu0 %v5420_v47  ;;  %1636 = vmatpush2.msra.mxu1 %v4981_v30  ;;  %v7396_v30 = vld [vmem:[#allocation20_spill] sm:$0xff] }
 0x4f9   :  { %1513 = vmatpush2.msra.mxu0 %v5424_v1  ;;  %1637 = vmatprep.subr.mxu1 %v7390_v2  ;;  %v7408_v2 = vld [vmem:[#allocation25_spill] sm:$0xff] }
 0x4fa   :  { %1514 = vmatprep.subr.mxu0 %v5428_v36  ;;  %1638 = vmatpush2.msra.mxu1 %v7392_v3  ;;  %v5464_v3 = vld [vmem:[#allocation6 + $0x410] sm:$0xff] }
 0x4fb   :  { %1515 = vmatpush2.msra.mxu0 %v5432_v40  ;;  %1639 = vmatprep.subr.mxu1 %v7394_v4  ;;  %7409 = vst [vmem:[#allocation41_spill] sm:$0xff] %v5464_v3  ;;  %v7410_v4 = vld [vmem:[#allocation26_spill] sm:$0xff] }
 0x4fc   :  { %1516 = vmatprep.subr.mxu0 %v5436_v34  ;;  %1640 = vmatpush2.msra.mxu1 %v7396_v30  ;;  %v5468_v30 = vld [vmem:[#allocation6 + $0x3e8] sm:$0xff] }
 0x4fd   :  { %1517 = vmatpush2.msra.mxu0 %v5440_v17  ;;  %1641 = vmatprep.subr.mxu1 %v7398_v16  ;;  %7411 = vst [vmem:[#allocation43_spill] sm:$0xff] %v5468_v30  ;;  %v7412_v16 = vld [vmem:[#allocation27_spill] sm:$0xff] }
 0x4fe   :  { %1518 = vmatprep.subr.mxu0 %v5444_v13  ;;  %1642 = vmatpush2.msra.mxu1 %v7400_v50  ;;  %v5472_v50 = vld [vmem:[#allocation6 + $0x3e0] sm:$0xff] }
 0x4ff   :  { %1519 = vmatpush2.msra.mxu0 %v5448_v14  ;;  %1643 = vmatprep.subr.mxu1 %v7402_v43  ;;  %7413 = vst [vmem:[#allocation13_spill] sm:$0xff] %v5472_v50  ;;  %v7414_v43 = vld [vmem:[#allocation28_spill] sm:$0xff]  ;;  %v1325_v14 = vld [vmem:[#allocation3 + $0xd8] sm:$0xff] }
 0x500   :  { %1520 = vmatprep.subr.mxu0 %v5452_v32  ;;  %1644 = vmatpush2.msra.mxu1 %v7404_v8  ;;  %v5476_v8 = vld [vmem:[#allocation6 + $0x3b8] sm:$0xff] }
 0x501   :  { %1521 = vmatpush2.msra.mxu0 %v5456_v39  ;;  %1645 = vmatprep.subr.mxu1 %v7406_v7  ;;  %7415 = vst [vmem:[#allocation45_spill] sm:$0xff] %v5476_v8  ;;  %v7416_v7 = vld [vmem:[#allocation29_spill] sm:$0xff]  ;;  %v7445_v39 = vld [vmem:[#allocation46_spill] sm:$0xff] }
 0x502   :  { %1522 = vmatprep.subr.mxu0 %v5460_v5  ;;  %1646 = vmatpush2.msra.mxu1 %v7408_v2  ;;  %v5480_v2 = vld [vmem:[#allocation6 + $0x3b0] sm:$0xff]  ;;  %v7442_v5 = vld [vmem:[#allocation40_spill] sm:$0xff] }
 0x503   :  { %1523 = vmatpush2.msra.mxu0 %v5464_v3  ;;  %1647 = vmatprep.subr.mxu1 %v7410_v4  ;;  %7417 = vst [vmem:[#allocation14_spill] sm:$0xff] %v5480_v2  ;;  %v7418_v4 = vld [vmem:[#allocation30_spill] sm:$0xff]  ;;  %v7439_v3 = vld [vmem:[#allocation37_spill] sm:$0xff] }
 0x504   :  { %1524 = vmatprep.subr.mxu0 %v5468_v30  ;;  %1648 = vmatpush2.msra.mxu1 %v7412_v16  ;;  %v5484_v30 = vld [vmem:[#allocation6 + $0x388] sm:$0xff]  ;;  %v5487_v16 = vld [vmem:[#allocation6 + $0x390] sm:$0xff] }
 0x505   :  { %1525 = vmatpush2.msra.mxu0 %v5472_v50  ;;  %1649 = vmatprep.subr.mxu1 %v7414_v43  ;;  %7419 = vst [vmem:[#allocation47_spill] sm:$0xff] %v5484_v30  ;;  %7420 = vst [vmem:[#allocation15_spill] sm:$0xff] %v5487_v16  ;;  %v5490_v43 = vld [vmem:[#allocation6 + $0x380] sm:$0xff]  ;;  %v7437_v50 = vld [vmem:[#allocation35_spill] sm:$0xff] }
 0x506   :  { %1526 = vmatprep.subr.mxu0 %v5476_v8  ;;  %1650 = vmatpush2.msra.mxu1 %v7416_v7  ;;  %7421 = vst [vmem:[#allocation49_spill] sm:$0xff] %v5490_v43  ;;  %v5493_v8 = vld [vmem:[#allocation6 + $0x368] sm:$0xff]  ;;  %v5496_v7 = vld [vmem:[#allocation6 + $0x358] sm:$0xff] }
 0x507   :  { %1527 = vmatpush2.msra.mxu0 %v5480_v2  ;;  %1651 = vmatprep.subr.mxu1 %v7418_v4  ;;  %7422 = vst [vmem:[#allocation16_spill] sm:$0xff] %v5493_v8  ;;  %7423 = vst [vmem:[#allocation51_spill] sm:$0xff] %v5496_v7  ;;  %v5499_v4 = vld [vmem:[#allocation6 + $0x360] sm:$0xff] }
 0x508   :  { %1528 = vmatprep.subr.mxu0 %v5484_v30  ;;  %1652 = vmatpush2.msra.mxu1 %v5487_v16  ;;  %7424 = vst [vmem:[#allocation17_spill] sm:$0xff] %v5499_v4  ;;  %v5502_v30 = vld [vmem:[#allocation6 + $0x350] sm:$0xff]  ;;  %v5505_v16 = vld [vmem:[#allocation6 + $0x338] sm:$0xff]  ;;  %v5523_v2 = vld [vmem:[#allocation6 + $0x300] sm:$0xff] }
 0x509   :  { %1529 = vmatpush2.msra.mxu0 %v5490_v43  ;;  %1653 = vmatprep.subr.mxu1 %v5493_v8  ;;  %7425 = vst [vmem:[#allocation53_spill] sm:$0xff] %v5502_v30  ;;  %7426 = vst [vmem:[#allocation18_spill] sm:$0xff] %v5505_v16  ;;  %v5508_v43 = vld [vmem:[#allocation6 + $0x328] sm:$0xff]  ;;  %v5511_v8 = vld [vmem:[#allocation6 + $0x330] sm:$0xff] }
 0x50a   :  { %1530 = vmatprep.subr.mxu0 %v5496_v7  ;;  %1654 = vmatpush2.msra.mxu1 %v5499_v4  ;;  %7427 = vst [vmem:[#allocation55_spill] sm:$0xff] %v5508_v43  ;;  %7428 = vst [vmem:[#allocation19_spill] sm:$0xff] %v5511_v8  ;;  %v5514_v7 = vld [vmem:[#allocation6 + $0x320] sm:$0xff]  ;;  %v5517_v4 = vld [vmem:[#allocation6 + $0x308] sm:$0xff] }
 0x50b   :  { %1531 = vmatpush2.msra.mxu0 %v5502_v30  ;;  %1655 = vmatprep.subr.mxu1 %v5505_v16  ;;  %7429 = vst [vmem:[#allocation57_spill] sm:$0xff] %v5514_v7  ;;  %7430 = vst [vmem:[#allocation20_spill] sm:$0xff] %v5517_v4  ;;  %v7431_v30 = vld [vmem:[#allocation31_spill] sm:$0xff]  ;;  %v7432_v16 = vld [vmem:[#allocation32_spill] sm:$0xff] }
 0x50c   :  { %1532 = vmatprep.subr.mxu0 %v5508_v43  ;;  %1656 = vmatpush2.msra.mxu1 %v5511_v8  ;;  %7433 = vst [vmem:[#allocation59_spill] sm:$0xff] %v5523_v2  ;;  %v7434_v43 = vld [vmem:[#allocation33_spill] sm:$0xff]  ;;  %v5527_v8 = vld [vmem:[#allocation6 + $0x2f8] sm:$0xff] }
 0x50d   :  { %1533 = vmatpush2.msra.mxu0 %v5514_v7  ;;  %1657 = vmatprep.subr.mxu1 %v5517_v4  ;;  %7435 = vst [vmem:[#allocation21_spill] sm:$0xff] %v5527_v8  ;;  %v7436_v7 = vld [vmem:[#allocation34_spill] sm:$0xff]  ;;  %v7438_v4 = vld [vmem:[#allocation36_spill] sm:$0xff] }
 0x50e   :  { %1535 = vmatmul.mubr.f32.vlgmr.msra.gmra.mxu0 %v5246_v15  ;;  %1666 = vmatprep.subr.mxu0 %v7431_v30  ;;  %v7440_v30 = vld [vmem:[#allocation38_spill] sm:$0xff] }
 0x50f   :  { %1667 = vmatpush1.msra.mxu0 %v7432_v16  ;;  %1658 = vmatpush2.msra.mxu1 %v5523_v2  ;;  %v7441_v16 = vld [vmem:[#allocation39_spill] sm:$0xff]  ;;  %v7443_v2 = vld [vmem:[#allocation42_spill] sm:$0xff] }
 0x510   :  { %1668 = vmatprep.subr.mxu0 %v7434_v43  ;;  %1737 = vmatprep.subr.mxu1 %v5527_v8  ;;  %v7444_v43 = vld [vmem:[#allocation44_spill] sm:$0xff] }
 0x511   :  { %1669 = vmatpush1.msra.mxu0 %v7436_v7  ;;  %v7446_v8 = vld [vmem:[#allocation48_spill] sm:$0xff]  ;;  %v7447_v7 = vld [vmem:[#allocation50_spill] sm:$0xff] }
 0x512   :  { %1670 = vmatprep.subr.mxu0 %v7437_v50  ;;  %v7448_v50 = vld [vmem:[#allocation52_spill] sm:$0xff] }
 0x513   :  { %1671 = vmatpush1.msra.mxu0 %v7438_v4  ;;  %v7449_v4 = vld [vmem:[#allocation54_spill] sm:$0xff] }
 0x514   :  { %1672 = vmatprep.subr.mxu0 %v7439_v3  ;;  %v7450_v3 = vld [vmem:[#allocation56_spill] sm:$0xff] }
 0x515   :  { %1673 = vmatpush1.msra.mxu0 %v7440_v30  ;;  %v7451_v30 = vld [vmem:[#allocation58_spill] sm:$0xff] }
 0x516   :  { %1674 = vmatprep.subr.mxu0 %v7441_v16  ;;  %v7452_v16 = vld [vmem:[#allocation60_spill] sm:$0xff] }
 0x517   :  { %1675 = vmatpush1.msra.mxu0 %v7442_v5  ;;  %v7453_v5 = vld [vmem:[#allocation62_spill] sm:$0xff] }
 0x518   :  { %1676 = vmatprep.subr.mxu0 %v7443_v2  ;;  %v7454_v2 = vld [vmem:[#allocation64_spill] sm:$0xff] }
 0x519   :  { %1677 = vmatpush1.msra.mxu0 %v7444_v43  ;;  %v7455_v43 = vld [vmem:[#allocation66_spill] sm:$0xff] }
 0x51a   :  { %1678 = vmatprep.subr.mxu0 %v7445_v39  ;;  %v7456_v39 = vld [vmem:[#allocation68_spill] sm:$0xff] }
 0x51b   :  { %1679 = vmatpush1.msra.mxu0 %v7446_v8  ;;  %v7457_v8 = vld [vmem:[#allocation70_spill] sm:$0xff] }
 0x51c   :  { %1680 = vmatprep.subr.mxu0 %v7447_v7  ;;  %v7458_v7 = vld [vmem:[#allocation72_spill] sm:$0xff] }
 0x51d   :  { %1681 = vmatpush1.msra.mxu0 %v7448_v50  ;;  %v7459_v50 = vld [vmem:[#allocation75_spill] sm:$0xff] }
 0x51e   :  { %1682 = vmatprep.subr.mxu0 %v7449_v4  ;;  %v7460_v4 = vld [vmem:[#allocation77_spill] sm:$0xff] }
 0x51f   :  { %1683 = vmatpush1.msra.mxu0 %v7450_v3  ;;  %v7461_v3 = vld [vmem:[#allocation79_spill] sm:$0xff] }
 0x520   :  { %1684 = vmatprep.subr.mxu0 %v7451_v30  ;;  %v7462_v30 = vld [vmem:[#allocation81_spill] sm:$0xff] }
 0x521   :  { %1685 = vmatpush1.msra.mxu0 %v7452_v16  ;;  %v7463_v16 = vld [vmem:[#allocation83_spill] sm:$0xff] }
 0x522   :  { %1686 = vmatprep.subr.mxu0 %v7453_v5  ;;  %v7464_v5 = vld [vmem:[#allocation85_spill] sm:$0xff] }
 0x523   :  { %1687 = vmatpush1.msra.mxu0 %v7454_v2  ;;  %v7465_v2 = vld [vmem:[#allocation87_spill] sm:$0xff] }
 0x524   :  { %1688 = vmatprep.subr.mxu0 %v7455_v43  ;;  %v7466_v43 = vld [vmem:[#allocation89_spill] sm:$0xff] }
 0x525   :  { %1689 = vmatpush1.msra.mxu0 %v7456_v39  ;;  %v7467_v39 = vld [vmem:[#allocation91_spill] sm:$0xff] }
 0x526   :  { %1690 = vmatprep.subr.mxu0 %v7457_v8  ;;  %v7468_v8 = vld [vmem:[#allocation93_spill] sm:$0xff] }
 0x527   :  { %1691 = vmatpush1.msra.mxu0 %v7458_v7  ;;  %v7469_v7 = vld [vmem:[#allocation74_spill] sm:$0xff] }
 0x528   :  { %1692 = vmatprep.subr.mxu0 %v7459_v50  ;;  %v7470_v50 = vld [vmem:[#allocation76_spill] sm:$0xff] }
 0x529   :  { %1693 = vmatpush1.msra.mxu0 %v7460_v4  ;;  %v7471_v4 = vld [vmem:[#allocation78_spill] sm:$0xff] }
 0x52a   :  { %1694 = vmatprep.subr.mxu0 %v7461_v3  ;;  %v7472_v3 = vld [vmem:[#allocation80_spill] sm:$0xff] }
 0x52b   :  { %1695 = vmatpush1.msra.mxu0 %v7462_v30  ;;  %v7473_v30 = vld [vmem:[#allocation82_spill] sm:$0xff] }
 0x52c   :  { %1696 = vmatprep.subr.mxu0 %v7463_v16  ;;  %v7474_v16 = vld [vmem:[#allocation84_spill] sm:$0xff] }
 0x52d   :  { %1697 = vmatpush1.msra.mxu0 %v7464_v5  ;;  %v7475_v5 = vld [vmem:[#allocation86_spill] sm:$0xff] }
 0x52e   :  { %1698 = vmatprep.subr.mxu0 %v7465_v2  ;;  %v7476_v2 = vld [vmem:[#allocation88_spill] sm:$0xff] }
 0x52f   :  { %1699 = vmatpush2.msra.mxu0 %v7466_v43  ;;  %v7477_v43 = vld [vmem:[#allocation90_spill] sm:$0xff] }
 0x530   :  { %1700 = vmatprep.subr.mxu0 %v7467_v39  ;;  %v7478_v39 = vld [vmem:[#allocation92_spill] sm:$0xff] }
 0x531   :  { %1701 = vmatpush2.msra.mxu0 %v7468_v8  ;;  %v7479_v8 = vld [vmem:[#allocation94_spill] sm:$0xff] }
 0x532   :  { %1702 = vmatprep.subr.mxu0 %v7469_v7  ;;  %v7480_v7 = vld [vmem:[#allocation96_spill] sm:$0xff] }
 0x533   :  { %1703 = vmatpush2.msra.mxu0 %v7470_v50  ;;  %v7481_v50 = vld [vmem:[#allocation98_spill] sm:$0xff] }
 0x534   :  { %1704 = vmatprep.subr.mxu0 %v7471_v4  ;;  %v7482_v4 = vld [vmem:[#allocation100_spill] sm:$0xff] }
 0x535   :  { %1705 = vmatpush2.msra.mxu0 %v7472_v3  ;;  %v7483_v3 = vld [vmem:[#allocation102_spill] sm:$0xff] }
 0x536   :  { %1706 = vmatprep.subr.mxu0 %v7473_v30  ;;  %v7484_v30 = vld [vmem:[#allocation104_spill] sm:$0xff] }
 0x537   :  { %1707 = vmatpush2.msra.mxu0 %v7474_v16  ;;  %v7485_v16 = vld [vmem:[#allocation105_spill] sm:$0xff] }
 0x538   :  { %1708 = vmatprep.subr.mxu0 %v7475_v5  ;;  %v7486_v5 = vld [vmem:[#allocation106_spill] sm:$0xff] }
 0x539   :  { %1709 = vmatpush2.msra.mxu0 %v7476_v2  ;;  %v7487_v2 = vld [vmem:[#allocation61_spill] sm:$0xff] }
 0x53a   :  { %1710 = vmatprep.subr.mxu0 %v7477_v43  ;;  %v7488_v43 = vld [vmem:[#allocation107_spill] sm:$0xff] }
 0x53b   :  { %1711 = vmatpush2.msra.mxu0 %v7478_v39  ;;  %v7489_v39 = vld [vmem:[#allocation63_spill] sm:$0xff] }
 0x53c   :  { %1712 = vmatprep.subr.mxu0 %v7479_v8  ;;  %v7490_v8 = vld [vmem:[#allocation108_spill] sm:$0xff] }
 0x53d   :  { %1713 = vmatpush2.msra.mxu0 %v7480_v7  ;;  %v7491_v7 = vld [vmem:[#allocation65_spill] sm:$0xff] }
 0x53e   :  { %1714 = vmatprep.subr.mxu0 %v7481_v50  ;;  %v5586_v50 = vld [vmem:[#allocation6 + $0x370] sm:$0xff] }
 0x53f   :  { %1715 = vmatpush2.msra.mxu0 %v7482_v4  ;;  %7492 = vst [vmem:[#allocation22_spill] sm:$0xff] %v5586_v50  ;;  %v5589_v4 = vld [vmem:[#allocation6 + $0x348] sm:$0xff] }
 0x540   :  { %1716 = vmatprep.subr.mxu0 %v7483_v3  ;;  %7493 = vst [vmem:[#allocation23_spill] sm:$0xff] %v5589_v4  ;;  %v5592_v3 = vld [vmem:[#allocation6 + $0x340] sm:$0xff] }
 0x541   :  { %1717 = vmatpush2.msra.mxu0 %v7484_v30  ;;  %7494 = vst [vmem:[#allocation24_spill] sm:$0xff] %v5592_v3  ;;  %v5595_v30 = vld [vmem:[#allocation6 + $0x318] sm:$0xff] }
 0x542   :  { %1718 = vmatprep.subr.mxu0 %v7485_v16  ;;  %7495 = vst [vmem:[#allocation25_spill] sm:$0xff] %v5595_v30  ;;  %v5598_v16 = vld [vmem:[#allocation6 + $0x310] sm:$0xff] }
 0x543   :  { %1719 = vmatpush2.msra.mxu0 %v7486_v5  ;;  %7496 = vst [vmem:[#allocation26_spill] sm:$0xff] %v5598_v16  ;;  %v5601_v5 = vld [vmem:[#allocation6 + $0x2d8] sm:$0xff] }
 0x544   :  { %1720 = vmatprep.subr.mxu0 %v7487_v2  ;;  %7497 = vst [vmem:[#allocation27_spill] sm:$0xff] %v5601_v5 }
 0x545   :  { %1721 = vmatpush2.msra.mxu0 %v7488_v43  ;;  %v1322_v43 = vld [vmem:[#allocation3 + $0xc0] sm:$0xff] }
 0x546   :  { %1722 = vmatprep.subr.mxu0 %v7489_v39  ;;  %v1323_v39 = vld [vmem:[#allocation3 + $0xc8] sm:$0xff] }
 0x547   :  { %1723 = vmatpush2.msra.mxu0 %v7490_v8 }
 0x548   :  { %1724 = vmatprep.subr.mxu0 %v7491_v7 }
 0x549   :  { %1725 = vmatpush2.msra.mxu0 %v5586_v50 }
 0x54a   :  { %1726 = vmatprep.subr.mxu0 %v5589_v4 }
 0x54b   :  { %1727 = vmatpush2.msra.mxu0 %v5592_v3 }
 0x54c   :  { %1728 = vmatprep.subr.mxu0 %v5595_v30  ;;  %v1324_v30 = vld [vmem:[#allocation3 + $0xd0] sm:$0xff] }
 0x54d   :  { %1729 = vmatpush2.msra.mxu0 %v5598_v16 }
 0x54e   :  { %1862 = vmatprep.subr.mxu0 %v5601_v5 }
 0x58e   :  { %v1394_v2 = vpop.f32.mrf.mxu0  ;;  %v1465_v32 = vpop.f32.mrf.mxu1 }
 0x58f   :  { %v1541_v7 = vadd.f32 %v1394_v2, %v1322_v43  ;;  %v1555_v17 = vadd.f32 %v1465_v32, %v1324_v30  ;;  %v1326_v32 = vld [vmem:[#allocation3 + $0xe0] sm:$0xff] }
 0x590   :  { %v1396_v8 = vpop.f32.mrf.mxu0  ;;  %v1467_v13 = vpop.f32.mrf.mxu1 }
 0x591   :  { %v1542_v4 = vadd.f32 %v1396_v8, %v1323_v39  ;;  %v2425_v50 = vmul.f32 -1.442695, %v1541_v7  ;;  %v1556_v16 = vadd.f32 %v1467_v13, %v1325_v14  ;;  %v2427_v34 = vmul.f32 -1.442695, %v1555_v17  ;;  %v7498_v39 = vld [vmem:[#allocation12_spill] sm:$0xff] }
 0x593   :  { %v2426_v3 = vmul.f32 -1.442695, %v1542_v4  ;;  %2529 = vpow2.f32 %v2425_v50  ;;  %v2428_v40 = vmul.f32 -1.442695, %v1556_v16 }
 0x595   :  { %2531 = vpow2.f32 %v2426_v3 }
 0x596   :  { %2533 = vpow2.f32 %v2427_v34 }
 0x597   :  { %2535 = vpow2.f32 %v2428_v40 }
 0x5a0   :  { %v2530_v36 = vpop.eup %2529 }
 0x5a1   :  { %v1549_v1 = vadd.f32 1.0, %v2530_v36  ;;  %v1327_v36 = vld [vmem:[#allocation3 + $0xe8] sm:$0xff] }
 0x5a2   :  { %v2532_v5 = vpop.eup %2531 }
 0x5a3   :  { %v1550_v47 = vadd.f32 1.0, %v2532_v5  ;;  %2537 = vrcp.f32 %v1549_v1  ;;  %v2534_v2 = vpop.eup %2533 }
 0x5a4   :  { %v2536_v4 = vpop.eup %2535  ;;  %v1563_v50 = vadd.f32 1.0, %v2534_v2 }
 0x5a5   :  { %2539 = vrcp.f32 %v1550_v47  ;;  %v1564_v3 = vadd.f32 1.0, %v2536_v4 }
 0x5a6   :  { %2541 = vrcp.f32 %v1563_v50 }
 0x5a7   :  { %2543 = vrcp.f32 %v1564_v3 }
 0x5b0   :  { %v2538_v7 = vpop.eup %2537 }
 0x5b2   :  { %v2540_v14 = vpop.eup %2539 }
 0x5b3   :  { %v2542_v30 = vpop.eup %2541 }
 0x5b4   :  { %v2544_v16 = vpop.eup %2543  ;;  %v1577_v5 = vsub.f32 1.0, %v2542_v30 }
 0x5b5   :  { %v1578_v4 = vsub.f32 1.0, %v2544_v16 }
 0x5ce   :  { %v1536_v43 = vpop.f32.mrf.mxu0 }
 0x5cf   :  { %v1569_v8 = vadd.f32 %v1536_v43, %v7498_v39  ;;  %v1581_v39 = vmul.f32 %v2542_v30, %v5246_v15  ;;  %v5621_v15 = vld [vmem:[#allocation6 + $0x2d0] sm:$0xff]  ;;  %v7510_v30 = vld [vmem:[#allocation95_spill] sm:$0xff] }
 0x5d0   :  { %v1538_v13 = vpop.f32.mrf.mxu0 }
 0x5d1   :  { %v1571_v17 = vmul.f32 %v2538_v7, %v1569_v8  ;;  %v1570_v34 = vadd.f32 %v1538_v13, %v4004_v41  ;;  %v1582_v7 = vmul.f32 %v2544_v16, %v5248_v11  ;;  %v5625_v11 = vld [vmem:[#allocation6 + $0x2a8] sm:$0xff]  ;;  %v5805_v16 = vld [vmem:[#allocation6 + $0x480] sm:$0xff] }
 0x5d2   :  { %7511 = vst [vmem:[#allocation33_spill] sm:$0xff] %v5805_v16 }
 0x5d3   :  { %v1573_v40 = vadd.f32 %v1571_v17, %v1326_v32  ;;  %v1572_v1 = vmul.f32 %v2540_v14, %v1570_v34  ;;  %v5781_v32 = vld [vmem:[#allocation6 + $0x510] sm:$0xff]  ;;  %v5785_v17 = vld [vmem:[#allocation6 + $0x4e8] sm:$0xff]  ;;  %v5789_v34 = vld [vmem:[#allocation6 + $0x4e0] sm:$0xff] }
 0x5d4   :  { %7501 = vst [vmem:[#allocation28_spill] sm:$0xff] %v5785_v17  ;;  %7503 = vst [vmem:[#allocation29_spill] sm:$0xff] %v5789_v34  ;;  %v5793_v14 = vld [vmem:[#allocation6 + $0x4b8] sm:$0xff] }
 0x5d5   :  { %2545 = vtanh.f32 %v1573_v40  ;;  %v1574_v47 = vadd.f32 %v1572_v1, %v1327_v36  ;;  %7505 = vst [vmem:[#allocation30_spill] sm:$0xff] %v5793_v14  ;;  %v7506_v36 = vld [vmem:[#allocation71_spill] sm:$0xff]  ;;  %v5797_v40 = vld [vmem:[#allocation6 + $0x4b0] sm:$0xff]  ;;  %v7508_v1 = vld [vmem:[#allocation73_spill] sm:$0xff] }
 0x5d6   :  { %7507 = vst [vmem:[#allocation31_spill] sm:$0xff] %v5797_v40 }
 0x5d7   :  { %2547 = vtanh.f32 %v1574_v47  ;;  %v5801_v47 = vld [vmem:[#allocation6 + $0x488] sm:$0xff] }
 0x5d8   :  { %7509 = vst [vmem:[#allocation32_spill] sm:$0xff] %v5801_v47 }
 0x5e2   :  { %v2546_v2 = vpop.eup %2545 }
 0x5e3   :  { %v1579_v43 = vmul.f32 %v2546_v2, %v1577_v5  ;;  %v7512_v5 = vld [vmem:[#allocation97_spill] sm:$0xff]  ;;  %v5809_v2 = vld [vmem:[#allocation6 + $0x458] sm:$0xff] }
 0x5e4   :  { %v2548_v50 = vpop.eup %2547  ;;  %7513 = vst [vmem:[#allocation34_spill] sm:$0xff] %v5809_v2 }
 0x5e5   :  { %v1580_v8 = vmul.f32 %v2548_v50, %v1578_v4  ;;  %v5608_v13 = vadd.f32 %v1581_v39, %v1579_v43  ;;  %v5629_v39 = vld [vmem:[#allocation6 + $0x2a0] sm:$0xff]  ;;  %v7514_v4 = vld [vmem:[#allocation99_spill] sm:$0xff]  ;;  %v5813_v43 = vld [vmem:[#allocation6 + $0x450] sm:$0xff] }
 0x5e6   :  { %7515 = vst [vmem:[#allocation35_spill] sm:$0xff] %v5813_v43  ;;  %v7516_v50 = vld [vmem:[#allocation101_spill] sm:$0xff] }
 0x5e7   :  { %v5610_v3 = vadd.f32 %v1582_v7, %v1580_v8  ;;  %1586 = vst [vmem:[#allocation8 + $0x40] sm:$0xff] %v5608_v13  ;;  %v5817_v8 = vld [vmem:[#allocation6 + $0x428] sm:$0xff]  ;;  %v7518_v7 = vld [vmem:[#allocation103_spill] sm:$0xff] }
 0x5e8   :  { %7517 = vst [vmem:[#allocation36_spill] sm:$0xff] %v5817_v8 }
 0x5e9   :  { %1587 = vst [vmem:[#allocation8 + $0x48] sm:$0xff] %v5610_v3  ;;  %1659 = vmatprep.mubr.f32.mxu1 %v5610_v3  ;;  %1730 = vmatprep.mubr.f32.mxu0 %v5610_v3 }
 0x5ea   :  { %1660 = vmatmul.mubr.f32.vlgmr.msra.gmra.mxu1 %v5608_v13  ;;  %1731 = vmatmul.mubr.f32.vlgmr.msra.gmra.mxu0 %v5608_v13 }
 0x5eb   :  { %1738 = vmatpush1.msra.mxu1 %v5256_v42  ;;  %1801 = vmatprep.mubr.f32.mxu1 %v5610_v3  ;;  %v5633_v42 = vld [vmem:[#allocation6 + $0x278] sm:$0xff] }
 0x5ec   :  { %1739 = vmatprep.subr.mxu1 %v5260_v12  ;;  %1863 = vmatpush1.msra.mxu0 %v5621_v15  ;;  %v5637_v12 = vld [vmem:[#allocation6 + $0x270] sm:$0xff] }
 0x5ed   :  { %1740 = vmatpush1.msra.mxu1 %v5264_v6  ;;  %1864 = vmatprep.subr.mxu0 %v5625_v11  ;;  %v5641_v6 = vld [vmem:[#allocation6 + $0x248] sm:$0xff] }
 0x5ee   :  { %1741 = vmatprep.subr.mxu1 %v5268_v10  ;;  %1865 = vmatpush1.msra.mxu0 %v5629_v39  ;;  %v5645_v10 = vld [vmem:[#allocation6 + $0x240] sm:$0xff] }
 0x5ef   :  { %1742 = vmatpush1.msra.mxu1 %v5272_v9  ;;  %1866 = vmatprep.subr.mxu0 %v5633_v42  ;;  %v5649_v9 = vld [vmem:[#allocation6 + $0x218] sm:$0xff] }
 0x5f0   :  { %1743 = vmatprep.subr.mxu1 %v5276_v48  ;;  %1867 = vmatpush1.msra.mxu0 %v5637_v12  ;;  %v5653_v48 = vld [vmem:[#allocation6 + $0x210] sm:$0xff] }
 0x5f1   :  { %1744 = vmatpush1.msra.mxu1 %v5280_v25  ;;  %1868 = vmatprep.subr.mxu0 %v5641_v6  ;;  %v5657_v25 = vld [vmem:[#allocation6 + $0x1e8] sm:$0xff] }
 0x5f2   :  { %1745 = vmatprep.subr.mxu1 %v5284_v38  ;;  %1869 = vmatpush1.msra.mxu0 %v5645_v10  ;;  %v5661_v38 = vld [vmem:[#allocation6 + $0x1e0] sm:$0xff] }
 0x5f3   :  { %1746 = vmatpush1.msra.mxu1 %v5288_v27  ;;  %1870 = vmatprep.subr.mxu0 %v5649_v9  ;;  %v5665_v27 = vld [vmem:[#allocation6 + $0x1b8] sm:$0xff] }
 0x5f4   :  { %1747 = vmatprep.subr.mxu1 %v5292_v56  ;;  %1871 = vmatpush1.msra.mxu0 %v5653_v48  ;;  %v5669_v56 = vld [vmem:[#allocation6 + $0x1b0] sm:$0xff] }
 0x5f5   :  { %1748 = vmatpush1.msra.mxu1 %v5296_v55  ;;  %1872 = vmatprep.subr.mxu0 %v5657_v25  ;;  %v5673_v55 = vld [vmem:[#allocation6 + $0x188] sm:$0xff] }
 0x5f6   :  { %1749 = vmatprep.subr.mxu1 %v5300_v52  ;;  %1873 = vmatpush1.msra.mxu0 %v5661_v38  ;;  %v5677_v52 = vld [vmem:[#allocation6 + $0x180] sm:$0xff] }
 0x5f7   :  { %1750 = vmatpush1.msra.mxu1 %v5304_v46  ;;  %1874 = vmatprep.subr.mxu0 %v5665_v27  ;;  %v5681_v46 = vld [vmem:[#allocation6 + $0x158] sm:$0xff] }
 0x5f8   :  { %1751 = vmatprep.subr.mxu1 %v5308_v22  ;;  %1875 = vmatpush1.msra.mxu0 %v5669_v56  ;;  %v5685_v22 = vld [vmem:[#allocation6 + $0x150] sm:$0xff] }
 0x5f9   :  { %1752 = vmatpush1.msra.mxu1 %v5312_v20  ;;  %1876 = vmatprep.subr.mxu0 %v5673_v55  ;;  %v5689_v20 = vld [vmem:[#allocation6 + $0x128] sm:$0xff] }
 0x5fa   :  { %1753 = vmatprep.subr.mxu1 %v5316_v54  ;;  %1877 = vmatpush1.msra.mxu0 %v5677_v52  ;;  %v5693_v54 = vld [vmem:[#allocation6 + $0x120] sm:$0xff] }
 0x5fb   :  { %1754 = vmatpush1.msra.mxu1 %v5320_v23  ;;  %1878 = vmatprep.subr.mxu0 %v5681_v46  ;;  %v5697_v23 = vld [vmem:[#allocation6 + $0xf8] sm:$0xff] }
 0x5fc   :  { %1755 = vmatprep.subr.mxu1 %v5324_v59  ;;  %1879 = vmatpush1.msra.mxu0 %v5685_v22  ;;  %v5701_v59 = vld [vmem:[#allocation6 + $0xf0] sm:$0xff] }
 0x5fd   :  { %1756 = vmatpush1.msra.mxu1 %v5328_v63  ;;  %1880 = vmatprep.subr.mxu0 %v5689_v20  ;;  %v5705_v63 = vld [vmem:[#allocation6 + $0xc8] sm:$0xff] }
 0x5fe   :  { %1757 = vmatprep.subr.mxu1 %v5332_v53  ;;  %1881 = vmatpush1.msra.mxu0 %v5693_v54  ;;  %v5709_v53 = vld [vmem:[#allocation6 + $0xc0] sm:$0xff] }
 0x5ff   :  { %1758 = vmatpush1.msra.mxu1 %v5336_v51  ;;  %1882 = vmatprep.subr.mxu0 %v5697_v23  ;;  %v5713_v51 = vld [vmem:[#allocation6 + $0x98] sm:$0xff] }
 0x600   :  { %1759 = vmatprep.subr.mxu1 %v5340_v49  ;;  %1883 = vmatpush1.msra.mxu0 %v5701_v59  ;;  %v5717_v49 = vld [vmem:[#allocation6 + $0x90] sm:$0xff] }
 0x601   :  { %1760 = vmatpush1.msra.mxu1 %v5344_v44  ;;  %1884 = vmatprep.subr.mxu0 %v5705_v63  ;;  %v5721_v44 = vld [vmem:[#allocation6 + $0x68] sm:$0xff] }
 0x602   :  { %1761 = vmatprep.subr.mxu1 %v5348_v58  ;;  %1885 = vmatpush1.msra.mxu0 %v5709_v53  ;;  %v5725_v58 = vld [vmem:[#allocation6 + $0x60] sm:$0xff] }
 0x603   :  { %1762 = vmatpush1.msra.mxu1 %v5352_v21  ;;  %1886 = vmatprep.subr.mxu0 %v5713_v51  ;;  %v5729_v21 = vld [vmem:[#allocation6 + $0x38] sm:$0xff] }
 0x604   :  { %1763 = vmatprep.subr.mxu1 %v5356_v62  ;;  %1887 = vmatpush1.msra.mxu0 %v5717_v49  ;;  %v5733_v62 = vld [vmem:[#allocation6 + $0x30] sm:$0xff] }
 0x605   :  { %1764 = vmatpush1.msra.mxu1 %v5360_v18  ;;  %1888 = vmatprep.subr.mxu0 %v5721_v44  ;;  %v5737_v18 = vld [vmem:[#allocation6 + $0x8] sm:$0xff] }
 0x606   :  { %1765 = vmatprep.subr.mxu1 %v5364_v0  ;;  %1889 = vmatpush1.msra.mxu0 %v5725_v58  ;;  %v5741_v0 = vld [vmem:[#allocation6] sm:$0xff] }
 0x607   :  { %1766 = vmatpush1.msra.mxu1 %v5368_v60  ;;  %1890 = vmatprep.subr.mxu0 %v5729_v21  ;;  %v5745_v60 = vld [vmem:[#allocation6 + $0x5d8] sm:$0xff] }
 0x608   :  { %1767 = vmatprep.subr.mxu1 %v5372_v37  ;;  %1891 = vmatpush1.msra.mxu0 %v5733_v62  ;;  %v5749_v37 = vld [vmem:[#allocation6 + $0x5d0] sm:$0xff] }
 0x609   :  { %1768 = vmatpush1.msra.mxu1 %v5376_v57  ;;  %1892 = vmatprep.subr.mxu0 %v5737_v18  ;;  %v5753_v57 = vld [vmem:[#allocation6 + $0x5a8] sm:$0xff] }
 0x60a   :  { %1769 = vmatprep.subr.mxu1 %v5380_v19  ;;  %1893 = vmatpush1.msra.mxu0 %v5741_v0  ;;  %v5757_v19 = vld [vmem:[#allocation6 + $0x5a0] sm:$0xff] }
 0x60b   :  { %1770 = vmatpush2.msra.mxu1 %v5384_v33  ;;  %1894 = vmatprep.subr.mxu0 %v5745_v60  ;;  %v5761_v33 = vld [vmem:[#allocation6 + $0x578] sm:$0xff] }
 0x60c   :  { %1771 = vmatprep.subr.mxu1 %v5388_v24  ;;  %1895 = vmatpush2.msra.mxu0 %v5749_v37  ;;  %v5765_v24 = vld [vmem:[#allocation6 + $0x570] sm:$0xff] }
 0x60d   :  { %1772 = vmatpush2.msra.mxu1 %v5392_v61  ;;  %1896 = vmatprep.subr.mxu0 %v5753_v57  ;;  %v5769_v61 = vld [vmem:[#allocation6 + $0x548] sm:$0xff] }
 0x60e   :  { %1773 = vmatprep.subr.mxu1 %v5396_v26  ;;  %1897 = vmatpush2.msra.mxu0 %v5757_v19  ;;  %v5773_v26 = vld [vmem:[#allocation6 + $0x540] sm:$0xff] }
 0x60f   :  { %1774 = vmatpush2.msra.mxu1 %v5400_v35  ;;  %1898 = vmatprep.subr.mxu0 %v5761_v33  ;;  %v5777_v35 = vld [vmem:[#allocation6 + $0x518] sm:$0xff] }
 0x610   :  { %1775 = vmatprep.subr.mxu1 %v5404_v45  ;;  %1899 = vmatpush2.msra.mxu0 %v5765_v24  ;;  %v7499_v45 = vld [vmem:[#allocation109_spill] sm:$0xff] }
 0x611   :  { %1776 = vmatpush2.msra.mxu1 %v5408_v31  ;;  %1900 = vmatprep.subr.mxu0 %v5769_v61  ;;  %v7500_v31 = vld [vmem:[#allocation67_spill] sm:$0xff] }
 0x612   :  { %1777 = vmatprep.subr.mxu1 %v5412_v29  ;;  %1901 = vmatpush2.msra.mxu0 %v5773_v26  ;;  %v7502_v29 = vld [vmem:[#allocation110_spill] sm:$0xff] }
 0x613   :  { %1778 = vmatpush2.msra.mxu1 %v5416_v28  ;;  %1902 = vmatprep.subr.mxu0 %v5777_v35  ;;  %v7504_v28 = vld [vmem:[#allocation69_spill] sm:$0xff] }
 0x614   :  { %1779 = vmatprep.subr.mxu1 %v7499_v45  ;;  %1903 = vmatpush2.msra.mxu0 %v5781_v32  ;;  %v5821_v45 = vld [vmem:[#allocation6 + $0x420] sm:$0xff] }
 0x615   :  { %1780 = vmatpush2.msra.mxu1 %v7500_v31  ;;  %1904 = vmatprep.subr.mxu0 %v5785_v17  ;;  %7519 = vst [vmem:[#allocation37_spill] sm:$0xff] %v5821_v45  ;;  %v7520_v31 = vld [vmem:[#allocation41_spill] sm:$0xff] }
 0x616   :  { %1781 = vmatprep.subr.mxu1 %v7502_v29  ;;  %1905 = vmatpush2.msra.mxu0 %v5789_v34  ;;  %v5825_v29 = vld [vmem:[#allocation6 + $0x3f8] sm:$0xff] }
 0x617   :  { %1782 = vmatpush2.msra.mxu1 %v7504_v28  ;;  %1906 = vmatprep.subr.mxu0 %v5793_v14  ;;  %7521 = vst [vmem:[#allocation38_spill] sm:$0xff] %v5825_v29  ;;  %v7522_v28 = vld [vmem:[#allocation43_spill] sm:$0xff] }
 0x618   :  { %1783 = vmatprep.subr.mxu1 %v7506_v36  ;;  %1907 = vmatpush2.msra.mxu0 %v5797_v40  ;;  %v5829_v36 = vld [vmem:[#allocation6 + $0x3f0] sm:$0xff] }
 0x619   :  { %1784 = vmatpush2.msra.mxu1 %v7508_v1  ;;  %1908 = vmatprep.subr.mxu0 %v5801_v47  ;;  %7523 = vst [vmem:[#allocation39_spill] sm:$0xff] %v5829_v36  ;;  %v7524_v1 = vld [vmem:[#allocation13_spill] sm:$0xff] }
 0x61a   :  { %1785 = vmatprep.subr.mxu1 %v7510_v30  ;;  %1909 = vmatpush2.msra.mxu0 %v5805_v16  ;;  %v5833_v30 = vld [vmem:[#allocation6 + $0x3c8] sm:$0xff] }
 0x61b   :  { %1786 = vmatpush2.msra.mxu1 %v7512_v5  ;;  %1910 = vmatprep.subr.mxu0 %v5809_v2  ;;  %7525 = vst [vmem:[#allocation40_spill] sm:$0xff] %v5833_v30  ;;  %v7526_v5 = vld [vmem:[#allocation45_spill] sm:$0xff] }
 0x61c   :  { %1787 = vmatprep.subr.mxu1 %v7514_v4  ;;  %1911 = vmatpush2.msra.mxu0 %v5813_v43  ;;  %v5837_v4 = vld [vmem:[#allocation6 + $0x3c0] sm:$0xff]  ;;  %v1592_v16 = vld [vmem:[#allocation3 + $0x108] sm:$0xff] }
 0x61d   :  { %1788 = vmatpush2.msra.mxu1 %v7516_v50  ;;  %1912 = vmatprep.subr.mxu0 %v5817_v8  ;;  %7527 = vst [vmem:[#allocation42_spill] sm:$0xff] %v5837_v4  ;;  %v7528_v50 = vld [vmem:[#allocation14_spill] sm:$0xff] }
 0x61e   :  { %1789 = vmatprep.subr.mxu1 %v7518_v7  ;;  %1913 = vmatpush2.msra.mxu0 %v5821_v45  ;;  %v5841_v7 = vld [vmem:[#allocation6 + $0x398] sm:$0xff] }
 0x61f   :  { %1790 = vmatpush2.msra.mxu1 %v7520_v31  ;;  %1914 = vmatprep.subr.mxu0 %v5825_v29  ;;  %7529 = vst [vmem:[#allocation44_spill] sm:$0xff] %v5841_v7  ;;  %v7530_v31 = vld [vmem:[#allocation47_spill] sm:$0xff]  ;;  %v7536_v29 = vld [vmem:[#allocation53_spill] sm:$0xff] }
 0x620   :  { %1791 = vmatprep.subr.mxu1 %v7522_v28  ;;  %1915 = vmatpush2.msra.mxu0 %v5829_v36  ;;  %v7531_v28 = vld [vmem:[#allocation15_spill] sm:$0xff]  ;;  %v7533_v36 = vld [vmem:[#allocation16_spill] sm:$0xff] }
 0x621   :  { %1792 = vmatpush2.msra.mxu1 %v7524_v1  ;;  %1916 = vmatprep.subr.mxu0 %v5833_v30  ;;  %v7532_v1 = vld [vmem:[#allocation49_spill] sm:$0xff]  ;;  %v7534_v30 = vld [vmem:[#allocation51_spill] sm:$0xff] }
 0x622   :  { %1793 = vmatprep.subr.mxu1 %v7526_v5  ;;  %1917 = vmatpush2.msra.mxu0 %v5837_v4  ;;  %v7535_v5 = vld [vmem:[#allocation17_spill] sm:$0xff]  ;;  %v7537_v4 = vld [vmem:[#allocation18_spill] sm:$0xff]  ;;  %v7539_v45 = vld [vmem:[#allocation19_spill] sm:$0xff] }
 0x623   :  { %1794 = vmatpush2.msra.mxu1 %v7528_v50  ;;  %1918 = vmatprep.subr.mxu0 %v5841_v7  ;;  %v7538_v50 = vld [vmem:[#allocation55_spill] sm:$0xff]  ;;  %v7540_v7 = vld [vmem:[#allocation57_spill] sm:$0xff] }
 0x624   :  { %1795 = vmatprep.subr.mxu1 %v7530_v31  ;;  %1919 = vmatpush2.msra.mxu0 %v7531_v28  ;;  %v7541_v31 = vld [vmem:[#allocation20_spill] sm:$0xff]  ;;  %v5857_v28 = vld [vmem:[#allocation6 + $0x2e8] sm:$0xff] }
 0x625   :  { %1796 = vmatpush2.msra.mxu1 %v7532_v1  ;;  %1920 = vmatprep.subr.mxu0 %v7533_v36  ;;  %7542 = vst [vmem:[#allocation46_spill] sm:$0xff] %v5857_v28  ;;  %v5860_v36 = vld [vmem:[#allocation6 + $0x2e0] sm:$0xff] }
 0x626   :  { %1797 = vmatprep.subr.mxu1 %v7534_v30  ;;  %1921 = vmatpush2.msra.mxu0 %v7535_v5  ;;  %7543 = vst [vmem:[#allocation48_spill] sm:$0xff] %v5860_v36  ;;  %v5864_v30 = vld [vmem:[#allocation6 + $0x2b8] sm:$0xff]  ;;  %v5874_v1 = vld [vmem:[#allocation6 + $0x280] sm:$0xff] }
 0x627   :  { %1798 = vmatpush2.msra.mxu1 %v7536_v29  ;;  %1922 = vmatprep.subr.mxu0 %v7537_v4  ;;  %v7544_v29 = vld [vmem:[#allocation59_spill] sm:$0xff]  ;;  %7545 = vst [vmem:[#allocation50_spill] sm:$0xff] %v5864_v30  ;;  %v5868_v4 = vld [vmem:[#allocation6 + $0x2b0] sm:$0xff]  ;;  %7549 = vst [vmem:[#allocation56_spill] sm:$0xff] %v5874_v1 }
 0x628   :  { %1799 = vmatprep.subr.mxu1 %v7538_v50  ;;  %1923 = vmatpush2.msra.mxu0 %v7539_v45  ;;  %v7546_v45 = vld [vmem:[#allocation21_spill] sm:$0xff]  ;;  %7547 = vst [vmem:[#allocation52_spill] sm:$0xff] %v5868_v4  ;;  %v5877_v5 = vld [vmem:[#allocation6 + $0x258] sm:$0xff]  ;;  %v5880_v50 = vld [vmem:[#allocation6 + $0x250] sm:$0xff] }
 0x629   :  { %1800 = vmatpush2.msra.mxu1 %v7540_v7  ;;  %1924 = vmatprep.subr.mxu0 %v7541_v31  ;;  %v5871_v7 = vld [vmem:[#allocation6 + $0x288] sm:$0xff]  ;;  %7550 = vst [vmem:[#allocation58_spill] sm:$0xff] %v5877_v5  ;;  %7551 = vst [vmem:[#allocation60_spill] sm:$0xff] %v5880_v50 }
 0x62a   :  { %1802 = vmatmul.mubr.f32.vlgmr.msra.gmra.mxu1 %v5608_v13  ;;  %1933 = vmatprep.subr.mxu1 %v5857_v28  ;;  %7548 = vst [vmem:[#allocation54_spill] sm:$0xff] %v5871_v7  ;;  %v5883_v31 = vld [vmem:[#allocation6 + $0x228] sm:$0xff]  ;;  %v1590_v28 = vld [vmem:[#allocation3 + $0xf8] sm:$0xff] }
 0x62b   :  { %1934 = vmatpush1.msra.mxu1 %v5860_v36  ;;  %1925 = vmatpush2.msra.mxu0 %v7544_v29  ;;  %7552 = vst [vmem:[#allocation62_spill] sm:$0xff] %v5883_v31  ;;  %v5886_v29 = vld [vmem:[#allocation6 + $0x220] sm:$0xff]  ;;  %v1589_v36 = vld [vmem:[#allocation3 + $0xf0] sm:$0xff] }
 0x62c   :  { %1935 = vmatprep.subr.mxu1 %v5864_v30  ;;  %2004 = vmatprep.subr.mxu0 %v7546_v45  ;;  %7553 = vst [vmem:[#allocation64_spill] sm:$0xff] %v5886_v29  ;;  %v5889_v45 = vld [vmem:[#allocation6 + $0x1f8] sm:$0xff] }
 0x62d   :  { %1936 = vmatpush1.msra.mxu1 %v5868_v4  ;;  %7554 = vst [vmem:[#allocation66_spill] sm:$0xff] %v5889_v45  ;;  %v7606_v4 = vld [vmem:[#allocation25_spill] sm:$0xff]  ;;  %v7608_v30 = vld [vmem:[#allocation27_spill] sm:$0xff] }
 0x62e   :  { %1937 = vmatprep.subr.mxu1 %v5871_v7  ;;  %v7604_v7 = vld [vmem:[#allocation23_spill] sm:$0xff] }
 0x62f   :  { %1938 = vmatpush1.msra.mxu1 %v5874_v1  ;;  %v5892_v1 = vld [vmem:[#allocation6 + $0x1f0] sm:$0xff] }
 0x630   :  { %1939 = vmatprep.subr.mxu1 %v5877_v5  ;;  %7555 = vst [vmem:[#allocation68_spill] sm:$0xff] %v5892_v1  ;;  %v5895_v5 = vld [vmem:[#allocation6 + $0x1c8] sm:$0xff] }
 0x631   :  { %1940 = vmatpush1.msra.mxu1 %v5880_v50  ;;  %7556 = vst [vmem:[#allocation70_spill] sm:$0xff] %v5895_v5  ;;  %v5898_v50 = vld [vmem:[#allocation6 + $0x1c0] sm:$0xff] }
 0x632   :  { %1941 = vmatprep.subr.mxu1 %v5883_v31  ;;  %7557 = vst [vmem:[#allocation72_spill] sm:$0xff] %v5898_v50  ;;  %v5901_v31 = vld [vmem:[#allocation6 + $0x198] sm:$0xff] }
 0x633   :  { %1942 = vmatpush1.msra.mxu1 %v5886_v29  ;;  %7558 = vst [vmem:[#allocation75_spill] sm:$0xff] %v5901_v31  ;;  %v5904_v29 = vld [vmem:[#allocation6 + $0x190] sm:$0xff] }
 0x634   :  { %1943 = vmatprep.subr.mxu1 %v5889_v45  ;;  %7559 = vst [vmem:[#allocation77_spill] sm:$0xff] %v5904_v29  ;;  %v5907_v45 = vld [vmem:[#allocation6 + $0x168] sm:$0xff] }
 0x635   :  { %1944 = vmatpush1.msra.mxu1 %v5892_v1  ;;  %7560 = vst [vmem:[#allocation79_spill] sm:$0xff] %v5907_v45  ;;  %v5910_v1 = vld [vmem:[#allocation6 + $0x160] sm:$0xff] }
 0x636   :  { %1945 = vmatprep.subr.mxu1 %v5895_v5  ;;  %7561 = vst [vmem:[#allocation81_spill] sm:$0xff] %v5910_v1  ;;  %v5913_v5 = vld [vmem:[#allocation6 + $0x138] sm:$0xff] }
 0x637   :  { %1946 = vmatpush1.msra.mxu1 %v5898_v50  ;;  %7562 = vst [vmem:[#allocation83_spill] sm:$0xff] %v5913_v5  ;;  %v5916_v50 = vld [vmem:[#allocation6 + $0x130] sm:$0xff] }
 0x638   :  { %1947 = vmatprep.subr.mxu1 %v5901_v31  ;;  %7563 = vst [vmem:[#allocation85_spill] sm:$0xff] %v5916_v50  ;;  %v5919_v31 = vld [vmem:[#allocation6 + $0x108] sm:$0xff] }
 0x639   :  { %1948 = vmatpush1.msra.mxu1 %v5904_v29  ;;  %7564 = vst [vmem:[#allocation87_spill] sm:$0xff] %v5919_v31  ;;  %v5922_v29 = vld [vmem:[#allocation6 + $0x100] sm:$0xff] }
 0x63a   :  { %1949 = vmatprep.subr.mxu1 %v5907_v45  ;;  %7565 = vst [vmem:[#allocation89_spill] sm:$0xff] %v5922_v29  ;;  %v5925_v45 = vld [vmem:[#allocation6 + $0xd8] sm:$0xff] }
 0x63b   :  { %1950 = vmatpush1.msra.mxu1 %v5910_v1  ;;  %7566 = vst [vmem:[#allocation91_spill] sm:$0xff] %v5925_v45  ;;  %v5928_v1 = vld [vmem:[#allocation6 + $0xd0] sm:$0xff] }
 0x63c   :  { %1951 = vmatprep.subr.mxu1 %v5913_v5  ;;  %7567 = vst [vmem:[#allocation93_spill] sm:$0xff] %v5928_v1  ;;  %v5931_v5 = vld [vmem:[#allocation6 + $0xa8] sm:$0xff] }
 0x63d   :  { %1952 = vmatpush1.msra.mxu1 %v5916_v50  ;;  %7568 = vst [vmem:[#allocation74_spill] sm:$0xff] %v5931_v5  ;;  %v5934_v50 = vld [vmem:[#allocation6 + $0xa0] sm:$0xff] }
 0x63e   :  { %1953 = vmatprep.subr.mxu1 %v5919_v31  ;;  %7569 = vst [vmem:[#allocation76_spill] sm:$0xff] %v5934_v50  ;;  %v5937_v31 = vld [vmem:[#allocation6 + $0x78] sm:$0xff] }
 0x63f   :  { %1954 = vmatpush1.msra.mxu1 %v5922_v29  ;;  %7570 = vst [vmem:[#allocation78_spill] sm:$0xff] %v5937_v31  ;;  %v5940_v29 = vld [vmem:[#allocation6 + $0x70] sm:$0xff] }
 0x640   :  { %1955 = vmatprep.subr.mxu1 %v5925_v45  ;;  %7571 = vst [vmem:[#allocation80_spill] sm:$0xff] %v5940_v29  ;;  %v5943_v45 = vld [vmem:[#allocation6 + $0x48] sm:$0xff] }
 0x641   :  { %1956 = vmatpush1.msra.mxu1 %v5928_v1  ;;  %7572 = vst [vmem:[#allocation82_spill] sm:$0xff] %v5943_v45  ;;  %v5946_v1 = vld [vmem:[#allocation6 + $0x40] sm:$0xff] }
 0x642   :  { %1957 = vmatprep.subr.mxu1 %v5931_v5  ;;  %7573 = vst [vmem:[#allocation84_spill] sm:$0xff] %v5946_v1  ;;  %v5949_v5 = vld [vmem:[#allocation6 + $0x18] sm:$0xff] }
 0x643   :  { %1958 = vmatpush1.msra.mxu1 %v5934_v50  ;;  %7574 = vst [vmem:[#allocation86_spill] sm:$0xff] %v5949_v5  ;;  %v5952_v50 = vld [vmem:[#allocation6 + $0x10] sm:$0xff] }
 0x644   :  { %1959 = vmatprep.subr.mxu1 %v5937_v31  ;;  %7575 = vst [vmem:[#allocation88_spill] sm:$0xff] %v5952_v50  ;;  %v5955_v31 = vld [vmem:[#allocation6 + $0x5e8] sm:$0xff] }
 0x645   :  { %1960 = vmatpush1.msra.mxu1 %v5940_v29  ;;  %7576 = vst [vmem:[#allocation90_spill] sm:$0xff] %v5955_v31  ;;  %v5958_v29 = vld [vmem:[#allocation6 + $0x5e0] sm:$0xff] }
 0x646   :  { %1961 = vmatprep.subr.mxu1 %v5943_v45  ;;  %7577 = vst [vmem:[#allocation92_spill] sm:$0xff] %v5958_v29  ;;  %v5961_v45 = vld [vmem:[#allocation6 + $0x5b8] sm:$0xff] }
 0x647   :  { %1962 = vmatpush1.msra.mxu1 %v5946_v1  ;;  %7578 = vst [vmem:[#allocation94_spill] sm:$0xff] %v5961_v45  ;;  %v5964_v1 = vld [vmem:[#allocation6 + $0x5b0] sm:$0xff] }
 0x648   :  { %1963 = vmatprep.subr.mxu1 %v5949_v5  ;;  %7579 = vst [vmem:[#allocation96_spill] sm:$0xff] %v5964_v1  ;;  %v5967_v5 = vld [vmem:[#allocation6 + $0x588] sm:$0xff] }
 0x649   :  { %1964 = vmatpush1.msra.mxu1 %v5952_v50  ;;  %7580 = vst [vmem:[#allocation98_spill] sm:$0xff] %v5967_v5  ;;  %v5970_v50 = vld [vmem:[#allocation6 + $0x580] sm:$0xff] }
 0x64a   :  { %1965 = vmatprep.subr.mxu1 %v5955_v31  ;;  %7581 = vst [vmem:[#allocation100_spill] sm:$0xff] %v5970_v50  ;;  %v5973_v31 = vld [vmem:[#allocation6 + $0x558] sm:$0xff] }
 0x64b   :  { %1966 = vmatpush2.msra.mxu1 %v5958_v29  ;;  %7582 = vst [vmem:[#allocation102_spill] sm:$0xff] %v5973_v31  ;;  %v5976_v29 = vld [vmem:[#allocation6 + $0x550] sm:$0xff] }
 0x64c   :  { %1967 = vmatprep.subr.mxu1 %v5961_v45  ;;  %7583 = vst [vmem:[#allocation104_spill] sm:$0xff] %v5976_v29  ;;  %v5979_v45 = vld [vmem:[#allocation6 + $0x528] sm:$0xff] }
 0x64d   :  { %1968 = vmatpush2.msra.mxu1 %v5964_v1  ;;  %7584 = vst [vmem:[#allocation105_spill] sm:$0xff] %v5979_v45  ;;  %v5982_v1 = vld [vmem:[#allocation6 + $0x520] sm:$0xff] }
 0x64e   :  { %1969 = vmatprep.subr.mxu1 %v5967_v5  ;;  %7585 = vst [vmem:[#allocation106_spill] sm:$0xff] %v5982_v1  ;;  %v5985_v5 = vld [vmem:[#allocation6 + $0x4f8] sm:$0xff] }
 0x64f   :  { %1970 = vmatpush2.msra.mxu1 %v5970_v50  ;;  %7586 = vst [vmem:[#allocation61_spill] sm:$0xff] %v5985_v5  ;;  %v5988_v50 = vld [vmem:[#allocation6 + $0x4f0] sm:$0xff] }
 0x650   :  { %1971 = vmatprep.subr.mxu1 %v5973_v31  ;;  %7587 = vst [vmem:[#allocation107_spill] sm:$0xff] %v5988_v50  ;;  %v5991_v31 = vld [vmem:[#allocation6 + $0x4c8] sm:$0xff] }
 0x651   :  { %1972 = vmatpush2.msra.mxu1 %v5976_v29  ;;  %7588 = vst [vmem:[#allocation63_spill] sm:$0xff] %v5991_v31  ;;  %v5994_v29 = vld [vmem:[#allocation6 + $0x4c0] sm:$0xff] }
 0x652   :  { %1973 = vmatprep.subr.mxu1 %v5979_v45  ;;  %7589 = vst [vmem:[#allocation108_spill] sm:$0xff] %v5994_v29  ;;  %v5997_v45 = vld [vmem:[#allocation6 + $0x498] sm:$0xff] }
 0x653   :  { %1974 = vmatpush2.msra.mxu1 %v5982_v1  ;;  %7590 = vst [vmem:[#allocation65_spill] sm:$0xff] %v5997_v45  ;;  %v6000_v1 = vld [vmem:[#allocation6 + $0x490] sm:$0xff] }
 0x654   :  { %1975 = vmatprep.subr.mxu1 %v5985_v5  ;;  %7591 = vst [vmem:[#allocation109_spill] sm:$0xff] %v6000_v1  ;;  %v6003_v5 = vld [vmem:[#allocation6 + $0x468] sm:$0xff] }
 0x655   :  { %1976 = vmatpush2.msra.mxu1 %v5988_v50  ;;  %7592 = vst [vmem:[#allocation67_spill] sm:$0xff] %v6003_v5  ;;  %v6006_v50 = vld [vmem:[#allocation6 + $0x460] sm:$0xff] }
 0x656   :  { %1977 = vmatprep.subr.mxu1 %v5991_v31  ;;  %7593 = vst [vmem:[#allocation110_spill] sm:$0xff] %v6006_v50  ;;  %v6009_v31 = vld [vmem:[#allocation6 + $0x438] sm:$0xff] }
 0x657   :  { %1978 = vmatpush2.msra.mxu1 %v5994_v29  ;;  %7594 = vst [vmem:[#allocation69_spill] sm:$0xff] %v6009_v31  ;;  %v6012_v29 = vld [vmem:[#allocation6 + $0x430] sm:$0xff] }
 0x658   :  { %1979 = vmatprep.subr.mxu1 %v5997_v45  ;;  %7595 = vst [vmem:[#allocation71_spill] sm:$0xff] %v6012_v29  ;;  %v6015_v45 = vld [vmem:[#allocation6 + $0x408] sm:$0xff] }
 0x659   :  { %1980 = vmatpush2.msra.mxu1 %v6000_v1  ;;  %7596 = vst [vmem:[#allocation73_spill] sm:$0xff] %v6015_v45  ;;  %v6018_v1 = vld [vmem:[#allocation6 + $0x400] sm:$0xff] }
 0x65a   :  { %1981 = vmatprep.subr.mxu1 %v6003_v5  ;;  %7597 = vst [vmem:[#allocation95_spill] sm:$0xff] %v6018_v1  ;;  %v6021_v5 = vld [vmem:[#allocation6 + $0x3d8] sm:$0xff] }
 0x65b   :  { %1982 = vmatpush2.msra.mxu1 %v6006_v50  ;;  %7598 = vst [vmem:[#allocation97_spill] sm:$0xff] %v6021_v5  ;;  %v6024_v50 = vld [vmem:[#allocation6 + $0x3d0] sm:$0xff] }
 0x65c   :  { %1983 = vmatprep.subr.mxu1 %v6009_v31  ;;  %7599 = vst [vmem:[#allocation99_spill] sm:$0xff] %v6024_v50  ;;  %v6027_v31 = vld [vmem:[#allocation6 + $0x3a8] sm:$0xff] }
 0x65d   :  { %1984 = vmatpush2.msra.mxu1 %v6012_v29  ;;  %7600 = vst [vmem:[#allocation101_spill] sm:$0xff] %v6027_v31  ;;  %v6030_v29 = vld [vmem:[#allocation6 + $0x3a0] sm:$0xff] }
 0x65e   :  { %1985 = vmatprep.subr.mxu1 %v6015_v45  ;;  %7601 = vst [vmem:[#allocation103_spill] sm:$0xff] %v6030_v29  ;;  %v6033_v45 = vld [vmem:[#allocation6 + $0x378] sm:$0xff] }
 0x65f   :  { %1986 = vmatpush2.msra.mxu1 %v6018_v1  ;;  %7602 = vst [vmem:[#allocation41_spill] sm:$0xff] %v6033_v45  ;;  %v7603_v1 = vld [vmem:[#allocation22_spill] sm:$0xff] }
 0x660   :  { %1987 = vmatprep.subr.mxu1 %v6021_v5  ;;  %v7605_v5 = vld [vmem:[#allocation24_spill] sm:$0xff] }
 0x661   :  { %1988 = vmatpush2.msra.mxu1 %v6024_v50  ;;  %v7607_v50 = vld [vmem:[#allocation26_spill] sm:$0xff] }
 0x662   :  { %1989 = vmatprep.subr.mxu1 %v6027_v31 }
 0x663   :  { %1990 = vmatpush2.msra.mxu1 %v6030_v29 }
 0x664   :  { %1991 = vmatprep.subr.mxu1 %v6033_v45 }
 0x665   :  { %1992 = vmatpush2.msra.mxu1 %v7603_v1 }
 0x666   :  { %1993 = vmatprep.subr.mxu1 %v7604_v7  ;;  %v1591_v7 = vld [vmem:[#allocation3 + $0x100] sm:$0xff] }
 0x667   :  { %1994 = vmatpush2.msra.mxu1 %v7605_v5 }
 0x668   :  { %1995 = vmatprep.subr.mxu1 %v7606_v4 }
 0x669   :  { %1996 = vmatpush2.msra.mxu1 %v7607_v50 }
 0x66a   :  { %2129 = vmatprep.subr.mxu1 %v7608_v30 }
 0x6aa   :  { %v1661_v31 = vpop.f32.mrf.mxu1  ;;  %v1732_v1 = vpop.f32.mrf.mxu0 }
 0x6ab   :  { %v1808_v8 = vadd.f32 %v1661_v31, %v1589_v36  ;;  %v1822_v47 = vadd.f32 %v1732_v1, %v1591_v7  ;;  %v7609_v31 = vld [vmem:[#allocation12_spill] sm:$0xff]  ;;  %v1593_v1 = vld [vmem:[#allocation3 + $0x110] sm:$0xff] }
 0x6ac   :  { %v1663_v29 = vpop.f32.mrf.mxu1  ;;  %v1734_v5 = vpop.f32.mrf.mxu0 }
 0x6ad   :  { %v1809_v43 = vadd.f32 %v1663_v29, %v1590_v28  ;;  %v2429_v2 = vmul.f32 -1.442695, %v1808_v8  ;;  %v1823_v4 = vadd.f32 %v1734_v5, %v1592_v16  ;;  %v2431_v40 = vmul.f32 -1.442695, %v1822_v47 }
 0x6af   :  { %v2430_v45 = vmul.f32 -1.442695, %v1809_v43  ;;  %2549 = vpow2.f32 %v2429_v2  ;;  %v2432_v50 = vmul.f32 -1.442695, %v1823_v4 }
 0x6b1   :  { %2551 = vpow2.f32 %v2430_v45 }
 0x6b2   :  { %2553 = vpow2.f32 %v2431_v40 }
 0x6b3   :  { %2555 = vpow2.f32 %v2432_v50 }
 0x6bc   :  { %v2550_v14 = vpop.eup %2549 }
 0x6bd   :  { %v1816_v34 = vadd.f32 1.0, %v2550_v14  ;;  %v1594_v14 = vld [vmem:[#allocation3 + $0x118] sm:$0xff] }
 0x6be   :  { %v2552_v30 = vpop.eup %2551 }
 0x6bf   :  { %v1817_v17 = vadd.f32 1.0, %v2552_v30  ;;  %2557 = vrcp.f32 %v1816_v34  ;;  %v2554_v8 = vpop.eup %2553 }
 0x6c0   :  { %v2556_v43 = vpop.eup %2555  ;;  %v1830_v2 = vadd.f32 1.0, %v2554_v8 }
 0x6c1   :  { %2559 = vrcp.f32 %v1817_v17  ;;  %v1831_v36 = vadd.f32 1.0, %v2556_v43 }
 0x6c2   :  { %2561 = vrcp.f32 %v1830_v2 }
 0x6c3   :  { %2563 = vrcp.f32 %v1831_v36 }
 0x6cc   :  { %v2558_v45 = vpop.eup %2557 }
 0x6ce   :  { %v2560_v7 = vpop.eup %2559 }
 0x6cf   :  { %v2562_v4 = vpop.eup %2561 }
 0x6d0   :  { %v2564_v50 = vpop.eup %2563  ;;  %v1844_v30 = vsub.f32 1.0, %v2562_v4 }
 0x6d1   :  { %v1845_v43 = vsub.f32 1.0, %v2564_v50 }
 0x6ea   :  { %v1803_v28 = vpop.f32.mrf.mxu1 }
 0x6eb   :  { %v1836_v29 = vadd.f32 %v1803_v28, %v7609_v31  ;;  %v1848_v31 = vmul.f32 %v2562_v4, %v5608_v13  ;;  %v6056_v13 = vld [vmem:[#allocation6 + $0x2f0] sm:$0xff]  ;;  %v6244_v4 = vld [vmem:[#allocation6 + $0x478] sm:$0xff] }
 0x6ec   :  { %v1805_v16 = vpop.f32.mrf.mxu1  ;;  %7621 = vst [vmem:[#allocation49_spill] sm:$0xff] %v6244_v4 }
 0x6ed   :  { %v1838_v47 = vmul.f32 %v2558_v45, %v1836_v29  ;;  %v1837_v40 = vadd.f32 %v1805_v16, %v4004_v41  ;;  %v1849_v45 = vmul.f32 %v2564_v50, %v5610_v3  ;;  %v6060_v3 = vld [vmem:[#allocation6 + $0x2c8] sm:$0xff] }
 0x6ee   :  { %v7622_v50 = vld [vmem:[#allocation33_spill] sm:$0xff] }
 0x6ef   :  { %v1840_v5 = vadd.f32 %v1838_v47, %v1593_v1  ;;  %v1839_v34 = vmul.f32 %v2560_v7, %v1837_v40  ;;  %v6068_v1 = vld [vmem:[#allocation6 + $0x298] sm:$0xff]  ;;  %v6072_v47 = vld [vmem:[#allocation6 + $0x290] sm:$0xff]  ;;  %v6076_v40 = vld [vmem:[#allocation6 + $0x268] sm:$0xff] }
 0x6f0   :  { %v6228_v7 = vld [vmem:[#allocation6 + $0x4d8] sm:$0xff] }
 0x6f1   :  { %2565 = vtanh.f32 %v1840_v5  ;;  %v1841_v17 = vadd.f32 %v1839_v34, %v1594_v14  ;;  %7613 = vst [vmem:[#allocation45_spill] sm:$0xff] %v6228_v7  ;;  %v6232_v14 = vld [vmem:[#allocation6 + $0x4d0] sm:$0xff]  ;;  %v6236_v5 = vld [vmem:[#allocation6 + $0x4a8] sm:$0xff]  ;;  %v6240_v34 = vld [vmem:[#allocation6 + $0x4a0] sm:$0xff] }
 0x6f2   :  { %7615 = vst [vmem:[#allocation14_spill] sm:$0xff] %v6232_v14  ;;  %7617 = vst [vmem:[#allocation47_spill] sm:$0xff] %v6236_v5 }
 0x6f3   :  { %2567 = vtanh.f32 %v1841_v17  ;;  %7619 = vst [vmem:[#allocation15_spill] sm:$0xff] %v6240_v34  ;;  %v7620_v17 = vld [vmem:[#allocation32_spill] sm:$0xff] }
 0x6fe   :  { %v2566_v8 = vpop.eup %2565 }
 0x6ff   :  { %v1846_v28 = vmul.f32 %v2566_v8, %v1844_v30  ;;  %v6248_v30 = vld [vmem:[#allocation6 + $0x470] sm:$0xff] }
 0x700   :  { %v2568_v2 = vpop.eup %2567  ;;  %7623 = vst [vmem:[#allocation16_spill] sm:$0xff] %v6248_v30  ;;  %v7624_v8 = vld [vmem:[#allocation34_spill] sm:$0xff] }
 0x701   :  { %v1847_v29 = vmul.f32 %v2568_v2, %v1845_v43  ;;  %v6046_v16 = vadd.f32 %v1848_v31, %v1846_v28  ;;  %v6064_v31 = vld [vmem:[#allocation6 + $0x2c0] sm:$0xff]  ;;  %v6252_v43 = vld [vmem:[#allocation6 + $0x448] sm:$0xff]  ;;  %v7626_v28 = vld [vmem:[#allocation35_spill] sm:$0xff] }
 0x702   :  { %7625 = vst [vmem:[#allocation51_spill] sm:$0xff] %v6252_v43  ;;  %v6256_v2 = vld [vmem:[#allocation6 + $0x440] sm:$0xff] }
 0x703   :  { %v6048_v36 = vadd.f32 %v1849_v45, %v1847_v29  ;;  %1853 = vst [vmem:[#allocation8 + $0x50] sm:$0xff] %v6046_v16  ;;  %7627 = vst [vmem:[#allocation17_spill] sm:$0xff] %v6256_v2  ;;  %v7628_v29 = vld [vmem:[#allocation36_spill] sm:$0xff]  ;;  %v6260_v45 = vld [vmem:[#allocation6 + $0x418] sm:$0xff] }
 0x704   :  { %7629 = vst [vmem:[#allocation53_spill] sm:$0xff] %v6260_v45 }
 0x705   :  { %1854 = vst [vmem:[#allocation8 + $0x58] sm:$0xff] %v6048_v36  ;;  %1926 = vmatprep.mubr.f32.mxu0 %v6048_v36  ;;  %1997 = vmatprep.mubr.f32.mxu1 %v6048_v36 }
 0x706   :  { %1927 = vmatmul.mubr.f32.vlgmr.msra.gmra.mxu0 %v6046_v16  ;;  %1998 = vmatmul.mubr.f32.vlgmr.msra.gmra.mxu1 %v6046_v16 }
 0x707   :  { %2005 = vmatpush1.msra.mxu0 %v6056_v13  ;;  %2068 = vmatprep.mubr.f32.mxu0 %v6048_v36 }
 0x708   :  { %2006 = vmatprep.subr.mxu0 %v6060_v3  ;;  %2130 = vmatpush1.msra.mxu1 %v5621_v15  ;;  %v6080_v15 = vld [vmem:[#allocation6 + $0x260] sm:$0xff] }
 0x709   :  { %2007 = vmatpush1.msra.mxu0 %v6064_v31  ;;  %2131 = vmatprep.subr.mxu1 %v5625_v11  ;;  %v6084_v11 = vld [vmem:[#allocation6 + $0x238] sm:$0xff] }
 0x70a   :  { %2008 = vmatprep.subr.mxu0 %v6068_v1  ;;  %2132 = vmatpush1.msra.mxu1 %v5629_v39  ;;  %v6088_v39 = vld [vmem:[#allocation6 + $0x230] sm:$0xff] }
 0x70b   :  { %2009 = vmatpush1.msra.mxu0 %v6072_v47  ;;  %2133 = vmatprep.subr.mxu1 %v5633_v42  ;;  %v6092_v42 = vld [vmem:[#allocation6 + $0x208] sm:$0xff] }
 0x70c   :  { %2010 = vmatprep.subr.mxu0 %v6076_v40  ;;  %2134 = vmatpush1.msra.mxu1 %v5637_v12  ;;  %v6096_v12 = vld [vmem:[#allocation6 + $0x200] sm:$0xff] }
 0x70d   :  { %2011 = vmatpush1.msra.mxu0 %v6080_v15  ;;  %2135 = vmatprep.subr.mxu1 %v5641_v6  ;;  %v6100_v6 = vld [vmem:[#allocation6 + $0x1d8] sm:$0xff] }
 0x70e   :  { %2012 = vmatprep.subr.mxu0 %v6084_v11  ;;  %2136 = vmatpush1.msra.mxu1 %v5645_v10  ;;  %v6104_v10 = vld [vmem:[#allocation6 + $0x1d0] sm:$0xff] }
 0x70f   :  { %2013 = vmatpush1.msra.mxu0 %v6088_v39  ;;  %2137 = vmatprep.subr.mxu1 %v5649_v9  ;;  %v6108_v9 = vld [vmem:[#allocation6 + $0x1a8] sm:$0xff] }
 0x710   :  { %2014 = vmatprep.subr.mxu0 %v6092_v42  ;;  %2138 = vmatpush1.msra.mxu1 %v5653_v48  ;;  %v6112_v48 = vld [vmem:[#allocation6 + $0x1a0] sm:$0xff] }
 0x711   :  { %2015 = vmatpush1.msra.mxu0 %v6096_v12  ;;  %2139 = vmatprep.subr.mxu1 %v5657_v25  ;;  %v6116_v25 = vld [vmem:[#allocation6 + $0x178] sm:$0xff] }
 0x712   :  { %2016 = vmatprep.subr.mxu0 %v6100_v6  ;;  %2140 = vmatpush1.msra.mxu1 %v5661_v38  ;;  %v6120_v38 = vld [vmem:[#allocation6 + $0x170] sm:$0xff] }
 0x713   :  { %2017 = vmatpush1.msra.mxu0 %v6104_v10  ;;  %2141 = vmatprep.subr.mxu1 %v5665_v27  ;;  %v6124_v27 = vld [vmem:[#allocation6 + $0x148] sm:$0xff] }
 0x714   :  { %2018 = vmatprep.subr.mxu0 %v6108_v9  ;;  %2142 = vmatpush1.msra.mxu1 %v5669_v56  ;;  %v6128_v56 = vld [vmem:[#allocation6 + $0x140] sm:$0xff] }
 0x715   :  { %2019 = vmatpush1.msra.mxu0 %v6112_v48  ;;  %2143 = vmatprep.subr.mxu1 %v5673_v55  ;;  %v6132_v55 = vld [vmem:[#allocation6 + $0x118] sm:$0xff] }
 0x716   :  { %2020 = vmatprep.subr.mxu0 %v6116_v25  ;;  %2144 = vmatpush1.msra.mxu1 %v5677_v52  ;;  %v6136_v52 = vld [vmem:[#allocation6 + $0x110] sm:$0xff] }
 0x717   :  { %2021 = vmatpush1.msra.mxu0 %v6120_v38  ;;  %2145 = vmatprep.subr.mxu1 %v5681_v46  ;;  %v6140_v46 = vld [vmem:[#allocation6 + $0xe8] sm:$0xff] }
 0x718   :  { %2022 = vmatprep.subr.mxu0 %v6124_v27  ;;  %2146 = vmatpush1.msra.mxu1 %v5685_v22  ;;  %v6144_v22 = vld [vmem:[#allocation6 + $0xe0] sm:$0xff] }
 0x719   :  { %2023 = vmatpush1.msra.mxu0 %v6128_v56  ;;  %2147 = vmatprep.subr.mxu1 %v5689_v20  ;;  %v6148_v20 = vld [vmem:[#allocation6 + $0xb8] sm:$0xff] }
 0x71a   :  { %2024 = vmatprep.subr.mxu0 %v6132_v55  ;;  %2148 = vmatpush1.msra.mxu1 %v5693_v54  ;;  %v6152_v54 = vld [vmem:[#allocation6 + $0xb0] sm:$0xff] }
 0x71b   :  { %2025 = vmatpush1.msra.mxu0 %v6136_v52  ;;  %2149 = vmatprep.subr.mxu1 %v5697_v23  ;;  %v6156_v23 = vld [vmem:[#allocation6 + $0x88] sm:$0xff] }
 0x71c   :  { %2026 = vmatprep.subr.mxu0 %v6140_v46  ;;  %2150 = vmatpush1.msra.mxu1 %v5701_v59  ;;  %v6160_v59 = vld [vmem:[#allocation6 + $0x80] sm:$0xff] }
 0x71d   :  { %2027 = vmatpush1.msra.mxu0 %v6144_v22  ;;  %2151 = vmatprep.subr.mxu1 %v5705_v63  ;;  %v6164_v63 = vld [vmem:[#allocation6 + $0x58] sm:$0xff] }
 0x71e   :  { %2028 = vmatprep.subr.mxu0 %v6148_v20  ;;  %2152 = vmatpush1.msra.mxu1 %v5709_v53  ;;  %v6168_v53 = vld [vmem:[#allocation6 + $0x50] sm:$0xff] }
 0x71f   :  { %2029 = vmatpush1.msra.mxu0 %v6152_v54  ;;  %2153 = vmatprep.subr.mxu1 %v5713_v51  ;;  %v6172_v51 = vld [vmem:[#allocation6 + $0x28] sm:$0xff] }
 0x720   :  { %2030 = vmatprep.subr.mxu0 %v6156_v23  ;;  %2154 = vmatpush1.msra.mxu1 %v5717_v49  ;;  %v6176_v49 = vld [vmem:[#allocation6 + $0x20] sm:$0xff] }
 0x721   :  { %2031 = vmatpush1.msra.mxu0 %v6160_v59  ;;  %2155 = vmatprep.subr.mxu1 %v5721_v44  ;;  %v6180_v44 = vld [vmem:[#allocation6 + $0x5f8] sm:$0xff] }
 0x722   :  { %2032 = vmatprep.subr.mxu0 %v6164_v63  ;;  %2156 = vmatpush1.msra.mxu1 %v5725_v58  ;;  %v6184_v58 = vld [vmem:[#allocation6 + $0x5f0] sm:$0xff] }
 0x723   :  { %2033 = vmatpush1.msra.mxu0 %v6168_v53  ;;  %2157 = vmatprep.subr.mxu1 %v5729_v21  ;;  %v6188_v21 = vld [vmem:[#allocation6 + $0x5c8] sm:$0xff] }
 0x724   :  { %2034 = vmatprep.subr.mxu0 %v6172_v51  ;;  %2158 = vmatpush1.msra.mxu1 %v5733_v62  ;;  %v6192_v62 = vld [vmem:[#allocation6 + $0x5c0] sm:$0xff] }
 0x725   :  { %2035 = vmatpush1.msra.mxu0 %v6176_v49  ;;  %2159 = vmatprep.subr.mxu1 %v5737_v18  ;;  %v6196_v18 = vld [vmem:[#allocation6 + $0x598] sm:$0xff] }
 0x726   :  { %2036 = vmatprep.subr.mxu0 %v6180_v44  ;;  %2160 = vmatpush1.msra.mxu1 %v5741_v0  ;;  %v6200_v0 = vld [vmem:[#allocation6 + $0x590] sm:$0xff] }
 0x727   :  { %2037 = vmatpush2.msra.mxu0 %v6184_v58  ;;  %2161 = vmatprep.subr.mxu1 %v5745_v60  ;;  %v6204_v60 = vld [vmem:[#allocation6 + $0x568] sm:$0xff] }
 0x728   :  { %2038 = vmatprep.subr.mxu0 %v6188_v21  ;;  %2162 = vmatpush2.msra.mxu1 %v5749_v37  ;;  %v6208_v37 = vld [vmem:[#allocation6 + $0x560] sm:$0xff] }
 0x729   :  { %2039 = vmatpush2.msra.mxu0 %v6192_v62  ;;  %2163 = vmatprep.subr.mxu1 %v5753_v57  ;;  %v6212_v57 = vld [vmem:[#allocation6 + $0x538] sm:$0xff] }
 0x72a   :  { %2040 = vmatprep.subr.mxu0 %v6196_v18  ;;  %2164 = vmatpush2.msra.mxu1 %v5757_v19  ;;  %v6216_v19 = vld [vmem:[#allocation6 + $0x530] sm:$0xff] }
 0x72b   :  { %2041 = vmatpush2.msra.mxu0 %v6200_v0  ;;  %2165 = vmatprep.subr.mxu1 %v5761_v33  ;;  %v6220_v33 = vld [vmem:[#allocation6 + $0x508] sm:$0xff] }
 0x72c   :  { %2042 = vmatprep.subr.mxu0 %v6204_v60  ;;  %2166 = vmatpush2.msra.mxu1 %v5765_v24  ;;  %7610 = vst [vmem:[#allocation43_spill] sm:$0xff] %v6220_v33  ;;  %v6224_v24 = vld [vmem:[#allocation6 + $0x500] sm:$0xff] }
 0x72d   :  { %2043 = vmatpush2.msra.mxu0 %v6208_v37  ;;  %2167 = vmatprep.subr.mxu1 %v5769_v61  ;;  %7611 = vst [vmem:[#allocation13_spill] sm:$0xff] %v6224_v24  ;;  %v7612_v61 = vld [vmem:[#allocation28_spill] sm:$0xff] }
 0x72e   :  { %2044 = vmatprep.subr.mxu0 %v6212_v57  ;;  %2168 = vmatpush2.msra.mxu1 %v5773_v26  ;;  %v7614_v26 = vld [vmem:[#allocation29_spill] sm:$0xff] }
 0x72f   :  { %2045 = vmatpush2.msra.mxu0 %v6216_v19  ;;  %2169 = vmatprep.subr.mxu1 %v5777_v35  ;;  %v7616_v35 = vld [vmem:[#allocation30_spill] sm:$0xff] }
 0x730   :  { %2046 = vmatprep.subr.mxu0 %v6220_v33  ;;  %2170 = vmatpush2.msra.mxu1 %v5781_v32  ;;  %v7618_v32 = vld [vmem:[#allocation31_spill] sm:$0xff] }
 0x731   :  { %2047 = vmatpush2.msra.mxu0 %v6224_v24  ;;  %2171 = vmatprep.subr.mxu1 %v7612_v61  ;;  %v7630_v61 = vld [vmem:[#allocation37_spill] sm:$0xff] }
 0x732   :  { %2048 = vmatprep.subr.mxu0 %v6228_v7  ;;  %2172 = vmatpush2.msra.mxu1 %v7614_v26  ;;  %v6264_v26 = vld [vmem:[#allocation6 + $0x410] sm:$0xff] }
 0x733   :  { %2049 = vmatpush2.msra.mxu0 %v6232_v14  ;;  %2173 = vmatprep.subr.mxu1 %v7616_v35  ;;  %7631 = vst [vmem:[#allocation18_spill] sm:$0xff] %v6264_v26  ;;  %v7632_v35 = vld [vmem:[#allocation38_spill] sm:$0xff] }
 0x734   :  { %2050 = vmatprep.subr.mxu0 %v6236_v5  ;;  %2174 = vmatpush2.msra.mxu1 %v7618_v32  ;;  %v6268_v32 = vld [vmem:[#allocation6 + $0x3e8] sm:$0xff] }
 0x735   :  { %2051 = vmatpush2.msra.mxu0 %v6240_v34  ;;  %2175 = vmatprep.subr.mxu1 %v7620_v17  ;;  %7633 = vst [vmem:[#allocation55_spill] sm:$0xff] %v6268_v32  ;;  %v7634_v17 = vld [vmem:[#allocation39_spill] sm:$0xff] }
 0x736   :  { %2052 = vmatprep.subr.mxu0 %v6244_v4  ;;  %2176 = vmatpush2.msra.mxu1 %v7622_v50  ;;  %v6272_v50 = vld [vmem:[#allocation6 + $0x3e0] sm:$0xff]  ;;  %v1859_v34 = vld [vmem:[#allocation3 + $0x138] sm:$0xff] }
 0x737   :  { %2053 = vmatpush2.msra.mxu0 %v6248_v30  ;;  %2177 = vmatprep.subr.mxu1 %v7624_v8  ;;  %7635 = vst [vmem:[#allocation19_spill] sm:$0xff] %v6272_v50  ;;  %v7636_v8 = vld [vmem:[#allocation40_spill] sm:$0xff] }
 0x738   :  { %2054 = vmatprep.subr.mxu0 %v6252_v43  ;;  %2178 = vmatpush2.msra.mxu1 %v7626_v28  ;;  %v6276_v28 = vld [vmem:[#allocation6 + $0x3b8] sm:$0xff]  ;;  %v1857_v43 = vld [vmem:[#allocation3 + $0x128] sm:$0xff] }
 0x739   :  { %2055 = vmatpush2.msra.mxu0 %v6256_v2  ;;  %2179 = vmatprep.subr.mxu1 %v7628_v29  ;;  %7637 = vst [vmem:[#allocation57_spill] sm:$0xff] %v6276_v28  ;;  %v7638_v29 = vld [vmem:[#allocation42_spill] sm:$0xff] }
 0x73a   :  { %2056 = vmatprep.subr.mxu0 %v6260_v45  ;;  %2180 = vmatpush2.msra.mxu1 %v7630_v61  ;;  %v6280_v61 = vld [vmem:[#allocation6 + $0x3b0] sm:$0xff]  ;;  %v7652_v45 = vld [vmem:[#allocation56_spill] sm:$0xff] }
 0x73b   :  { %2057 = vmatpush2.msra.mxu0 %v6264_v26  ;;  %2181 = vmatprep.subr.mxu1 %v7632_v35  ;;  %7639 = vst [vmem:[#allocation20_spill] sm:$0xff] %v6280_v61  ;;  %v7640_v35 = vld [vmem:[#allocation44_spill] sm:$0xff]  ;;  %v3179_v26 = vld [vmem:[#allocation6 + $0x2f8] sm:$0xff]  ;;  %v7655_v2 = vld [vmem:[#allocation62_spill] sm:$0xff] }
 0x73c   :  { %2058 = vmatprep.subr.mxu0 %v6268_v32  ;;  %2182 = vmatpush2.msra.mxu1 %v7634_v17  ;;  %v6284_v32 = vld [vmem:[#allocation6 + $0x388] sm:$0xff]  ;;  %v3167_v17 = vld [vmem:[#allocation6 + $0x390] sm:$0xff] }
 0x73d   :  { %2059 = vmatpush2.msra.mxu0 %v6272_v50  ;;  %2183 = vmatprep.subr.mxu1 %v7636_v8  ;;  %7641 = vst [vmem:[#allocation59_spill] sm:$0xff] %v6284_v32  ;;  %v6287_v50 = vld [vmem:[#allocation6 + $0x380] sm:$0xff]  ;;  %v3169_v8 = vld [vmem:[#allocation6 + $0x368] sm:$0xff] }
 0x73e   :  { %2060 = vmatprep.subr.mxu0 %v6276_v28  ;;  %2184 = vmatpush2.msra.mxu1 %v7638_v29  ;;  %7642 = vst [vmem:[#allocation21_spill] sm:$0xff] %v6287_v50  ;;  %v6290_v28 = vld [vmem:[#allocation6 + $0x358] sm:$0xff]  ;;  %v3171_v29 = vld [vmem:[#allocation6 + $0x360] sm:$0xff] }
 0x73f   :  { %2061 = vmatpush2.msra.mxu0 %v6280_v61  ;;  %2185 = vmatprep.subr.mxu1 %v7640_v35  ;;  %7643 = vst [vmem:[#allocation22_spill] sm:$0xff] %v6290_v28  ;;  %v6293_v61 = vld [vmem:[#allocation6 + $0x350] sm:$0xff]  ;;  %v3173_v35 = vld [vmem:[#allocation6 + $0x338] sm:$0xff] }
 0x740   :  { %2062 = vmatprep.subr.mxu0 %v6284_v32  ;;  %2186 = vmatpush2.msra.mxu1 %v3167_v17  ;;  %7644 = vst [vmem:[#allocation23_spill] sm:$0xff] %v6293_v61  ;;  %v6296_v32 = vld [vmem:[#allocation6 + $0x328] sm:$0xff]  ;;  %v3175_v17 = vld [vmem:[#allocation6 + $0x330] sm:$0xff] }
 0x741   :  { %2063 = vmatpush2.msra.mxu0 %v6287_v50  ;;  %2187 = vmatprep.subr.mxu1 %v3169_v8  ;;  %7645 = vst [vmem:[#allocation24_spill] sm:$0xff] %v6296_v32  ;;  %v6299_v50 = vld [vmem:[#allocation6 + $0x320] sm:$0xff]  ;;  %v3177_v8 = vld [vmem:[#allocation6 + $0x308] sm:$0xff] }
 0x742   :  { %2064 = vmatprep.subr.mxu0 %v6290_v28  ;;  %2188 = vmatpush2.msra.mxu1 %v3171_v29  ;;  %7646 = vst [vmem:[#allocation25_spill] sm:$0xff] %v6299_v50  ;;  %v7647_v29 = vld [vmem:[#allocation46_spill] sm:$0xff]  ;;  %v7648_v28 = vld [vmem:[#allocation48_spill] sm:$0xff] }
 0x743   :  { %2065 = vmatpush2.msra.mxu0 %v6293_v61  ;;  %2189 = vmatprep.subr.mxu1 %v3173_v35  ;;  %v3178_v61 = vld [vmem:[#allocation6 + $0x300] sm:$0xff]  ;;  %v7649_v35 = vld [vmem:[#allocation50_spill] sm:$0xff] }
 0x744   :  { %2066 = vmatprep.subr.mxu0 %v6296_v32  ;;  %2190 = vmatpush2.msra.mxu1 %v3175_v17  ;;  %v7650_v32 = vld [vmem:[#allocation52_spill] sm:$0xff]  ;;  %v7651_v17 = vld [vmem:[#allocation54_spill] sm:$0xff] }
 0x745   :  { %2067 = vmatpush2.msra.mxu0 %v6299_v50  ;;  %2191 = vmatprep.subr.mxu1 %v3177_v8  ;;  %v7653_v50 = vld [vmem:[#allocation58_spill] sm:$0xff]  ;;  %v7654_v8 = vld [vmem:[#allocation60_spill] sm:$0xff] }
 0x746   :  { %2069 = vmatmul.mubr.f32.vlgmr.msra.gmra.mxu0 %v6046_v16  ;;  %2200 = vmatprep.subr.mxu0 %v7647_v29  ;;  %v7656_v29 = vld [vmem:[#allocation64_spill] sm:$0xff] }
 0x747   :  { %2201 = vmatpush1.msra.mxu0 %v7648_v28  ;;  %2192 = vmatpush2.msra.mxu1 %v3178_v61  ;;  %v7657_v28 = vld [vmem:[#allocation66_spill] sm:$0xff]  ;;  %v7658_v61 = vld [vmem:[#allocation68_spill] sm:$0xff] }
 0x748   :  { %2202 = vmatprep.subr.mxu0 %v7649_v35  ;;  %2271 = vmatprep.subr.mxu1 %v3179_v26  ;;  %v7659_v35 = vld [vmem:[#allocation70_spill] sm:$0xff]  ;;  %v7660_v26 = vld [vmem:[#allocation72_spill] sm:$0xff] }
 0x749   :  { %2203 = vmatpush1.msra.mxu0 %v7650_v32  ;;  %v7661_v32 = vld [vmem:[#allocation75_spill] sm:$0xff] }
 0x74a   :  { %2204 = vmatprep.subr.mxu0 %v7651_v17  ;;  %v7662_v17 = vld [vmem:[#allocation77_spill] sm:$0xff] }
 0x74b   :  { %2205 = vmatpush1.msra.mxu0 %v7652_v45  ;;  %v7663_v45 = vld [vmem:[#allocation79_spill] sm:$0xff] }
 0x74c   :  { %2206 = vmatprep.subr.mxu0 %v7653_v50  ;;  %v7664_v50 = vld [vmem:[#allocation81_spill] sm:$0xff] }
 0x74d   :  { %2207 = vmatpush1.msra.mxu0 %v7654_v8  ;;  %v7665_v8 = vld [vmem:[#allocation83_spill] sm:$0xff] }
 0x74e   :  { %2208 = vmatprep.subr.mxu0 %v7655_v2  ;;  %v7666_v2 = vld [vmem:[#allocation85_spill] sm:$0xff] }
 0x74f   :  { %2209 = vmatpush1.msra.mxu0 %v7656_v29  ;;  %v7667_v29 = vld [vmem:[#allocation87_spill] sm:$0xff] }
 0x750   :  { %2210 = vmatprep.subr.mxu0 %v7657_v28  ;;  %v7668_v28 = vld [vmem:[#allocation89_spill] sm:$0xff] }
 0x751   :  { %2211 = vmatpush1.msra.mxu0 %v7658_v61  ;;  %v7669_v61 = vld [vmem:[#allocation91_spill] sm:$0xff] }
 0x752   :  { %2212 = vmatprep.subr.mxu0 %v7659_v35  ;;  %v7670_v35 = vld [vmem:[#allocation93_spill] sm:$0xff] }
 0x753   :  { %2213 = vmatpush1.msra.mxu0 %v7660_v26  ;;  %v7671_v26 = vld [vmem:[#allocation74_spill] sm:$0xff] }
 0x754   :  { %2214 = vmatprep.subr.mxu0 %v7661_v32  ;;  %v7672_v32 = vld [vmem:[#allocation76_spill] sm:$0xff] }
 0x755   :  { %2215 = vmatpush1.msra.mxu0 %v7662_v17  ;;  %v7673_v17 = vld [vmem:[#allocation78_spill] sm:$0xff] }
 0x756   :  { %2216 = vmatprep.subr.mxu0 %v7663_v45  ;;  %v7674_v45 = vld [vmem:[#allocation80_spill] sm:$0xff] }
 0x757   :  { %2217 = vmatpush1.msra.mxu0 %v7664_v50  ;;  %v7675_v50 = vld [vmem:[#allocation82_spill] sm:$0xff] }
 0x758   :  { %2218 = vmatprep.subr.mxu0 %v7665_v8  ;;  %v7676_v8 = vld [vmem:[#allocation84_spill] sm:$0xff] }
 0x759   :  { %2219 = vmatpush1.msra.mxu0 %v7666_v2  ;;  %v7677_v2 = vld [vmem:[#allocation86_spill] sm:$0xff] }
 0x75a   :  { %2220 = vmatprep.subr.mxu0 %v7667_v29  ;;  %v7678_v29 = vld [vmem:[#allocation88_spill] sm:$0xff] }
 0x75b   :  { %2221 = vmatpush1.msra.mxu0 %v7668_v28  ;;  %v7679_v28 = vld [vmem:[#allocation90_spill] sm:$0xff] }
 0x75c   :  { %2222 = vmatprep.subr.mxu0 %v7669_v61  ;;  %v7680_v61 = vld [vmem:[#allocation92_spill] sm:$0xff] }
 0x75d   :  { %2223 = vmatpush1.msra.mxu0 %v7670_v35  ;;  %v7681_v35 = vld [vmem:[#allocation94_spill] sm:$0xff] }
 0x75e   :  { %2224 = vmatprep.subr.mxu0 %v7671_v26  ;;  %v7682_v26 = vld [vmem:[#allocation96_spill] sm:$0xff] }
 0x75f   :  { %2225 = vmatpush1.msra.mxu0 %v7672_v32  ;;  %v7683_v32 = vld [vmem:[#allocation98_spill] sm:$0xff] }
 0x760   :  { %2226 = vmatprep.subr.mxu0 %v7673_v17  ;;  %v7684_v17 = vld [vmem:[#allocation100_spill] sm:$0xff] }
 0x761   :  { %2227 = vmatpush1.msra.mxu0 %v7674_v45  ;;  %v7685_v45 = vld [vmem:[#allocation102_spill] sm:$0xff] }
 0x762   :  { %2228 = vmatprep.subr.mxu0 %v7675_v50  ;;  %v7686_v50 = vld [vmem:[#allocation104_spill] sm:$0xff] }
 0x763   :  { %2229 = vmatpush1.msra.mxu0 %v7676_v8  ;;  %v7687_v8 = vld [vmem:[#allocation105_spill] sm:$0xff] }
 0x764   :  { %2230 = vmatprep.subr.mxu0 %v7677_v2  ;;  %v7688_v2 = vld [vmem:[#allocation106_spill] sm:$0xff] }
 0x765   :  { %2231 = vmatpush1.msra.mxu0 %v7678_v29  ;;  %v7689_v29 = vld [vmem:[#allocation61_spill] sm:$0xff] }
 0x766   :  { %2232 = vmatprep.subr.mxu0 %v7679_v28  ;;  %v7690_v28 = vld [vmem:[#allocation107_spill] sm:$0xff] }
 0x767   :  { %2233 = vmatpush2.msra.mxu0 %v7680_v61  ;;  %v7691_v61 = vld [vmem:[#allocation63_spill] sm:$0xff] }
 0x768   :  { %2234 = vmatprep.subr.mxu0 %v7681_v35  ;;  %v7692_v35 = vld [vmem:[#allocation108_spill] sm:$0xff] }
 0x769   :  { %2235 = vmatpush2.msra.mxu0 %v7682_v26  ;;  %v7693_v26 = vld [vmem:[#allocation65_spill] sm:$0xff] }
 0x76a   :  { %2236 = vmatprep.subr.mxu0 %v7683_v32  ;;  %v7694_v32 = vld [vmem:[#allocation109_spill] sm:$0xff] }
 0x76b   :  { %2237 = vmatpush2.msra.mxu0 %v7684_v17  ;;  %v7695_v17 = vld [vmem:[#allocation67_spill] sm:$0xff] }
 0x76c   :  { %2238 = vmatprep.subr.mxu0 %v7685_v45  ;;  %v7696_v45 = vld [vmem:[#allocation110_spill] sm:$0xff] }
 0x76d   :  { %2239 = vmatpush2.msra.mxu0 %v7686_v50  ;;  %v7697_v50 = vld [vmem:[#allocation69_spill] sm:$0xff] }
 0x76e   :  { %2240 = vmatprep.subr.mxu0 %v7687_v8  ;;  %v7698_v8 = vld [vmem:[#allocation71_spill] sm:$0xff] }
 0x76f   :  { %2241 = vmatpush2.msra.mxu0 %v7688_v2  ;;  %v7699_v2 = vld [vmem:[#allocation73_spill] sm:$0xff] }
 0x770   :  { %2242 = vmatprep.subr.mxu0 %v7689_v29  ;;  %v7700_v29 = vld [vmem:[#allocation95_spill] sm:$0xff] }
 0x771   :  { %2243 = vmatpush2.msra.mxu0 %v7690_v28  ;;  %v7701_v28 = vld [vmem:[#allocation97_spill] sm:$0xff] }
 0x772   :  { %2244 = vmatprep.subr.mxu0 %v7691_v61  ;;  %v7702_v61 = vld [vmem:[#allocation99_spill] sm:$0xff] }
 0x773   :  { %2245 = vmatpush2.msra.mxu0 %v7692_v35  ;;  %v7703_v35 = vld [vmem:[#allocation101_spill] sm:$0xff] }
 0x774   :  { %2246 = vmatprep.subr.mxu0 %v7693_v26  ;;  %v7704_v26 = vld [vmem:[#allocation103_spill] sm:$0xff] }
 0x775   :  { %2247 = vmatpush2.msra.mxu0 %v7694_v32  ;;  %v7705_v32 = vld [vmem:[#allocation41_spill] sm:$0xff] }
 0x776   :  { %2248 = vmatprep.subr.mxu0 %v7695_v17  ;;  %v3180_v17 = vld [vmem:[#allocation6 + $0x370] sm:$0xff] }
 0x777   :  { %2249 = vmatpush2.msra.mxu0 %v7696_v45  ;;  %v3181_v45 = vld [vmem:[#allocation6 + $0x348] sm:$0xff] }
 0x778   :  { %2250 = vmatprep.subr.mxu0 %v7697_v50  ;;  %v3182_v50 = vld [vmem:[#allocation6 + $0x340] sm:$0xff] }
 0x779   :  { %2251 = vmatpush2.msra.mxu0 %v7698_v8  ;;  %v3183_v8 = vld [vmem:[#allocation6 + $0x318] sm:$0xff] }
 0x77a   :  { %2252 = vmatprep.subr.mxu0 %v7699_v2  ;;  %v3184_v2 = vld [vmem:[#allocation6 + $0x310] sm:$0xff] }
 0x77b   :  { %2253 = vmatpush2.msra.mxu0 %v7700_v29 }
 0x77c   :  { %2254 = vmatprep.subr.mxu0 %v7701_v28  ;;  %v1856_v28 = vld [vmem:[#allocation3 + $0x120] sm:$0xff] }
 0x77d   :  { %2255 = vmatpush2.msra.mxu0 %v7702_v61 }
 0x77e   :  { %2256 = vmatprep.subr.mxu0 %v7703_v35 }
 0x77f   :  { %2257 = vmatpush2.msra.mxu0 %v7704_v26 }
 0x780   :  { %2258 = vmatprep.subr.mxu0 %v7705_v32 }
 0x781   :  { %2259 = vmatpush2.msra.mxu0 %v3180_v17  ;;  %v1858_v17 = vld [vmem:[#allocation3 + $0x130] sm:$0xff] }
 0x782   :  { %2260 = vmatprep.subr.mxu0 %v3181_v45 }
 0x783   :  { %2261 = vmatpush2.msra.mxu0 %v3182_v50 }
 0x784   :  { %2262 = vmatprep.subr.mxu0 %v3183_v8 }
 0x785   :  { %2263 = vmatpush2.msra.mxu0 %v3184_v2 }
 0x7c6   :  { %v1928_v29 = vpop.f32.mrf.mxu0  ;;  %v1999_v32 = vpop.f32.mrf.mxu1 }
 0x7c7   :  { %v2075_v30 = vadd.f32 %v1928_v29, %v1856_v28  ;;  %v2089_v5 = vadd.f32 %v1999_v32, %v1858_v17  ;;  %v1860_v32 = vld [vmem:[#allocation3 + $0x140] sm:$0xff] }
 0x7c8   :  { %v1930_v61 = vpop.f32.mrf.mxu0  ;;  %v2001_v45 = vpop.f32.mrf.mxu1 }
 0x7c9   :  { %v2076_v35 = vadd.f32 %v1930_v61, %v1857_v43  ;;  %v2433_v4 = vmul.f32 -1.442695, %v2075_v30  ;;  %v2090_v50 = vadd.f32 %v2001_v45, %v1859_v34  ;;  %v2435_v14 = vmul.f32 -1.442695, %v2089_v5  ;;  %v7706_v61 = vld [vmem:[#allocation12_spill] sm:$0xff] }
 0x7cb   :  { %v2434_v26 = vmul.f32 -1.442695, %v2076_v35  ;;  %2569 = vpow2.f32 %v2433_v4  ;;  %v2436_v8 = vmul.f32 -1.442695, %v2090_v50 }
 0x7cd   :  { %2571 = vpow2.f32 %v2434_v26 }
 0x7ce   :  { %2573 = vpow2.f32 %v2435_v14 }
 0x7cf   :  { %2575 = vpow2.f32 %v2436_v8 }
 0x7d8   :  { %v2570_v7 = vpop.eup %2569 }
 0x7d9   :  { %v2083_v24 = vadd.f32 1.0, %v2570_v7  ;;  %v1861_v7 = vld [vmem:[#allocation3 + $0x148] sm:$0xff] }
 0x7da   :  { %v2572_v2 = vpop.eup %2571 }
 0x7db   :  { %v2084_v33 = vadd.f32 1.0, %v2572_v2  ;;  %2577 = vrcp.f32 %v2083_v24  ;;  %v2574_v30 = vpop.eup %2573 }
 0x7dc   :  { %v2576_v43 = vpop.eup %2575  ;;  %v2097_v4 = vadd.f32 1.0, %v2574_v30 }
 0x7dd   :  { %2579 = vrcp.f32 %v2084_v33  ;;  %v2098_v28 = vadd.f32 1.0, %v2576_v43 }
 0x7de   :  { %2581 = vrcp.f32 %v2097_v4 }
 0x7df   :  { %2583 = vrcp.f32 %v2098_v28 }
 0x7e8   :  { %v2578_v26 = vpop.eup %2577 }
 0x7ea   :  { %v2580_v17 = vpop.eup %2579 }
 0x7eb   :  { %v2582_v50 = vpop.eup %2581 }
 0x7ec   :  { %v2584_v8 = vpop.eup %2583  ;;  %v2111_v2 = vsub.f32 1.0, %v2582_v50 }
 0x7ed   :  { %v2112_v43 = vsub.f32 1.0, %v2584_v8 }
 0x806   :  { %v2070_v29 = vpop.f32.mrf.mxu0 }
 0x807   :  { %v2103_v35 = vadd.f32 %v2070_v29, %v7706_v61  ;;  %v2115_v61 = vmul.f32 %v2582_v50, %v6046_v16  ;;  %v7707_v16 = vld [vmem:[#allocation43_spill] sm:$0xff] }
 0x808   :  { %v2072_v34 = vpop.f32.mrf.mxu0 }
 0x809   :  { %v2105_v5 = vmul.f32 %v2578_v26, %v2103_v35  ;;  %v2104_v14 = vadd.f32 %v2072_v34, %v4004_v41  ;;  %v2116_v26 = vmul.f32 %v2584_v8, %v6048_v36  ;;  %v7708_v36 = vld [vmem:[#allocation13_spill] sm:$0xff] }
 0x80b   :  { %v2107_v45 = vadd.f32 %v2105_v5, %v1860_v32  ;;  %v2106_v24 = vmul.f32 %v2580_v17, %v2104_v14  ;;  %v7729_v17 = vld [vmem:[#allocation12_spill] sm:$0xff] }
 0x80d   :  { %2585 = vtanh.f32 %v2107_v45  ;;  %v2108_v33 = vadd.f32 %v2106_v24, %v1861_v7  ;;  %v2127_v24 = vld [vmem:[#allocation3 + $0x170] sm:$0xff] }
 0x80f   :  { %2587 = vtanh.f32 %v2108_v33 }
 0x81a   :  { %v2586_v30 = vpop.eup %2585 }
 0x81b   :  { %v2113_v29 = vmul.f32 %v2586_v30, %v2111_v2  ;;  %v2128_v30 = vld [vmem:[#allocation3 + $0x178] sm:$0xff] }
 0x81c   :  { %v2588_v4 = vpop.eup %2587 }
 0x81d   :  { %v2114_v35 = vmul.f32 %v2588_v4, %v2112_v43  ;;  %v6366_v34 = vadd.f32 %v2115_v61, %v2113_v29 }
 0x81f   :  { %v6368_v28 = vadd.f32 %v2116_v26, %v2114_v35  ;;  %2120 = vst [vmem:[#allocation8 + $0x60] sm:$0xff] %v6366_v34 }
 0x821   :  { %2121 = vst [vmem:[#allocation8 + $0x68] sm:$0xff] %v6368_v28  ;;  %2193 = vmatprep.mubr.f32.mxu1 %v6368_v28  ;;  %2264 = vmatprep.mubr.f32.mxu0 %v6368_v28 }
 0x822   :  { %2194 = vmatmul.mubr.f32.vlgmr.msra.gmra.mxu1 %v6366_v34  ;;  %2265 = vmatmul.mubr.f32.vlgmr.msra.gmra.mxu0 %v6366_v34 }
 0x823   :  { %2272 = vmatpush1.msra.mxu1 %v6056_v13  ;;  %2335 = vmatprep.mubr.f32.mxu1 %v6368_v28  ;;  %v7709_v13 = vld [vmem:[#allocation45_spill] sm:$0xff] }
 0x824   :  { %2273 = vmatprep.subr.mxu1 %v6060_v3  ;;  %v7710_v3 = vld [vmem:[#allocation14_spill] sm:$0xff] }
 0x825   :  { %2274 = vmatpush1.msra.mxu1 %v6064_v31  ;;  %v7711_v31 = vld [vmem:[#allocation47_spill] sm:$0xff] }
 0x826   :  { %2275 = vmatprep.subr.mxu1 %v6068_v1  ;;  %v7712_v1 = vld [vmem:[#allocation15_spill] sm:$0xff] }
 0x827   :  { %2276 = vmatpush1.msra.mxu1 %v6072_v47  ;;  %v7713_v47 = vld [vmem:[#allocation49_spill] sm:$0xff] }
 0x828   :  { %2277 = vmatprep.subr.mxu1 %v6076_v40  ;;  %v7714_v40 = vld [vmem:[#allocation16_spill] sm:$0xff] }
 0x829   :  { %2278 = vmatpush1.msra.mxu1 %v6080_v15  ;;  %v7715_v15 = vld [vmem:[#allocation51_spill] sm:$0xff] }
 0x82a   :  { %2279 = vmatprep.subr.mxu1 %v6084_v11  ;;  %v7716_v11 = vld [vmem:[#allocation17_spill] sm:$0xff] }
 0x82b   :  { %2280 = vmatpush1.msra.mxu1 %v6088_v39  ;;  %v7717_v39 = vld [vmem:[#allocation53_spill] sm:$0xff] }
 0x82c   :  { %2281 = vmatprep.subr.mxu1 %v6092_v42  ;;  %v7718_v42 = vld [vmem:[#allocation18_spill] sm:$0xff] }
 0x82d   :  { %2282 = vmatpush1.msra.mxu1 %v6096_v12  ;;  %v7719_v12 = vld [vmem:[#allocation55_spill] sm:$0xff] }
 0x82e   :  { %2283 = vmatprep.subr.mxu1 %v6100_v6  ;;  %v7720_v6 = vld [vmem:[#allocation19_spill] sm:$0xff] }
 0x82f   :  { %2284 = vmatpush1.msra.mxu1 %v6104_v10  ;;  %v7721_v10 = vld [vmem:[#allocation57_spill] sm:$0xff] }
 0x830   :  { %2285 = vmatprep.subr.mxu1 %v6108_v9  ;;  %v7722_v9 = vld [vmem:[#allocation20_spill] sm:$0xff] }
 0x831   :  { %2286 = vmatpush1.msra.mxu1 %v6112_v48  ;;  %v7723_v48 = vld [vmem:[#allocation59_spill] sm:$0xff] }
 0x832   :  { %2287 = vmatprep.subr.mxu1 %v6116_v25  ;;  %v7724_v25 = vld [vmem:[#allocation21_spill] sm:$0xff] }
 0x833   :  { %2288 = vmatpush1.msra.mxu1 %v6120_v38  ;;  %v7725_v38 = vld [vmem:[#allocation22_spill] sm:$0xff] }
 0x834   :  { %2289 = vmatprep.subr.mxu1 %v6124_v27  ;;  %v7726_v27 = vld [vmem:[#allocation23_spill] sm:$0xff] }
 0x835   :  { %2290 = vmatpush1.msra.mxu1 %v6128_v56  ;;  %v7727_v56 = vld [vmem:[#allocation24_spill] sm:$0xff] }
 0x836   :  { %2291 = vmatprep.subr.mxu1 %v6132_v55  ;;  %v7728_v55 = vld [vmem:[#allocation25_spill] sm:$0xff] }
 0x837   :  { %2292 = vmatpush1.msra.mxu1 %v6136_v52 }
 0x838   :  { %2293 = vmatprep.subr.mxu1 %v6140_v46  ;;  %v2123_v46 = vld [vmem:[#allocation3 + $0x150] sm:$0xff] }
 0x839   :  { %2294 = vmatpush1.msra.mxu1 %v6144_v22  ;;  %v2124_v22 = vld [vmem:[#allocation3 + $0x158] sm:$0xff] }
 0x83a   :  { %2295 = vmatprep.subr.mxu1 %v6148_v20 }
 0x83b   :  { %2296 = vmatpush1.msra.mxu1 %v6152_v54 }
 0x83c   :  { %2297 = vmatprep.subr.mxu1 %v6156_v23 }
 0x83d   :  { %2298 = vmatpush1.msra.mxu1 %v6160_v59 }
 0x83e   :  { %2299 = vmatprep.subr.mxu1 %v6164_v63 }
 0x83f   :  { %2300 = vmatpush1.msra.mxu1 %v6168_v53 }
 0x840   :  { %2301 = vmatprep.subr.mxu1 %v6172_v51  ;;  %v2125_v51 = vld [vmem:[#allocation3 + $0x160] sm:$0xff] }
 0x841   :  { %2302 = vmatpush1.msra.mxu1 %v6176_v49  ;;  %v2126_v49 = vld [vmem:[#allocation3 + $0x168] sm:$0xff] }
 0x842   :  { %2303 = vmatprep.subr.mxu1 %v6180_v44 }
 0x843   :  { %2304 = vmatpush2.msra.mxu1 %v6184_v58 }
 0x844   :  { %2305 = vmatprep.subr.mxu1 %v6188_v21 }
 0x845   :  { %2306 = vmatpush2.msra.mxu1 %v6192_v62 }
 0x846   :  { %2307 = vmatprep.subr.mxu1 %v6196_v18 }
 0x847   :  { %2308 = vmatpush2.msra.mxu1 %v6200_v0 }
 0x848   :  { %2309 = vmatprep.subr.mxu1 %v6204_v60 }
 0x849   :  { %2310 = vmatpush2.msra.mxu1 %v6208_v37 }
 0x84a   :  { %2311 = vmatprep.subr.mxu1 %v6212_v57 }
 0x84b   :  { %2312 = vmatpush2.msra.mxu1 %v6216_v19 }
 0x84c   :  { %2313 = vmatprep.subr.mxu1 %v7707_v16 }
 0x84d   :  { %2314 = vmatpush2.msra.mxu1 %v7708_v36 }
 0x84e   :  { %2315 = vmatprep.subr.mxu1 %v7709_v13 }
 0x84f   :  { %2316 = vmatpush2.msra.mxu1 %v7710_v3 }
 0x850   :  { %2317 = vmatprep.subr.mxu1 %v7711_v31 }
 0x851   :  { %2318 = vmatpush2.msra.mxu1 %v7712_v1 }
 0x852   :  { %2319 = vmatprep.subr.mxu1 %v7713_v47 }
 0x853   :  { %2320 = vmatpush2.msra.mxu1 %v7714_v40 }
 0x854   :  { %2321 = vmatprep.subr.mxu1 %v7715_v15 }
 0x855   :  { %2322 = vmatpush2.msra.mxu1 %v7716_v11 }
 0x856   :  { %2323 = vmatprep.subr.mxu1 %v7717_v39 }
 0x857   :  { %2324 = vmatpush2.msra.mxu1 %v7718_v42 }
 0x858   :  { %2325 = vmatprep.subr.mxu1 %v7719_v12 }
 0x859   :  { %2326 = vmatpush2.msra.mxu1 %v7720_v6 }
 0x85a   :  { %2327 = vmatprep.subr.mxu1 %v7721_v10 }
 0x85b   :  { %2328 = vmatpush2.msra.mxu1 %v7722_v9 }
 0x85c   :  { %2329 = vmatprep.subr.mxu1 %v7723_v48 }
 0x85d   :  { %2330 = vmatpush2.msra.mxu1 %v7724_v25 }
 0x85e   :  { %2331 = vmatprep.subr.mxu1 %v7725_v38 }
 0x85f   :  { %2332 = vmatpush2.msra.mxu1 %v7726_v27 }
 0x860   :  { %2333 = vmatprep.subr.mxu1 %v7727_v56 }
 0x861   :  { %2334 = vmatpush2.msra.mxu1 %v7728_v55 }
 0x862   :  { %2336 = vmatmul.mubr.f32.vlgmr.msra.gmra.mxu1 %v6366_v34 }
 0x8e2   :  { %v2195_v52 = vpop.f32.mrf.mxu1  ;;  %v2266_v53 = vpop.f32.mrf.mxu0 }
 0x8e3   :  { %v2342_v54 = vadd.f32 %v2195_v52, %v2123_v46  ;;  %v2356_v58 = vadd.f32 %v2266_v53, %v2125_v51 }
 0x8e4   :  { %v2197_v20 = vpop.f32.mrf.mxu1  ;;  %v2268_v44 = vpop.f32.mrf.mxu0 }
 0x8e5   :  { %v2343_v23 = vadd.f32 %v2197_v20, %v2124_v22  ;;  %v2437_v59 = vmul.f32 -1.442695, %v2342_v54  ;;  %v2357_v21 = vadd.f32 %v2268_v44, %v2126_v49  ;;  %v2439_v62 = vmul.f32 -1.442695, %v2356_v58 }
 0x8e7   :  { %v2438_v63 = vmul.f32 -1.442695, %v2343_v23  ;;  %2589 = vpow2.f32 %v2437_v59  ;;  %v2440_v18 = vmul.f32 -1.442695, %v2357_v21 }
 0x8e9   :  { %2591 = vpow2.f32 %v2438_v63 }
 0x8ea   :  { %2593 = vpow2.f32 %v2439_v62 }
 0x8eb   :  { %2595 = vpow2.f32 %v2440_v18 }
 0x8f4   :  { %v2590_v0 = vpop.eup %2589 }
 0x8f5   :  { %v2350_v37 = vadd.f32 1.0, %v2590_v0 }
 0x8f6   :  { %v2592_v60 = vpop.eup %2591 }
 0x8f7   :  { %v2351_v57 = vadd.f32 1.0, %v2592_v60  ;;  %2597 = vrcp.f32 %v2350_v37  ;;  %v2594_v19 = vpop.eup %2593 }
 0x8f8   :  { %v2596_v61 = vpop.eup %2595  ;;  %v2364_v32 = vadd.f32 1.0, %v2594_v19 }
 0x8f9   :  { %2599 = vrcp.f32 %v2351_v57  ;;  %v2365_v14 = vadd.f32 1.0, %v2596_v61 }
 0x8fa   :  { %2601 = vrcp.f32 %v2364_v32 }
 0x8fb   :  { %2603 = vrcp.f32 %v2365_v14 }
 0x904   :  { %v2598_v45 = vpop.eup %2597 }
 0x906   :  { %v2600_v2 = vpop.eup %2599 }
 0x907   :  { %v2602_v35 = vpop.eup %2601 }
 0x908   :  { %v2604_v26 = vpop.eup %2603  ;;  %v2378_v16 = vsub.f32 1.0, %v2602_v35  ;;  %v2382_v13 = vmul.f32 %v2602_v35, %v6366_v34 }
 0x909   :  { %v2379_v3 = vsub.f32 1.0, %v2604_v26 }
 0x922   :  { %v2337_v5 = vpop.f32.mrf.mxu1 }
 0x923   :  { %v2370_v7 = vadd.f32 %v2337_v5, %v7729_v17 }
 0x924   :  { %v2339_v33 = vpop.f32.mrf.mxu1 }
 0x925   :  { %v2372_v50 = vmul.f32 %v2598_v45, %v2370_v7  ;;  %v2371_v8 = vadd.f32 %v2339_v33, %v4004_v41  ;;  %v2383_v41 = vmul.f32 %v2604_v26, %v6368_v28 }
 0x927   :  { %v2374_v43 = vadd.f32 %v2372_v50, %v2127_v24  ;;  %v2373_v29 = vmul.f32 %v2600_v2, %v2371_v8 }
 0x929   :  { %2605 = vtanh.f32 %v2374_v43  ;;  %v2375_v4 = vadd.f32 %v2373_v29, %v2128_v30 }
 0x92b   :  { %2607 = vtanh.f32 %v2375_v4 }
 0x936   :  { %v2606_v36 = vpop.eup %2605 }
 0x937   :  { %v2380_v31 = vmul.f32 %v2606_v36, %v2378_v16 }
 0x938   :  { %v2608_v1 = vpop.eup %2607 }
 0x939   :  { %v2384_v47 = vadd.f32 %v2382_v13, %v2380_v31  ;;  %v2381_v40 = vmul.f32 %v2608_v1, %v2379_v3 }
 0x93b   :  { %2387 = vst [vmem:[#allocation8 + $0x70] sm:$0xff] %v2384_v47  ;;  %v2385_v15 = vadd.f32 %v2383_v41, %v2381_v40 }
 0x93d   :  { %2388 = vst [vmem:[#allocation8 + $0x78] sm:$0xff] %v2385_v15 }
 0x93e   :  { %3236 = shalt.err (!%p3233_p0)
}
 0x93f   :  { %s3257_s26 = smov 256   ;;  %s3258_s27 = smov 16  }
 0x940   :  { %2402 = dma.vmem_to_hbm [thread:$0]  %s2397_s24, 2048, %s6451_s3, [#allocation5], %s3257_s26, %s3257_s26, %s3258_s27  }
 0x941   :  { %3249 = dma.done.wait [#allocation5], 2048  }
 0x942   :  { %3250 = vsyncadd [#allocation5], 4294965248 }
 0x943   :  { %2406 = vsyncpa [#allocation4], 1 }
 0x944   :  { %2407 = vsyncpa [#allocation7], 1 }
 0x945   :  { %2408 = vsyncpa [#allocation5], 1 }

</bundles_post_ra>
